<compile_context>
chip_gen: v5e
topology: v5e:2x2
jax: 0.10.0
libtpu: 0.0.40
codegen_flags: <defaults>
</compile_context>

<pallas_src>
import functools

import jax
import jax.numpy as jnp
from jax import lax
from jax.experimental import pallas as pl
from jax.experimental.pallas import tpu as pltpu

EPS = 1e-5  # BatchNorm2d default eps


def _rup(x, m):
    return -(-x // m) * m


def _compiler_params(semantics, block_bytes):
    # Raise the scoped-VMEM limit when the (double-buffered) working set needs it,
    # but never above 64 MiB (v7x physical VMEM per TensorCore).
    vmem = 2 * int(block_bytes) + (4 << 20)
    vmem = max(32 << 20, min(vmem, 64 << 20))
    return pltpu.CompilerParams(dimension_semantics=semantics, vmem_limit_bytes=vmem)


# ---------------------------------------------------------------------------
# Pallas kernels
# ---------------------------------------------------------------------------
def _matmul_bias_act_kernel(x_ref, w_ref, b_ref, o_ref, *, relu):
    """o = [relu]((x @ w) + b); bf16 operands, f32 MXU accumulation."""
    y = jnp.dot(x_ref[...], w_ref[...], preferred_element_type=jnp.float32)
    y = y + b_ref[...]
    if relu:
        y = jnp.maximum(y, 0.0)
    o_ref[...] = y.astype(o_ref.dtype)


def _conv3_downsample_kernel(h_ref, w3_ref, b_ref, xd_ref, wd_ref, o_ref):
    """o = relu(h @ w3 + xd @ wd + b): conv3+bn3 fused with downsample conv+bn + add + relu."""
    y = jnp.dot(h_ref[...], w3_ref[...], preferred_element_type=jnp.float32)
    y = y + jnp.dot(xd_ref[...], wd_ref[...], preferred_element_type=jnp.float32)
    o_ref[...] = jnp.maximum(y + b_ref[...], 0.0).astype(o_ref.dtype)


def _conv3_identity_kernel(h_ref, w3_ref, b_ref, res_ref, o_ref):
    """o = relu(h @ w3 + b + res): conv3+bn3 fused with identity-shortcut add + relu."""
    y = jnp.dot(h_ref[...], w3_ref[...], preferred_element_type=jnp.float32)
    y = y + res_ref[...].astype(jnp.float32)
    o_ref[...] = jnp.maximum(y + b_ref[...], 0.0).astype(o_ref.dtype)


def _conv3x3_bn_relu_kernel(cur_ref, halo_ref, w_ref, b_ref, o_ref, buf_ref, *,
                            th, Wp, Wo, d):
    """Row-strip 3x3 conv (stride 1, padding=dilation) + folded-BN shift + ReLU.

    cur_ref : (1, th, Wp, C)  current output strip's input rows (padded h1, bf16)
    halo_ref: (1, hb, Wp, C)  next rows (only the first 2*d rows are used)
    w_ref   : (9, C, Cout)    bf16 taps, BN scale folded into output channels
    buf_ref : ((th+2d)*Wp + 2d, C) bf16 VMEM scratch; taps are contiguous flat slices.
    """
    C = w_ref.shape[1]
    Cout = w_ref.shape[2]
    R = th * Wp
    Rh = 2 * d * Wp
    # Stage strip + halo once (contiguous row-range stores), plus a tiny zero tail so
    # the last tap's flat slice never runs off the end of the buffer.
    buf_ref[0:R, :] = cur_ref[0].reshape(R, C)
    buf_ref[R:R + Rh, :] = halo_ref[0][:2 * d].reshape(Rh, C)
    buf_ref[R + Rh:R + Rh + 2 * d, :] = jnp.zeros((2 * d, C), buf_ref.dtype)

    acc = jnp.zeros((R, Cout), jnp.float32)
    for ky in range(3):
        for kx in range(3):
            s = (ky * Wp + kx) * d  # flat row offset of this tap's window
            acc = acc + jnp.dot(buf_ref[s:s + R, :], w_ref[ky * 3 + kx],
                                preferred_element_type=jnp.float32)
    y = jnp.maximum(acc + b_ref[...], 0.0).reshape(th, Wp, Cout)
    # Columns >= Wo only ever saw wrapped/garbage taps -> drop them here, once.
    o_ref[0] = y[:, :Wo, :].astype(o_ref.dtype)


# ---------------------------------------------------------------------------
# pallas_call wrappers
# ---------------------------------------------------------------------------
def _pick_tm(M):
    # Prefer large row tiles with >= 4 grid steps (v7x megacore + pipelining),
    # then >= 2, then any dividing tile; otherwise pad rows up to 256.
    for min_steps in (4, 2, 1):
        for tm in (512, 256, 128):
            if M % tm == 0 and M // tm >= min_steps:
                return tm
    for tm in (64, 32, 16, 8):
        if M % tm == 0:
            return tm
    return 256


def _pick_tn(Cout):
    for tn in (512, 384, 256, 128):
        if tn <= Cout and Cout % tn == 0:
            return tn
    return Cout


def _pad_rows(a, Mp):
    M = a.shape[0]
    return a if Mp == M else jnp.pad(a, ((0, Mp - M), (0, 0)))


def matmul_bias_act(x2d, w, b, *, relu, out_dtype):
    """[relu]((x2d @ w) + b), row-tiled. x2d/w bf16, b f32 of shape (1, Cout)."""
    M, K = x2d.shape
    Cout = w.shape[1]
    tm = _pick_tm(M)
    Mp = _rup(M, tm)
    xp = _pad_rows(x2d, Mp)
    blk = tm * K * 2 + K * Cout * 2 + Cout * 4 + tm * Cout * jnp.dtype(out_dtype).itemsize
    out = pl.pallas_call(
        functools.partial(_matmul_bias_act_kernel, relu=relu),
        out_shape=jax.ShapeDtypeStruct((Mp, Cout), out_dtype),
        grid_spec=pltpu.PrefetchScalarGridSpec(
            num_scalar_prefetch=0,
            grid=(Mp // tm,),
            in_specs=[
                pl.BlockSpec((tm, K), lambda i: (i, 0)),
                pl.BlockSpec((K, Cout), lambda i: (0, 0)),
                pl.BlockSpec((1, Cout), lambda i: (0, 0)),
            ],
            out_specs=pl.BlockSpec((tm, Cout), lambda i: (i, 0)),
        ),
        compiler_params=_compiler_params(("parallel",), blk),
    )(xp, w, b)
    return out if Mp == M else out[:M]


def _pick_th(H, dilation):
    """Row-strip height: prefer 8-16 rows dividing H with >= 2 strips."""
    d = dilation
    lo = max(2 * d, min(8, H))
    for th in range(min(16, H), lo - 1, -1):
        if H % th == 0 and H // th >= 2:
            return th, H
    for th in range(min(32, H), lo - 1, -1):
        if H % th == 0:
            return th, H
    th = max(lo, 8)
    return th, _rup(H, th)


def _smallest_divisor_ge(n, m):
    for k in range(m, n + 1):
        if n % k == 0:
            return k
    return n


def conv3x3_bn_relu(h1, w9, b, *, dilation, out_dtype):
    """Stride-1 3x3 conv + BN shift + ReLU, tiled over (batch, H row-strips)."""
    N, H, W, C = h1.shape
    d = dilation
    Cout = w9.shape[-1]
    th, Hc = _pick_th(H, d)
    nstrips = Hc // th
    hb = _smallest_divisor_ge(th, 2 * d)   # halo block height (>= 2*dilation, divides th)
    Hp = Hc + th                            # all leading-dim blocks tile the array exactly
    Wp = W + 2 * d

    # TODO(synk): this spatial zero-pad of h1 is still one extra HBM pass; fusing
    # conv1+bn1+relu into this row-strip kernel would remove it entirely.
    h1p = jnp.pad(h1, ((0, 0), (d, Hp - H - d), (d, d), (0, 0)))

    R = th * Wp
    buf_rows = R + 2 * d * Wp + 2 * d
    ratio = th // hb

    def cur_map(n, i):
        return (n, i, 0, 0)

    def halo_map(n, i):
        return (n, (i + 1) * ratio, 0, 0)

    blk = ((th + hb) * Wp * C * 2 + 9 * C * Cout * 2 + Cout * 4
           + th * W * Cout * jnp.dtype(out_dtype).itemsize + buf_rows * C * 2)

    out = pl.pallas_call(
        functools.partial(_conv3x3_bn_relu_kernel, th=th, Wp=Wp, Wo=W, d=d),
        out_shape=jax.ShapeDtypeStruct((N, Hc, W, Cout), out_dtype),
        grid_spec=pltpu.PrefetchScalarGridSpec(
            num_scalar_prefetch=0,
            grid=(N, nstrips),
            in_specs=[
                pl.BlockSpec((1, th, Wp, C), cur_map),
                pl.BlockSpec((1, hb, Wp, C), halo_map),
                pl.BlockSpec((9, C, Cout), lambda n, i: (0, 0, 0)),
                pl.BlockSpec((1, Cout), lambda n, i: (0, 0)),
            ],
            out_specs=pl.BlockSpec((1, th, W, Cout), lambda n, i: (n, i, 0, 0)),
            scratch_shapes=[pltpu.VMEM((buf_rows, C), jnp.bfloat16)],
        ),
        compiler_params=_compiler_params(("parallel", "parallel"), blk),
    )(h1p, h1p, w9, b)
    return out if Hc == H else out[:, :H]


def conv3_add_relu(h2, w3, b, *, xd=None, wd=None, res=None, out_dtype=jnp.bfloat16):
    """relu(h2 @ w3 + b + (xd @ wd | res)) fully fused; tiled over rows AND Cout."""
    M, K = h2.shape
    Cout = w3.shape[1]
    tm = _pick_tm(M)
    tn = _pick_tn(Cout)
    Mp = _rup(M, tm)
    h2p = _pad_rows(h2, Mp)
    grid = (Mp // tm, Cout // tn)
    osz = jnp.dtype(out_dtype).itemsize
    sem = ("parallel", "parallel")
    if xd is not None:
        Kd = xd.shape[1]
        blk = tm * K * 2 + K * tn * 2 + tn * 4 + tm * Kd * 2 + Kd * tn * 2 + tm * tn * osz
        out = pl.pallas_call(
            _conv3_downsample_kernel,
            out_shape=jax.ShapeDtypeStruct((Mp, Cout), out_dtype),
            grid_spec=pltpu.PrefetchScalarGridSpec(
                num_scalar_prefetch=0,
                grid=grid,
                in_specs=[
                    pl.BlockSpec((tm, K), lambda i, j: (i, 0)),
                    pl.BlockSpec((K, tn), lambda i, j: (0, j)),
                    pl.BlockSpec((1, tn), lambda i, j: (0, j)),
                    pl.BlockSpec((tm, Kd), lambda i, j: (i, 0)),
                    pl.BlockSpec((Kd, tn), lambda i, j: (0, j)),
                ],
                out_specs=pl.BlockSpec((tm, tn), lambda i, j: (i, j)),
            ),
            compiler_params=_compiler_params(sem, blk),
        )(h2p, w3, b, _pad_rows(xd, Mp), wd)
    else:
        blk = tm * K * 2 + K * tn * 2 + tn * 4 + tm * tn * 2 + tm * tn * osz
        out = pl.pallas_call(
            _conv3_identity_kernel,
            out_shape=jax.ShapeDtypeStruct((Mp, Cout), out_dtype),
            grid_spec=pltpu.PrefetchScalarGridSpec(
                num_scalar_prefetch=0,
                grid=grid,
                in_specs=[
                    pl.BlockSpec((tm, K), lambda i, j: (i, 0)),
                    pl.BlockSpec((K, tn), lambda i, j: (0, j)),
                    pl.BlockSpec((1, tn), lambda i, j: (0, j)),
                    pl.BlockSpec((tm, tn), lambda i, j: (i, j)),
                ],
                out_specs=pl.BlockSpec((tm, tn), lambda i, j: (i, j)),
            ),
            compiler_params=_compiler_params(sem, blk),
        )(h2p, w3, b, _pad_rows(res, Mp))
    return out if Mp == M else out[:M]


# ---------------------------------------------------------------------------
# Glue: BN folding, channel padding, im2col fallback for strided 3x3
# ---------------------------------------------------------------------------
def _bn_fold(gamma, beta, mean, var):
    scale = gamma / jnp.sqrt(var + EPS)
    shift = beta - mean * scale
    return scale, shift


def _pad_axis(a, axis, size):
    if a.shape[axis] == size:
        return a
    pad = [(0, 0)] * a.ndim
    pad[axis] = (0, size - a.shape[axis])
    return jnp.pad(a, pad)


def _prep_params(p, Cin, Cmid, Cout, Cin_p, Cmid_p, Cout_p, has_downsample):
    """Fold BN scale into bf16 weights, keep f32 shifts; zero-pad channels to 128-mult."""
    s1, b1 = _bn_fold(p["g1"], p["b1"], p["m1"], p["v1"])
    s2, b2 = _bn_fold(p["g2"], p["b2"], p["m2"], p["v2"])
    s3, b3 = _bn_fold(p["g3"], p["b3"], p["m3"], p["v3"])

    w1 = jnp.pad(p["w1"] * s1[None, :],
                 ((0, Cin_p - Cin), (0, Cmid_p - Cmid))).astype(jnp.bfloat16)
    b1p = jnp.pad(b1, (0, Cmid_p - Cmid)).reshape(1, Cmid_p).astype(jnp.float32)

    w2 = jnp.pad(p["w2"] * s2[None, None, None, :],
                 ((0, 0), (0, 0), (0, Cmid_p - Cmid), (0, Cmid_p - Cmid)))
    w2_9 = w2.reshape(9, Cmid_p, Cmid_p).astype(jnp.bfloat16)
    b2p = jnp.pad(b2, (0, Cmid_p - Cmid)).reshape(1, Cmid_p).astype(jnp.float32)

    w3 = jnp.pad(p["w3"] * s3[None, :],
                 ((0, Cmid_p - Cmid), (0, Cout_p - Cout))).astype(jnp.bfloat16)
    b3p = jnp.pad(b3, (0, Cout_p - Cout)).reshape(1, Cout_p).astype(jnp.float32)

    q = dict(w1=w1, b1=b1p, w2=w2_9, b2=b2p, w3=w3, b3=b3p)
    if has_downsample:
        sd, bd = _bn_fold(p["gd"], p["bd"], p["md"], p["vd"])
        q["wd"] = jnp.pad(p["wd"] * sd[None, :],
                          ((0, Cin_p - Cin), (0, Cout_p - Cout))).astype(jnp.bfloat16)
        q["bd"] = jnp.pad(bd, (0, Cout_p - Cout)).reshape(1, Cout_p).astype(jnp.float32)
    return q


def _im2col_3x3(x_nhwc, stride, dilation):
    """im2col fallback (only used for stride > 1); returns (N*Ho*Wo, 9*C)."""
    N, H, W, C = x_nhwc.shape
    pad = dilation
    xp = jnp.pad(x_nhwc, ((0, 0), (pad, pad), (pad, pad), (0, 0)))
    Ho = (H + 2 * pad - dilation * 2 - 1) // stride + 1
    Wo = (W + 2 * pad - dilation * 2 - 1) // stride + 1
    cols = []
    for ky in range(3):
        for kx in range(3):
            patch = xp[:,
                       ky * dilation: ky * dilation + (Ho - 1) * stride + 1: stride,
                       kx * dilation: kx * dilation + (Wo - 1) * stride + 1: stride,
                       :]
            cols.append(patch)
    cols = jnp.concatenate(cols, axis=-1)
    return cols.reshape(N * Ho * Wo, 9 * C), Ho, Wo


# ---------------------------------------------------------------------------
# Forward pass
# ---------------------------------------------------------------------------
def resnet_bn_block_forward_nhwc(x_nhwc, p, stride=1, dilation=1):
    """ResNetBNBlock.forward, NHWC-native hot path (norm_before=True, groups=1)."""
    # TODO(synk): groups>1, Dropout2d (dropout_rate>0), norm_before=False and
    # training-mode batch statistics are not implemented (inference running stats only).
    N, H, W, Cin = x_nhwc.shape
    Cmid = p["w1"].shape[1]
    Cout = p["w3"].shape[1]
    Cin_p, Cmid_p, Cout_p = _rup(Cin, 128), _rup(Cmid, 128), _rup(Cout, 128)
    has_downsample = (stride != 1) or (Cin != Cout)

    q = _prep_params(p, Cin, Cmid, Cout, Cin_p, Cmid_p, Cout_p, has_downsample)

    # zero-pad channels to a lane-dense 128-multiple and cast to bf16 once
    x_p = _pad_axis(x_nhwc, -1, Cin_p).astype(jnp.bfloat16)          # (N, H, W, Cin_p)

    # conv1 (1x1) + bn1 + relu
    h1 = matmul_bias_act(x_p.reshape(N * H * W, Cin_p), q["w1"], q["b1"],
                         relu=True, out_dtype=jnp.bfloat16)
    h1 = h1.reshape(N, H, W, Cmid_p)

    # conv2 (3x3, padding=dilation) + bn2 + relu
    if stride == 1:
        h2 = conv3x3_bn_relu(h1, q["w2"], q["b2"], dilation=dilation,
                             out_dtype=jnp.bfloat16)
        Ho, Wo = H, W
        h2_2d = h2.reshape(N * Ho * Wo, Cmid_p)
    else:
        # TODO(synk): stride>1 still falls back to an im2col matmul through HBM; an
        # in-kernel strided row-strip conv would avoid the 9x activation expansion.
        cols, Ho, Wo = _im2col_3x3(h1, stride, dilation)
        h2_2d = matmul_bias_act(cols, q["w2"].reshape(9 * Cmid_p, Cmid_p), q["b2"],
                                relu=True, out_dtype=jnp.bfloat16)

    # conv3 (1x1) + bn3 + residual (+ downsample conv/bn) + relu, fused in one kernel
    M2 = N * Ho * Wo
    if has_downsample:
        # TODO(synk): the strided subsample of x for the downsample is wrapper glue
        # (XLA slice); it could be moved into the fused kernel with a strided DMA.
        xd = x_p[:, ::stride, ::stride, :].reshape(M2, Cin_p)
        out2d = conv3_add_relu(h2_2d, q["w3"], q["b3"] + q["bd"],
                               xd=xd, wd=q["wd"], out_dtype=jnp.bfloat16)
    else:
        # NOTE: residual is added from the bf16 copy of x (reference adds f32 x);
        # difference is within bf16 rounding and covered by the test tolerance.
        res = x_p.reshape(M2, Cout_p)                    # Cin_p == Cout_p here
        out2d = conv3_add_relu(h2_2d, q["w3"], q["b3"], res=res,
                               out_dtype=jnp.bfloat16)

    return out2d[:, :Cout].reshape(N, Ho, Wo, Cout)


def resnet_bn_block_forward(x_nchw, p, stride=1, dilation=1):
    """NCHW public interface matching the PyTorch module (hot path is NHWC internally)."""
    x = jnp.transpose(x_nchw, (0, 2, 3, 1))
    out = resnet_bn_block_forward_nhwc(x, p, stride=stride, dilation=dilation)
    return jnp.transpose(out, (0, 3, 1, 2)).astype(jnp.float32)


# ---------------------------------------------------------------------------
# Pure-JAX f32 reference (semantic ground truth)
# ---------------------------------------------------------------------------
def reference_forward(x_nchw, p, stride=1, dilation=1):
    x = jnp.transpose(x_nchw, (0, 2, 3, 1))
    Cin = x.shape[-1]
    Cout = p["w3"].shape[1]

    def bn(y, g, b, m, v):
        return (y - m) / jnp.sqrt(v + EPS) * g + b

    h = jnp.einsum("nhwc,cd->nhwd", x, p["w1"])
    h = jax.nn.relu(bn(h, p["g1"], p["b1"], p["m1"], p["v1"]))
    h = lax.conv_general_dilated(
        h, p["w2"], (stride, stride),
        [(dilation, dilation), (dilation, dilation)],
        rhs_dilation=(dilation, dilation),
        dimension_numbers=("NHWC", "HWIO", "NHWC"))
    h = jax.nn.relu(bn(h, p["g2"], p["b2"], p["m2"], p["v2"]))
    h = jnp.einsum("nhwc,cd->nhwd", h, p["w3"])
    h = bn(h, p["g3"], p["b3"], p["m3"], p["v3"])
    if stride != 1 or Cin != Cout:
        res = jnp.einsum("nhwc,cd->nhwd", x[:, ::stride, ::stride, :], p["wd"])
        res = bn(res, p["gd"], p["bd"], p["md"], p["vd"])
    else:
        res = x
    out = jax.nn.relu(h + res)
    return jnp.transpose(out, (0, 3, 1, 2))


# ---------------------------------------------------------------------------
# Deterministic parameter init (shapes from ResNetBNBlock.__init__, expansion=4)
# ---------------------------------------------------------------------------
def init_params(key, in_channels, channels, expansion=4):
    Cout = channels * expansion
    ks = list(jax.random.split(key, 16))

    def bn_params(k, c):
        k1, k2, k3, k4 = jax.random.split(k, 4)
        gamma = 1.0 + 0.1 * jax.random.normal(k1, (c,), jnp.float32)
        beta = 0.1 * jax.random.normal(k2, (c,), jnp.float32)
        mean = 0.1 * jax.random.normal(k3, (c,), jnp.float32)
        var = 0.5 + jax.random.uniform(k4, (c,), jnp.float32)
        return gamma, beta, mean, var

    p = {}
    p["w1"] = 0.2 * jax.random.normal(ks[0], (in_channels, channels), jnp.float32)      # 1x1
    p["w2"] = 0.2 * jax.random.normal(ks[1], (3, 3, channels, channels), jnp.float32)   # 3x3 HWIO
    p["w3"] = 0.2 * jax.random.normal(ks[2], (channels, Cout), jnp.float32)             # 1x1
    p["wd"] = 0.2 * jax.random.normal(ks[3], (in_channels, Cout), jnp.float32)          # downsample 1x1
    p["g1"], p["b1"], p["m1"], p["v1"] = bn_params(ks[4], channels)
    p["g2"], p["b2"], p["m2"], p["v2"] = bn_params(ks[5], channels)
    p["g3"], p["b3"], p["m3"], p["v3"] = bn_params(ks[6], Cout)
    p["gd"], p["bd"], p["md"], p["vd"] = bn_params(ks[7], Cout)
    return p


if __name__ == "__main__":
    fwd = jax.jit(resnet_bn_block_forward, static_argnames=("stride", "dilation"))

    def check(name, in_channels, channels, N, H, W, stride, dilation, salt):
        k = jax.random.fold_in(jax.random.PRNGKey(0), salt)
        kx, kp = jax.random.split(k)
        x = jax.random.normal(kx, (N, in_channels, H, W), jnp.float32)   # NCHW like PyTorch
        params = init_params(kp, in_channels, channels)
        out = jax.block_until_ready(fwd(x, params, stride=stride, dilation=dilation))
        ref = reference_forward(x, params, stride=stride, dilation=dilation)
        assert out.shape == ref.shape, (name, out.shape, ref.shape)
        max_err = float(jnp.max(jnp.abs(out - ref)))
        # bf16 MXU operands / intermediates / output with f32 accumulation
        assert jnp.allclose(out, ref, atol=5e-2, rtol=5e-2), f"{name}: max abs err {max_err}"

    # projection shortcut (Cin != Cout), stride 1 -- main configuration
    check("projection", 4, 4, 2, 16, 16, 1, 1, 0)
    # identity shortcut (Cin == Cout == channels*4), dilation 2
    check("identity", 16, 4, 2, 16, 16, 1, 2, 1)
    # strided block (downsample by 2) -- exercises the im2col fallback path
    check("strided", 4, 4, 2, 16, 16, 2, 1, 2)

    print("KERNEL_OK")
</pallas_src>

<mosaic_0001>
module attributes {stable_mosaic.version = 11 : i64} {
  func.func @_matmul_bias_act_kernel(%arg0: i32, %arg1: memref<128x128xbf16, #tpu.memory_space<vmem>>, %arg2: memref<128x128xbf16, #tpu.memory_space<vmem>>, %arg3: memref<1x128xf32, #tpu.memory_space<vmem>>, %arg4: memref<128x128xbf16, #tpu.memory_space<vmem>>) attributes {dimension_semantics = [#tpu.dimension_semantics<parallel>], iteration_bounds = array<i64: 4>, scalar_prefetch = 0 : i64, scratch_operands = 0 : i64, tpu.core_type = #tpu.core_type<tc>, window_params = [{transform_indices = @transform_0, window_bounds = array<i64: 128, 128>}, {pipeline_mode = #tpu.pipeline_mode<synchronous>, transform_indices = @transform_1, window_bounds = array<i64: 128, 128>}, {pipeline_mode = #tpu.pipeline_mode<synchronous>, transform_indices = @transform_2, window_bounds = array<i64: 1, 128>}, {transform_indices = @transform_3, window_bounds = array<i64: 128, 128>}]} {
    %c0 = arith.constant 0 : index
    %c0_0 = arith.constant 0 : index
    %0 = vector.load %arg1[%c0, %c0_0] : memref<128x128xbf16, #tpu.memory_space<vmem>>, vector<128x128xbf16>
    %c0_1 = arith.constant 0 : index
    %c0_2 = arith.constant 0 : index
    %1 = vector.load %arg2[%c0_1, %c0_2] : memref<128x128xbf16, #tpu.memory_space<vmem>>, vector<128x128xbf16>
    %cst = arith.constant dense<0.000000e+00> : vector<128x128xf32>
    %2 = tpu.matmul %0, %1, %cst {dimension_numbers = #tpu.dot_dimension_numbers<[1], [0], [0], [1], [0, 0, 1, 1], [], []>} : vector<128x128xbf16>, vector<128x128xbf16>, vector<128x128xf32> -> vector<128x128xf32>
    %c0_3 = arith.constant 0 : index
    %c0_4 = arith.constant 0 : index
    %3 = vector.load %arg3[%c0_3, %c0_4] : memref<1x128xf32, #tpu.memory_space<vmem>>, vector<1x128xf32>
    %4 = vector.broadcast %3 : vector<1x128xf32> to vector<128x128xf32>
    %5 = arith.addf %2, %4 : vector<128x128xf32>
    %cst_5 = arith.constant 0.000000e+00 : f32
    %6 = vector.broadcast %cst_5 : f32 to vector<128x128xf32>
    %7 = arith.maximumf %5, %6 : vector<128x128xf32>
    %8 = arith.truncf %7 : vector<128x128xf32> to vector<128x128xbf16>
    %c0_6 = arith.constant 0 : index
    %c0_7 = arith.constant 0 : index
    %9 = vector.load %arg4[%c0_6, %c0_7] : memref<128x128xbf16, #tpu.memory_space<vmem>>, vector<128x128xbf16>
    tpu.vector_store %arg4[%c0_6, %c0_7], %8 {strides = array<i32>} : memref<128x128xbf16, #tpu.memory_space<vmem>>, vector<128x128xbf16>,
    return
  }
  func.func @transform_0(%arg0: i32) -> (i32, i32) {
    %c0_i32 = arith.constant 0 : i32
    %c0_i32_0 = arith.constant 0 : i32
    return %arg0, %c0_i32 : i32, i32
  }
  func.func @transform_1(%arg0: i32) -> (i32, i32) {
    %c0_i32 = arith.constant 0 : i32
    %c0_i32_0 = arith.constant 0 : i32
    %c0_i32_1 = arith.constant 0 : i32
    return %c0_i32, %c0_i32_0 : i32, i32
  }
  func.func @transform_2(%arg0: i32) -> (i32, i32) {
    %c0_i32 = arith.constant 0 : i32
    %c0_i32_0 = arith.constant 0 : i32
    %c0_i32_1 = arith.constant 0 : i32
    return %c0_i32, %c0_i32_0 : i32, i32
  }
  func.func @transform_3(%arg0: i32) -> (i32, i32) {
    %c0_i32 = arith.constant 0 : i32
    %c0_i32_0 = arith.constant 0 : i32
    return %arg0, %c0_i32 : i32, i32
  }
}

module attributes {stable_mosaic.version = 11 : i64} {
  func.func @_conv3x3_bn_relu_kernel(%arg0: i32, %arg1: i32, %arg2: memref<1x8x18x128xbf16, #tpu.memory_space<vmem>>, %arg3: memref<1x2x18x128xbf16, #tpu.memory_space<vmem>>, %arg4: memref<9x128x128xbf16, #tpu.memory_space<vmem>>, %arg5: memref<1x128xf32, #tpu.memory_space<vmem>>, %arg6: memref<1x8x16x128xbf16, #tpu.memory_space<vmem>>, %arg7: memref<182x128xbf16, #tpu.memory_space<vmem>>) attributes {dimension_semantics = [#tpu.dimension_semantics<parallel>, #tpu.dimension_semantics<parallel>], iteration_bounds = array<i64: 2, 2>, scalar_prefetch = 0 : i64, scratch_operands = 1 : i64, tpu.core_type = #tpu.core_type<tc>, window_params = [{transform_indices = @transform_0, window_bounds = array<i64: 1, 8, 18, 128>}, {transform_indices = @transform_1, window_bounds = array<i64: 1, 2, 18, 128>}, {pipeline_mode = #tpu.pipeline_mode<synchronous>, transform_indices = @transform_2, window_bounds = array<i64: 9, 128, 128>}, {pipeline_mode = #tpu.pipeline_mode<synchronous>, transform_indices = @transform_3, window_bounds = array<i64: 1, 128>}, {transform_indices = @transform_4, window_bounds = array<i64: 1, 8, 16, 128>}]} {
    %c0 = arith.constant 0 : index
    %c0_0 = arith.constant 0 : index
    %c0_1 = arith.constant 0 : index
    %c0_2 = arith.constant 0 : index
    %0 = vector.load %arg2[%c0, %c0_0, %c0_1, %c0_2] : memref<1x8x18x128xbf16, #tpu.memory_space<vmem>>, vector<1x8x18x128xbf16>
    %1 = vector.shape_cast %0 : vector<1x8x18x128xbf16> to vector<8x18x128xbf16>
    %2 = vector.shape_cast %1 : vector<8x18x128xbf16> to vector<144x128xbf16>
    %c0_3 = arith.constant 0 : index
    %c0_4 = arith.constant 0 : index
    %3 = vector.load %arg7[%c0_3, %c0_4] : memref<182x128xbf16, #tpu.memory_space<vmem>>, vector<144x128xbf16>
    tpu.vector_store %arg7[%c0_3, %c0_4], %2 {strides = array<i32>} : memref<182x128xbf16, #tpu.memory_space<vmem>>, vector<144x128xbf16>,
    %c0_5 = arith.constant 0 : index
    %c0_6 = arith.constant 0 : index
    %c0_7 = arith.constant 0 : index
    %c0_8 = arith.constant 0 : index
    %4 = vector.load %arg3[%c0_5, %c0_6, %c0_7, %c0_8] : memref<1x2x18x128xbf16, #tpu.memory_space<vmem>>, vector<1x2x18x128xbf16>
    %5 = vector.shape_cast %4 : vector<1x2x18x128xbf16> to vector<2x18x128xbf16>
    %6 = vector.shape_cast %5 : vector<2x18x128xbf16> to vector<36x128xbf16>
    %c144 = arith.constant 144 : index
    %c0_9 = arith.constant 0 : index
    %7 = vector.load %arg7[%c144, %c0_9] : memref<182x128xbf16, #tpu.memory_space<vmem>>, vector<36x128xbf16>
    tpu.vector_store %arg7[%c144, %c0_9], %6 {strides = array<i32>} : memref<182x128xbf16, #tpu.memory_space<vmem>>, vector<36x128xbf16>,
    %cst = arith.constant 0.000000e+00 : bf16
    %8 = vector.broadcast %cst : bf16 to vector<2x128xbf16>
    %c180 = arith.constant 180 : index
    %c0_10 = arith.constant 0 : index
    %9 = vector.load %arg7[%c180, %c0_10] : memref<182x128xbf16, #tpu.memory_space<vmem>>, vector<2x128xbf16>
    tpu.vector_store %arg7[%c180, %c0_10], %8 {strides = array<i32>} : memref<182x128xbf16, #tpu.memory_space<vmem>>, vector<2x128xbf16>,
    %cst_11 = arith.constant 0.000000e+00 : f32
    %10 = vector.broadcast %cst_11 : f32 to vector<144x128xf32>
    %c0_12 = arith.constant 0 : index
    %c0_13 = arith.constant 0 : index
    %11 = vector.load %arg7[%c0_12, %c0_13] : memref<182x128xbf16, #tpu.memory_space<vmem>>, vector<144x128xbf16>
    %c0_14 = arith.constant 0 : index
    %c0_15 = arith.constant 0 : index
    %c0_16 = arith.constant 0 : index
    %12 = vector.load %arg4[%c0_14, %c0_15, %c0_16] : memref<9x128x128xbf16, #tpu.memory_space<vmem>>, vector<1x128x128xbf16>
    %13 = vector.shape_cast %12 : vector<1x128x128xbf16> to vector<128x128xbf16>
    %cst_17 = arith.constant dense<0.000000e+00> : vector<144x128xf32>
    %14 = tpu.matmul %11, %13, %cst_17 {dimension_numbers = #tpu.dot_dimension_numbers<[1], [0], [0], [1], [0, 0, 1, 1], [], []>} : vector<144x128xbf16>, vector<128x128xbf16>, vector<144x128xf32> -> vector<144x128xf32>
    %15 = arith.addf %10, %14 : vector<144x128xf32>
    %c1 = arith.constant 1 : index
    %c0_18 = arith.constant 0 : index
    %16 = vector.load %arg7[%c1, %c0_18] : memref<182x128xbf16, #tpu.memory_space<vmem>>, vector<144x128xbf16>
    %c1_19 = arith.constant 1 : index
    %c0_20 = arith.constant 0 : index
    %c0_21 = arith.constant 0 : index
    %17 = vector.load %arg4[%c1_19, %c0_20, %c0_21] : memref<9x128x128xbf16, #tpu.memory_space<vmem>>, vector<1x128x128xbf16>
    %18 = vector.shape_cast %17 : vector<1x128x128xbf16> to vector<128x128xbf16>
    %cst_22 = arith.constant dense<0.000000e+00> : vector<144x128xf32>
    %19 = tpu.matmul %16, %18, %cst_22 {dimension_numbers = #tpu.dot_dimension_numbers<[1], [0], [0], [1], [0, 0, 1, 1], [], []>} : vector<144x128xbf16>, vector<128x128xbf16>, vector<144x128xf32> -> vector<144x128xf32>
    %20 = arith.addf %15, %19 : vector<144x128xf32>
    %c2 = arith.constant 2 : index
    %c0_23 = arith.constant 0 : index
    %21 = vector.load %arg7[%c2, %c0_23] : memref<182x128xbf16, #tpu.memory_space<vmem>>, vector<144x128xbf16>
    %c2_24 = arith.constant 2 : index
    %c0_25 = arith.constant 0 : index
    %c0_26 = arith.constant 0 : index
    %22 = vector.load %arg4[%c2_24, %c0_25, %c0_26] : memref<9x128x128xbf16, #tpu.memory_space<vmem>>, vector<1x128x128xbf16>
    %23 = vector.shape_cast %22 : vector<1x128x128xbf16> to vector<128x128xbf16>
    %cst_27 = arith.constant dense<0.000000e+00> : vector<144x128xf32>
    %24 = tpu.matmul %21, %23, %cst_27 {dimension_numbers = #tpu.dot_dimension_numbers<[1], [0], [0], [1], [0, 0, 1, 1], [], []>} : vector<144x128xbf16>, vector<128x128xbf16>, vector<144x128xf32> -> vector<144x128xf32>
    %25 = arith.addf %20, %24 : vector<144x128xf32>
    %c18 = arith.constant 18 : index
    %c0_28 = arith.constant 0 : index
    %26 = vector.load %arg7[%c18, %c0_28] : memref<182x128xbf16, #tpu.memory_space<vmem>>, vector<144x128xbf16>
    %c3 = arith.constant 3 : index
    %c0_29 = arith.constant 0 : index
    %c0_30 = arith.constant 0 : index
    %27 = vector.load %arg4[%c3, %c0_29, %c0_30] : memref<9x128x128xbf16, #tpu.memory_space<vmem>>, vector<1x128x128xbf16>
    %28 = vector.shape_cast %27 : vector<1x128x128xbf16> to vector<128x128xbf16>
    %cst_31 = arith.constant dense<0.000000e+00> : vector<144x128xf32>
    %29 = tpu.matmul %26, %28, %cst_31 {dimension_numbers = #tpu.dot_dimension_numbers<[1], [0], [0], [1], [0, 0, 1, 1], [], []>} : vector<144x128xbf16>, vector<128x128xbf16>, vector<144x128xf32> -> vector<144x128xf32>
    %30 = arith.addf %25, %29 : vector<144x128xf32>
    %c19 = arith.constant 19 : index
    %c0_32 = arith.constant 0 : index
    %31 = vector.load %arg7[%c19, %c0_32] : memref<182x128xbf16, #tpu.memory_space<vmem>>, vector<144x128xbf16>
    %c4 = arith.constant 4 : index
    %c0_33 = arith.constant 0 : index
    %c0_34 = arith.constant 0 : index
    %32 = vector.load %arg4[%c4, %c0_33, %c0_34] : memref<9x128x128xbf16, #tpu.memory_space<vmem>>, vector<1x128x128xbf16>
    %33 = vector.shape_cast %32 : vector<1x128x128xbf16> to vector<128x128xbf16>
    %cst_35 = arith.constant dense<0.000000e+00> : vector<144x128xf32>
    %34 = tpu.matmul %31, %33, %cst_35 {dimension_numbers = #tpu.dot_dimension_numbers<[1], [0], [0], [1], [0, 0, 1, 1], [], []>} : vector<144x128xbf16>, vector<128x128xbf16>, vector<144x128xf32> -> vector<144x128xf32>
    %35 = arith.addf %30, %34 : vector<144x128xf32>
    %c20 = arith.constant 20 : index
    %c0_36 = arith.constant 0 : index
    %36 = vector.load %arg7[%c20, %c0_36] : memref<182x128xbf16, #tpu.memory_space<vmem>>, vector<144x128xbf16>
    %c5 = arith.constant 5 : index
    %c0_37 = arith.constant 0 : index
    %c0_38 = arith.constant 0 : index
    %37 = vector.load %arg4[%c5, %c0_37, %c0_38] : memref<9x128x128xbf16, #tpu.memory_space<vmem>>, vector<1x128x128xbf16>
    %38 = vector.shape_cast %37 : vector<1x128x128xbf16> to vector<128x128xbf16>
    %cst_39 = arith.constant dense<0.000000e+00> : vector<144x128xf32>
    %39 = tpu.matmul %36, %38, %cst_39 {dimension_numbers = #tpu.dot_dimension_numbers<[1], [0], [0], [1], [0, 0, 1, 1], [], []>} : vector<144x128xbf16>, vector<128x128xbf16>, vector<144x128xf32> -> vector<144x128xf32>
    %40 = arith.addf %35, %39 : vector<144x128xf32>
    %c36 = arith.constant 36 : index
    %c0_40 = arith.constant 0 : index
    %41 = vector.load %arg7[%c36, %c0_40] : memref<182x128xbf16, #tpu.memory_space<vmem>>, vector<144x128xbf16>
    %c6 = arith.constant 6 : index
    %c0_41 = arith.constant 0 : index
    %c0_42 = arith.constant 0 : index
    %42 = vector.load %arg4[%c6, %c0_41, %c0_42] : memref<9x128x128xbf16, #tpu.memory_space<vmem>>, vector<1x128x128xbf16>
    %43 = vector.shape_cast %42 : vector<1x128x128xbf16> to vector<128x128xbf16>
    %cst_43 = arith.constant dense<0.000000e+00> : vector<144x128xf32>
    %44 = tpu.matmul %41, %43, %cst_43 {dimension_numbers = #tpu.dot_dimension_numbers<[1], [0], [0], [1], [0, 0, 1, 1], [], []>} : vector<144x128xbf16>, vector<128x128xbf16>, vector<144x128xf32> -> vector<144x128xf32>
    %45 = arith.addf %40, %44 : vector<144x128xf32>
    %c37 = arith.constant 37 : index
    %c0_44 = arith.constant 0 : index
    %46 = vector.load %arg7[%c37, %c0_44] : memref<182x128xbf16, #tpu.memory_space<vmem>>, vector<144x128xbf16>
    %c7 = arith.constant 7 : index
    %c0_45 = arith.constant 0 : index
    %c0_46 = arith.constant 0 : index
    %47 = vector.load %arg4[%c7, %c0_45, %c0_46] : memref<9x128x128xbf16, #tpu.memory_space<vmem>>, vector<1x128x128xbf16>
    %48 = vector.shape_cast %47 : vector<1x128x128xbf16> to vector<128x128xbf16>
    %cst_47 = arith.constant dense<0.000000e+00> : vector<144x128xf32>
    %49 = tpu.matmul %46, %48, %cst_47 {dimension_numbers = #tpu.dot_dimension_numbers<[1], [0], [0], [1], [0, 0, 1, 1], [], []>} : vector<144x128xbf16>, vector<128x128xbf16>, vector<144x128xf32> -> vector<144x128xf32>
    %50 = arith.addf %45, %49 : vector<144x128xf32>
    %c38 = arith.constant 38 : index
    %c0_48 = arith.constant 0 : index
    %51 = vector.load %arg7[%c38, %c0_48] : memref<182x128xbf16, #tpu.memory_space<vmem>>, vector<144x128xbf16>
    %c8 = arith.constant 8 : index
    %c0_49 = arith.constant 0 : index
    %c0_50 = arith.constant 0 : index
    %52 = vector.load %arg4[%c8, %c0_49, %c0_50] : memref<9x128x128xbf16, #tpu.memory_space<vmem>>, vector<1x128x128xbf16>
    %53 = vector.shape_cast %52 : vector<1x128x128xbf16> to vector<128x128xbf16>
    %cst_51 = arith.constant dense<0.000000e+00> : vector<144x128xf32>
    %54 = tpu.matmul %51, %53, %cst_51 {dimension_numbers = #tpu.dot_dimension_numbers<[1], [0], [0], [1], [0, 0, 1, 1], [], []>} : vector<144x128xbf16>, vector<128x128xbf16>, vector<144x128xf32> -> vector<144x128xf32>
    %55 = arith.addf %50, %54 : vector<144x128xf32>
    %c0_52 = arith.constant 0 : index
    %c0_53 = arith.constant 0 : index
    %56 = vector.load %arg5[%c0_52, %c0_53] : memref<1x128xf32, #tpu.memory_space<vmem>>, vector<1x128xf32>
    %57 = vector.broadcast %56 : vector<1x128xf32> to vector<144x128xf32>
    %58 = arith.addf %55, %57 : vector<144x128xf32>
    %cst_54 = arith.constant 0.000000e+00 : f32
    %59 = vector.broadcast %cst_54 : f32 to vector<144x128xf32>
    %60 = arith.maximumf %58, %59 : vector<144x128xf32>
    %61 = vector.shape_cast %60 : vector<144x128xf32> to vector<8x18x128xf32>
    %62 = vector.extract_strided_slice %61 {offsets = [0, 0, 0], sizes = [8, 16, 128], strides = [1, 1, 1]} : vector<8x18x128xf32> to vector<8x16x128xf32>
    %63 = arith.truncf %62 : vector<8x16x128xf32> to vector<8x16x128xbf16>
    %c0_55 = arith.constant 0 : index
    %c0_56 = arith.constant 0 : index
    %c0_57 = arith.constant 0 : index
    %c0_58 = arith.constant 0 : index
    %64 = vector.load %arg6[%c0_55, %c0_56, %c0_57, %c0_58] : memref<1x8x16x128xbf16, #tpu.memory_space<vmem>>, vector<1x8x16x128xbf16>
    %65 = vector.shape_cast %64 : vector<1x8x16x128xbf16> to vector<8x16x128xbf16>
    %66 = vector.shape_cast %63 : vector<8x16x128xbf16> to vector<1x8x16x128xbf16>
    tpu.vector_store %arg6[%c0_55, %c0_56, %c0_57, %c0_58], %66 {strides = array<i32>} : memref<1x8x16x128xbf16, #tpu.memory_space<vmem>>, vector<1x8x16x128xbf16>,
    return
  }
  func.func @transform_0(%arg0: i32, %arg1: i32) -> (i32, i32, i32, i32) {
    %c0_i32 = arith.constant 0 : i32
    %c0_i32_0 = arith.constant 0 : i32
    %c0_i32_1 = arith.constant 0 : i32
    return %arg0, %arg1, %c0_i32, %c0_i32_0 : i32, i32, i32, i32
  }
  func.func @transform_1(%arg0: i32, %arg1: i32) -> (i32, i32, i32, i32) {
    %c1_i32 = arith.constant 1 : i32
    %0 = arith.addi %arg1, %c1_i32 : i32
    %c4_i32 = arith.constant 4 : i32
    %1 = arith.muli %0, %c4_i32 : i32
    %c0_i32 = arith.constant 0 : i32
    %c0_i32_0 = arith.constant 0 : i32
    %c0_i32_1 = arith.constant 0 : i32
    return %arg0, %1, %c0_i32, %c0_i32_0 : i32, i32, i32, i32
  }
  func.func @transform_2(%arg0: i32, %arg1: i32) -> (i32, i32, i32) {
    %c0_i32 = arith.constant 0 : i32
    %c0_i32_0 = arith.constant 0 : i32
    %c0_i32_1 = arith.constant 0 : i32
    %c0_i32_2 = arith.constant 0 : i32
    return %c0_i32, %c0_i32_0, %c0_i32_1 : i32, i32, i32
  }
  func.func @transform_3(%arg0: i32, %arg1: i32) -> (i32, i32) {
    %c0_i32 = arith.constant 0 : i32
    %c0_i32_0 = arith.constant 0 : i32
    %c0_i32_1 = arith.constant 0 : i32
    return %c0_i32, %c0_i32_0 : i32, i32
  }
  func.func @transform_4(%arg0: i32, %arg1: i32) -> (i32, i32, i32, i32) {
    %c0_i32 = arith.constant 0 : i32
    %c0_i32_0 = arith.constant 0 : i32
    %c0_i32_1 = arith.constant 0 : i32
    return %arg0, %arg1, %c0_i32, %c0_i32_0 : i32, i32, i32, i32
  }
}

module attributes {stable_mosaic.version = 11 : i64} {
  func.func @_conv3_downsample_kernel(%arg0: i32, %arg1: i32, %arg2: memref<128x128xbf16, #tpu.memory_space<vmem>>, %arg3: memref<128x128xbf16, #tpu.memory_space<vmem>>, %arg4: memref<1x128xf32, #tpu.memory_space<vmem>>, %arg5: memref<128x128xbf16, #tpu.memory_space<vmem>>, %arg6: memref<128x128xbf16, #tpu.memory_space<vmem>>, %arg7: memref<128x128xbf16, #tpu.memory_space<vmem>>) attributes {dimension_semantics = [#tpu.dimension_semantics<parallel>, #tpu.dimension_semantics<parallel>], iteration_bounds = array<i64: 4, 1>, scalar_prefetch = 0 : i64, scratch_operands = 0 : i64, tpu.core_type = #tpu.core_type<tc>, window_params = [{transform_indices = @transform_0, window_bounds = array<i64: 128, 128>}, {transform_indices = @transform_1, window_bounds = array<i64: 128, 128>}, {transform_indices = @transform_2, window_bounds = array<i64: 1, 128>}, {transform_indices = @transform_3, window_bounds = array<i64: 128, 128>}, {transform_indices = @transform_4, window_bounds = array<i64: 128, 128>}, {transform_indices = @transform_5, window_bounds = array<i64: 128, 128>}]} {
    %c0 = arith.constant 0 : index
    %c0_0 = arith.constant 0 : index
    %0 = vector.load %arg2[%c0, %c0_0] : memref<128x128xbf16, #tpu.memory_space<vmem>>, vector<128x128xbf16>
    %c0_1 = arith.constant 0 : index
    %c0_2 = arith.constant 0 : index
    %1 = vector.load %arg3[%c0_1, %c0_2] : memref<128x128xbf16, #tpu.memory_space<vmem>>, vector<128x128xbf16>
    %cst = arith.constant dense<0.000000e+00> : vector<128x128xf32>
    %2 = tpu.matmul %0, %1, %cst {dimension_numbers = #tpu.dot_dimension_numbers<[1], [0], [0], [1], [0, 0, 1, 1], [], []>} : vector<128x128xbf16>, vector<128x128xbf16>, vector<128x128xf32> -> vector<128x128xf32>
    %c0_3 = arith.constant 0 : index
    %c0_4 = arith.constant 0 : index
    %3 = vector.load %arg5[%c0_3, %c0_4] : memref<128x128xbf16, #tpu.memory_space<vmem>>, vector<128x128xbf16>
    %c0_5 = arith.constant 0 : index
    %c0_6 = arith.constant 0 : index
    %4 = vector.load %arg6[%c0_5, %c0_6] : memref<128x128xbf16, #tpu.memory_space<vmem>>, vector<128x128xbf16>
    %cst_7 = arith.constant dense<0.000000e+00> : vector<128x128xf32>
    %5 = tpu.matmul %3, %4, %cst_7 {dimension_numbers = #tpu.dot_dimension_numbers<[1], [0], [0], [1], [0, 0, 1, 1], [], []>} : vector<128x128xbf16>, vector<128x128xbf16>, vector<128x128xf32> -> vector<128x128xf32>
    %6 = arith.addf %2, %5 : vector<128x128xf32>
    %c0_8 = arith.constant 0 : index
    %c0_9 = arith.constant 0 : index
    %7 = vector.load %arg4[%c0_8, %c0_9] : memref<1x128xf32, #tpu.memory_space<vmem>>, vector<1x128xf32>
    %8 = vector.broadcast %7 : vector<1x128xf32> to vector<128x128xf32>
    %9 = arith.addf %6, %8 : vector<128x128xf32>
    %cst_10 = arith.constant 0.000000e+00 : f32
    %10 = vector.broadcast %cst_10 : f32 to vector<128x128xf32>
    %11 = arith.maximumf %9, %10 : vector<128x128xf32>
    %12 = arith.truncf %11 : vector<128x128xf32> to vector<128x128xbf16>
    %c0_11 = arith.constant 0 : index
    %c0_12 = arith.constant 0 : index
    %13 = vector.load %arg7[%c0_11, %c0_12] : memref<128x128xbf16, #tpu.memory_space<vmem>>, vector<128x128xbf16>
    tpu.vector_store %arg7[%c0_11, %c0_12], %12 {strides = array<i32>} : memref<128x128xbf16, #tpu.memory_space<vmem>>, vector<128x128xbf16>,
    return
  }
  func.func @transform_0(%arg0: i32, %arg1: i32) -> (i32, i32) {
    %c0_i32 = arith.constant 0 : i32
    %c0_i32_0 = arith.constant 0 : i32
    return %arg0, %c0_i32 : i32, i32
  }
  func.func @transform_1(%arg0: i32, %arg1: i32) -> (i32, i32) {
    %c0_i32 = arith.constant 0 : i32
    %c0_i32_0 = arith.constant 0 : i32
    return %c0_i32, %arg1 : i32, i32
  }
  func.func @transform_2(%arg0: i32, %arg1: i32) -> (i32, i32) {
    %c0_i32 = arith.constant 0 : i32
    %c0_i32_0 = arith.constant 0 : i32
    return %c0_i32, %arg1 : i32, i32
  }
  func.func @transform_3(%arg0: i32, %arg1: i32) -> (i32, i32) {
    %c0_i32 = arith.constant 0 : i32
    %c0_i32_0 = arith.constant 0 : i32
    return %arg0, %c0_i32 : i32, i32
  }
  func.func @transform_4(%arg0: i32, %arg1: i32) -> (i32, i32) {
    %c0_i32 = arith.constant 0 : i32
    %c0_i32_0 = arith.constant 0 : i32
    return %c0_i32, %arg1 : i32, i32
  }
  func.func @transform_5(%arg0: i32, %arg1: i32) -> (i32, i32) {
    %c0_i32 = arith.constant 0 : i32
    return %arg0, %arg1 : i32, i32
  }
}

</mosaic_0001>

<bundles_post_ra>
// kernel: resnet_bn_block_forward.3
= control target key start
LH: loop header
LB: loop body
LE: loop exit
PB: predicated region body
PF: predicated region fallthrough
CT: control target
= control target key end

     0   :  { %s658_s12 = smov 0   ;;  %s719_s0 = inlined_call_operand.vmem [shape: bf16[512,128], index: 0, kind: input, shape index: {}]   ;;  %s720_s1 = inlined_call_operand.vmem [shape: bf16[128,128], index: 1, kind: input, shape index: {}]   ;;  %s721_s2 = inlined_call_operand.vmem [shape: f32[1,128], index: 2, kind: input, shape index: {}]   ;;  %s722_s3 = inlined_call_operand.vmem [shape: bf16[512,128], index: 3, kind: output, shape index: {}]  }
   0x1 LB: > { %s459_s13 = sadd.s32 4294967295, %s636_s12   ;;  %p463_p0 = scmp.ge.s32.totalorder %s636_s12, 1  ;;  %s636_s12 = sphi %s658_s12, %s13_s12  }
   0x2   : > { %p138_p1 = scmp.lt.s32.totalorder %s636_s12, 5 }
   0x4   : > { %p139_p2 = pnand %p463_p0, %p138_p1 }
   0x5   : > { %s464_s22 = sshll.u32 (!%p139_p2), %s459_s13, 4 }
   0x6   : > { %142 = sbr.rel (%p139_p2) target bundleno = 208 (0xd0), region = 32  ;;  %p163_p3 = scmp.lt.s32.totalorder (!%p139_p2), %s464_s22, 63 }
   0xb   : > { %v549_v0 = vld [vmem:[%s720_s1 + $0x38] sm:$0xff]  ;;  %v548_v1 = vld [vmem:[%s720_s1 + $0x30] sm:$0xff]  ;;  %v547_v2 = vld [vmem:[%s720_s1 + $0x28] sm:$0xff]  ;;  %s724_s22 = smov (!%p163_p3, %s464_s22), 63 }
   0xc   : > { %306 = vmatpush.bf16.msra.mxu0 %v549_v0  ;;  %597 = vmatpush.bf16.msra.mxu1 %v549_v0  ;;  %v546_v3 = vld [vmem:[%s720_s1 + $0x20] sm:$0xff]  ;;  %v545_v4 = vld [vmem:[%s720_s1 + $0x18] sm:$0xff]  ;;  %v544_v5 = vld [vmem:[%s720_s1 + $0x10] sm:$0xff]  ;;  %s465_s29 = sshll.u32 %s724_s22, 2 }
   0xd   : > { %598 = vmatpush.bf16.msra.mxu2 %v549_v0  ;;  %599 = vmatpush.bf16.msra.mxu3 %v549_v0  ;;  %v543_v6 = vld [vmem:[%s720_s1 + $0x8] sm:$0xff]  ;;  %v542_v7 = vld [vmem:[%s720_s1] sm:$0xff]  ;;  %s166_s7 = scalar_lea.vmem %s719_s0, %s465_s29  ;;  %s706_s13 = scalar_lea.vmem %s722_s3, %s465_s29 }
   0xe   : > { %v534_v8 = vld [vmem:[%s166_s7] sm:$0xff]  ;;  %v536_v9 = vld [vmem:[%s166_s7 + $0x10] sm:$0xff]  ;;  %v535_v12 = vld [vmem:[%s166_s7 + $0x8] sm:$0xff] }
   0xf   : > { %v538_v10 = vld [vmem:[%s166_s7 + $0x20] sm:$0xff]  ;;  %v540_v11 = vld [vmem:[%s166_s7 + $0x30] sm:$0xff]  ;;  %v537_v13 = vld [vmem:[%s166_s7 + $0x18] sm:$0xff] }
  0x10   : > { %307 = vmatpush.bf16.msra.mxu0 %v548_v1  ;;  %600 = vmatpush.bf16.msra.mxu1 %v548_v1  ;;  %v539_v14 = vld [vmem:[%s166_s7 + $0x28] sm:$0xff]  ;;  %v541_v15 = vld [vmem:[%s166_s7 + $0x38] sm:$0xff]  ;;  %v629_v18 = vld [vmem:[%s721_s2] ss:$0 sm:$0xff] }
  0x11   : > { %601 = vmatpush.bf16.msra.mxu2 %v548_v1  ;;  %602 = vmatpush.bf16.msra.mxu3 %v548_v1 }
  0x14   : > { %308 = vmatpush.bf16.msra.mxu0 %v547_v2  ;;  %603 = vmatpush.bf16.msra.mxu1 %v547_v2 }
  0x15   : > { %604 = vmatpush.bf16.msra.mxu2 %v547_v2  ;;  %605 = vmatpush.bf16.msra.mxu3 %v547_v2 }
  0x18   : > { %309 = vmatpush.bf16.msra.mxu0 %v546_v3  ;;  %606 = vmatpush.bf16.msra.mxu1 %v546_v3 }
  0x19   : > { %607 = vmatpush.bf16.msra.mxu2 %v546_v3  ;;  %608 = vmatpush.bf16.msra.mxu3 %v546_v3 }
  0x1c   : > { %310 = vmatpush.bf16.msra.mxu0 %v545_v4  ;;  %609 = vmatpush.bf16.msra.mxu1 %v545_v4 }
  0x1d   : > { %610 = vmatpush.bf16.msra.mxu2 %v545_v4  ;;  %611 = vmatpush.bf16.msra.mxu3 %v545_v4 }
  0x20   : > { %311 = vmatpush.bf16.msra.mxu0 %v544_v5  ;;  %612 = vmatpush.bf16.msra.mxu1 %v544_v5 }
  0x21   : > { %613 = vmatpush.bf16.msra.mxu2 %v544_v5  ;;  %614 = vmatpush.bf16.msra.mxu3 %v544_v5 }
  0x24   : > { %312 = vmatpush.bf16.msra.mxu0 %v543_v6  ;;  %615 = vmatpush.bf16.msra.mxu1 %v543_v6 }
  0x25   : > { %616 = vmatpush.bf16.msra.mxu2 %v543_v6  ;;  %617 = vmatpush.bf16.msra.mxu3 %v543_v6 }
  0x28   : > { %313 = vmatpush.bf16.msra.mxu0 %v542_v7  ;;  %618 = vmatpush.bf16.msra.mxu1 %v542_v7 }
  0x29   : > { %619 = vmatpush.bf16.msra.mxu2 %v542_v7  ;;  %620 = vmatpush.bf16.msra.mxu3 %v542_v7 }
  0x2b   : > { %314 = vmatmul.bf16.vlgmr.msra.gmra.mxu0 %v534_v8  ;;  %324 = vmatmul.bf16.vlgmr.msra.gmra.mxu1 %v536_v9 }
  0x2c   : > { %334 = vmatmul.bf16.vlgmr.msra.gmra.mxu2 %v538_v10  ;;  %344 = vmatmul.bf16.vlgmr.msra.gmra.mxu3 %v540_v11 }
  0x3b   : > { %319 = vmatmul.bf16.gmra.mxu0 %v535_v12  ;;  %329 = vmatmul.bf16.gmra.mxu1 %v537_v13 }
  0x3c   : > { %339 = vmatmul.bf16.gmra.mxu2 %v539_v14  ;;  %349 = vmatmul.bf16.gmra.mxu3 %v541_v15 }
  0xa8   : > { %v315_v16 = vpop.f32.mrf.mxu0  ;;  %v325_v17 = vpop.f32.mrf.mxu1 }
  0xa9   : > { %v316_v19 = vadd.f32 %v629_v18, %v315_v16  ;;  %v326_v20 = vadd.f32 %v629_v18, %v325_v17 }
  0xab   : > { %v355_v27 = vmax.f32 %v316_v19, 0.0  ;;  %v359_v28 = vmax.f32 %v326_v20, 0.0 }
  0xaf   : > { %v335_v21 = vpop.f32.mrf.mxu2  ;;  %v345_v22 = vpop.f32.mrf.mxu3 }
  0xb0   : > { %v317_v23 = vpop.f32.mrf.mxu0  ;;  %v327_v24 = vpop.f32.mrf.mxu1  ;;  %v336_v33 = vadd.f32 %v629_v18, %v335_v21  ;;  %v346_v34 = vadd.f32 %v629_v18, %v345_v22 }
  0xb1   : > { %v318_v25 = vadd.f32 %v629_v18, %v317_v23  ;;  %v328_v26 = vadd.f32 %v629_v18, %v327_v24 }
  0xb2   : > { %v363_v41 = vmax.f32 %v336_v33, 0.0  ;;  %v367_v42 = vmax.f32 %v346_v34, 0.0 }
  0xb3   : > { %v356_v29 = vmax.f32 %v318_v25, 0.0  ;;  %v360_v30 = vmax.f32 %v328_v26, 0.0 }
  0xb5   : > { %v553_v31 = vpack.c.bf16 %v356_v29, %v355_v27  ;;  %v563_v32 = vpack.c.bf16 %v360_v30, %v359_v28 }
  0xb7   : > { %554 = vst [vmem:[%s706_s13] sm:$0xff] %v553_v31   ;;  %v337_v35 = vpop.f32.mrf.mxu2  ;;  %v347_v36 = vpop.f32.mrf.mxu3 }
  0xb8   : > { %591 = vst [vmem:[%s706_s13 + $0x10] sm:$0xff] %v563_v32   ;;  %v338_v37 = vadd.f32 %v629_v18, %v337_v35  ;;  %v348_v38 = vadd.f32 %v629_v18, %v347_v36  ;;  %v320_v39 = vpop.f32.mrf.mxu0  ;;  %v330_v40 = vpop.f32.mrf.mxu1 }
  0xb9   : > { %v321_v47 = vadd.f32 %v629_v18, %v320_v39  ;;  %v331_v48 = vadd.f32 %v629_v18, %v330_v40 }
  0xba   : > { %v364_v43 = vmax.f32 %v338_v37, 0.0  ;;  %v368_v44 = vmax.f32 %v348_v38, 0.0 }
  0xbb   : > { %v357_v55 = vmax.f32 %v321_v47, 0.0  ;;  %v361_v56 = vmax.f32 %v331_v48, 0.0 }
  0xbc   : > { %v573_v45 = vpack.c.bf16 %v364_v43, %v363_v41  ;;  %v583_v46 = vpack.c.bf16 %v368_v44, %v367_v42 }
  0xbe   : > { %593 = vst [vmem:[%s706_s13 + $0x20] sm:$0xff] %v573_v45  }
  0xbf   : > { %595 = vst [vmem:[%s706_s13 + $0x30] sm:$0xff] %v583_v46   ;;  %v340_v49 = vpop.f32.mrf.mxu2  ;;  %v350_v50 = vpop.f32.mrf.mxu3 }
  0xc0   : > { %v322_v51 = vpop.f32.mrf.mxu0  ;;  %v332_v52 = vpop.f32.mrf.mxu1  ;;  %v341_v61 = vadd.f32 %v629_v18, %v340_v49  ;;  %v351_v62 = vadd.f32 %v629_v18, %v350_v50 }
  0xc1   : > { %v323_v53 = vadd.f32 %v629_v18, %v322_v51  ;;  %v333_v54 = vadd.f32 %v629_v18, %v332_v52 }
  0xc2   : > { %v365_v3 = vmax.f32 %v341_v61, 0.0  ;;  %v369_v4 = vmax.f32 %v351_v62, 0.0 }
  0xc3   : > { %v358_v57 = vmax.f32 %v323_v53, 0.0  ;;  %v362_v58 = vmax.f32 %v333_v54, 0.0 }
  0xc5   : > { %v558_v59 = vpack.c.bf16 %v358_v57, %v357_v55  ;;  %v568_v60 = vpack.c.bf16 %v362_v58, %v361_v56 }
  0xc7   : > { %590 = vst [vmem:[%s706_s13 + $0x8] sm:$0xff] %v558_v59   ;;  %v342_v63 = vpop.f32.mrf.mxu2  ;;  %v352_v0 = vpop.f32.mrf.mxu3 }
  0xc8   : > { %592 = vst [vmem:[%s706_s13 + $0x18] sm:$0xff] %v568_v60   ;;  %v343_v1 = vadd.f32 %v629_v18, %v342_v63  ;;  %v353_v2 = vadd.f32 %v629_v18, %v352_v0 }
  0xca   : > { %v366_v5 = vmax.f32 %v343_v1, 0.0  ;;  %v370_v6 = vmax.f32 %v353_v2, 0.0 }
  0xcc   : > { %v578_v7 = vpack.c.bf16 %v366_v5, %v365_v3  ;;  %v588_v8 = vpack.c.bf16 %v370_v6, %v369_v4 }
  0xce   : > { %594 = vst [vmem:[%s706_s13 + $0x28] sm:$0xff] %v578_v7  }
  0xcf   : > { %596 = vst [vmem:[%s706_s13 + $0x38] sm:$0xff] %v588_v8  }
  0xd0 PF: > { %s13_s12 = sadd.s32 1, %s636_s12  }
  0xd1   : > { %p10_p4 = scmp.ge.s32.totalorder %s13_s12, 6  }
  0xd3   :  { %12 = sbr.rel (!%p10_p4) target bundleno = 1 (0x1), region = 62 }

// kernel: resnet_bn_block_forward.5
= control target key start
LH: loop header
LB: loop body
LE: loop exit
PB: predicated region body
PF: predicated region fallthrough
CT: control target
= control target key end

     0   :  { %s1187_s18 = smov 0   ;;  %s1189_s19 = smov 0   ;;  %s1330_s0 = inlined_call_operand.vmem [shape: bf16[512,128], index: 0, kind: input, shape index: {}]   ;;  %s1331_s1 = inlined_call_operand.vmem [shape: bf16[128,128], index: 1, kind: input, shape index: {}]   ;;  %s1332_s2 = inlined_call_operand.vmem [shape: f32[1,128], index: 2, kind: input, shape index: {}]   ;;  %s1333_s3 = inlined_call_operand.vmem [shape: bf16[512,128], index: 3, kind: input, shape index: {}]   ;;  %s1334_s4 = inlined_call_operand.vmem [shape: bf16[128,128], index: 4, kind: input, shape index: {}]   ;;  %s1335_s5 = inlined_call_operand.vmem [shape: bf16[512,128], index: 5, kind: output, shape index: {}]  }
   0x1   :  { %s1191_s20 = smov 0  }
   0x2 LB: > { %s27_s21 = sadd.s32 1, %s1151_s19  ;;  %p876_p0 = scmp.ge.s32.totalorder %s1155_s20, 1  ;;  %s1155_s20 = sphi %s1191_s20, %s15_s20   ;;  %s1151_s19 = sphi %s1189_s19, %s1337_s19   ;;  %s1147_s18 = sphi %s1187_s18, %s1336_s18  }
   0x3   : > { %p29_p1 = scmp.ge.s32.totalorder %s27_s21, 4  ;;  %p239_p2 = scmp.lt.s32.totalorder %s1155_s20, 5 }
   0x5   : > { %s1339_s21 = smov (%p29_p1, %s27_s21), 0  ;;  %p240_p3 = pnand %p876_p0, %p239_p2 }
   0x6   : > { %s877_s13 = sshll.u32 (!%p240_p3), %s1147_s18, 4 }
   0x7   : > { %243 = sbr.rel (%p240_p3) target bundleno = 242 (0xf2), region = 40  ;;  %p287_p4 = scmp.lt.s32.totalorder (!%p240_p3), %s877_s13, 63 }
   0xc   : > { %v1044_v0 = vld [vmem:[%s1334_s4 + $0x38] sm:$0xff]  ;;  %v1043_v2 = vld [vmem:[%s1334_s4 + $0x30] sm:$0xff]  ;;  %v1042_v4 = vld [vmem:[%s1334_s4 + $0x28] sm:$0xff]  ;;  %s1341_s13 = smov (!%p287_p4, %s877_s13), 63 }
   0xd   : > { %v1028_v1 = vld [vmem:[%s1331_s1 + $0x38] sm:$0xff]  ;;  %478 = vmatpush.bf16.msra.mxu0 %v1044_v0  ;;  %1092 = vmatpush.bf16.msra.mxu2 %v1044_v0  ;;  %v1027_v3 = vld [vmem:[%s1331_s1 + $0x30] sm:$0xff]  ;;  %v1026_v5 = vld [vmem:[%s1331_s1 + $0x28] sm:$0xff]  ;;  %s1250_s29 = sshll.u32 %s1341_s13, 2 }
   0xe   : > { %623 = vmatpush.bf16.msra.mxu1 %v1028_v1  ;;  %1100 = vmatpush.bf16.msra.mxu3 %v1028_v1  ;;  %v1041_v6 = vld [vmem:[%s1334_s4 + $0x20] sm:$0xff]  ;;  %v1040_v8 = vld [vmem:[%s1334_s4 + $0x18] sm:$0xff]  ;;  %v1039_v10 = vld [vmem:[%s1334_s4 + $0x10] sm:$0xff]  ;;  %s1259_s9 = scalar_lea.vmem %s1333_s3, %s1250_s29  ;;  %s1268_s14 = scalar_lea.vmem %s1330_s0, %s1250_s29 }
   0xf   : > { %v1025_v7 = vld [vmem:[%s1331_s1 + $0x20] sm:$0xff]  ;;  %v1024_v9 = vld [vmem:[%s1331_s1 + $0x18] sm:$0xff]  ;;  %v1023_v11 = vld [vmem:[%s1331_s1 + $0x10] sm:$0xff]  ;;  %s1297_s23 = scalar_lea.vmem %s1335_s5, %s1250_s29 }
  0x10   : > { %v1038_v12 = vld [vmem:[%s1334_s4 + $0x8] sm:$0xff]  ;;  %v1037_v14 = vld [vmem:[%s1334_s4] sm:$0xff]  ;;  %v1031_v24 = vld [vmem:[%s1259_s9 + $0x10] sm:$0xff] }
  0x11   : > { %479 = vmatpush.bf16.msra.mxu0 %v1043_v2  ;;  %1093 = vmatpush.bf16.msra.mxu2 %v1043_v2  ;;  %v1022_v13 = vld [vmem:[%s1331_s1 + $0x8] sm:$0xff]  ;;  %v1021_v15 = vld [vmem:[%s1331_s1] sm:$0xff]  ;;  %v1035_v25 = vld [vmem:[%s1259_s9 + $0x30] sm:$0xff] }
  0x12   : > { %624 = vmatpush.bf16.msra.mxu1 %v1027_v3  ;;  %1101 = vmatpush.bf16.msra.mxu3 %v1027_v3  ;;  %v1029_v16 = vld [vmem:[%s1259_s9] sm:$0xff]  ;;  %v1030_v20 = vld [vmem:[%s1259_s9 + $0x8] sm:$0xff]  ;;  %v1015_v26 = vld [vmem:[%s1268_s14 + $0x10] sm:$0xff] }
  0x13   : > { %v1033_v17 = vld [vmem:[%s1259_s9 + $0x20] sm:$0xff]  ;;  %v1034_v21 = vld [vmem:[%s1259_s9 + $0x28] sm:$0xff]  ;;  %v1019_v27 = vld [vmem:[%s1268_s14 + $0x30] sm:$0xff] }
  0x14   : > { %v1013_v18 = vld [vmem:[%s1268_s14] sm:$0xff]  ;;  %v1014_v22 = vld [vmem:[%s1268_s14 + $0x8] sm:$0xff]  ;;  %v1032_v28 = vld [vmem:[%s1259_s9 + $0x18] sm:$0xff] }
  0x15   : > { %480 = vmatpush.bf16.msra.mxu0 %v1042_v4  ;;  %1094 = vmatpush.bf16.msra.mxu2 %v1042_v4  ;;  %v1017_v19 = vld [vmem:[%s1268_s14 + $0x20] sm:$0xff]  ;;  %v1018_v23 = vld [vmem:[%s1268_s14 + $0x28] sm:$0xff]  ;;  %v1036_v29 = vld [vmem:[%s1259_s9 + $0x38] sm:$0xff] }
  0x16   : > { %625 = vmatpush.bf16.msra.mxu1 %v1026_v5  ;;  %1102 = vmatpush.bf16.msra.mxu3 %v1026_v5  ;;  %v1016_v30 = vld [vmem:[%s1268_s14 + $0x18] sm:$0xff]  ;;  %v1289_v35 = vld [vmem:[%s1332_s2] ss:$0 sm:$0xff] }
  0x17   : > { %v1020_v31 = vld [vmem:[%s1268_s14 + $0x38] sm:$0xff] }
  0x19   : > { %481 = vmatpush.bf16.msra.mxu0 %v1041_v6  ;;  %1095 = vmatpush.bf16.msra.mxu2 %v1041_v6 }
  0x1a   : > { %626 = vmatpush.bf16.msra.mxu1 %v1025_v7  ;;  %1103 = vmatpush.bf16.msra.mxu3 %v1025_v7 }
  0x1d   : > { %482 = vmatpush.bf16.msra.mxu0 %v1040_v8  ;;  %1096 = vmatpush.bf16.msra.mxu2 %v1040_v8 }
  0x1e   : > { %627 = vmatpush.bf16.msra.mxu1 %v1024_v9  ;;  %1104 = vmatpush.bf16.msra.mxu3 %v1024_v9 }
  0x21   : > { %483 = vmatpush.bf16.msra.mxu0 %v1039_v10  ;;  %1097 = vmatpush.bf16.msra.mxu2 %v1039_v10 }
  0x22   : > { %628 = vmatpush.bf16.msra.mxu1 %v1023_v11  ;;  %1105 = vmatpush.bf16.msra.mxu3 %v1023_v11 }
  0x25   : > { %484 = vmatpush.bf16.msra.mxu0 %v1038_v12  ;;  %1098 = vmatpush.bf16.msra.mxu2 %v1038_v12 }
  0x26   : > { %629 = vmatpush.bf16.msra.mxu1 %v1022_v13  ;;  %1106 = vmatpush.bf16.msra.mxu3 %v1022_v13 }
  0x29   : > { %485 = vmatpush.bf16.msra.mxu0 %v1037_v14  ;;  %1099 = vmatpush.bf16.msra.mxu2 %v1037_v14 }
  0x2a   : > { %630 = vmatpush.bf16.msra.mxu1 %v1021_v15  ;;  %1107 = vmatpush.bf16.msra.mxu3 %v1021_v15 }
  0x2c   : > { %486 = vmatmul.bf16.vlgmr.msra.gmra.mxu0 %v1029_v16  ;;  %506 = vmatmul.bf16.vlgmr.msra.gmra.mxu2 %v1033_v17 }
  0x2d   : > { %631 = vmatmul.bf16.vlgmr.msra.gmra.mxu1 %v1013_v18  ;;  %651 = vmatmul.bf16.vlgmr.msra.gmra.mxu3 %v1017_v19 }
  0x3c   : > { %491 = vmatmul.bf16.gmra.mxu0 %v1030_v20  ;;  %511 = vmatmul.bf16.gmra.mxu2 %v1034_v21 }
  0x3d   : > { %636 = vmatmul.bf16.gmra.mxu1 %v1014_v22  ;;  %656 = vmatmul.bf16.gmra.mxu3 %v1018_v23 }
  0x4c   : > { %496 = vmatmul.bf16.gmra.mxu0 %v1031_v24  ;;  %516 = vmatmul.bf16.gmra.mxu2 %v1035_v25 }
  0x4d   : > { %641 = vmatmul.bf16.gmra.mxu1 %v1015_v26  ;;  %661 = vmatmul.bf16.gmra.mxu3 %v1019_v27 }
  0x5c   : > { %501 = vmatmul.bf16.gmra.mxu0 %v1032_v28  ;;  %521 = vmatmul.bf16.gmra.mxu2 %v1036_v29 }
  0x5d   : > { %646 = vmatmul.bf16.gmra.mxu1 %v1016_v30  ;;  %666 = vmatmul.bf16.gmra.mxu3 %v1020_v31 }
  0xa9   : > { %v487_v32 = vpop.f32.mrf.mxu0 }
  0xaa   : > { %v632_v33 = vpop.f32.mrf.mxu1 }
  0xab   : > { %v633_v34 = vadd.f32 %v632_v33, %v487_v32 }
  0xad   : > { %v676_v40 = vadd.f32 %v1289_v35, %v633_v34 }
  0xaf   : > { %v507_v36 = vpop.f32.mrf.mxu2  ;;  %v692_v44 = vmax.f32 %v676_v40, 0.0 }
  0xb0   : > { %v652_v37 = vpop.f32.mrf.mxu3 }
  0xb1   : > { %v489_v38 = vpop.f32.mrf.mxu0  ;;  %v653_v42 = vadd.f32 %v652_v37, %v507_v36 }
  0xb2   : > { %v634_v39 = vpop.f32.mrf.mxu1 }
  0xb3   : > { %v635_v41 = vadd.f32 %v634_v39, %v489_v38  ;;  %v684_v48 = vadd.f32 %v1289_v35, %v653_v42 }
  0xb5   : > { %v677_v43 = vadd.f32 %v1289_v35, %v635_v41  ;;  %v700_v54 = vmax.f32 %v684_v48, 0.0 }
  0xb7   : > { %v693_v45 = vmax.f32 %v677_v43, 0.0  ;;  %v509_v46 = vpop.f32.mrf.mxu2 }
  0xb8   : > { %v654_v47 = vpop.f32.mrf.mxu3 }
  0xb9   : > { %v1048_v49 = vpack.c.bf16 %v693_v45, %v692_v44  ;;  %v655_v50 = vadd.f32 %v654_v47, %v509_v46  ;;  %v492_v51 = vpop.f32.mrf.mxu0 }
  0xba   : > { %v637_v52 = vpop.f32.mrf.mxu1 }
  0xbb   : > { %1049 = vst [vmem:[%s1297_s23] sm:$0xff] %v1048_v49   ;;  %v685_v53 = vadd.f32 %v1289_v35, %v655_v50  ;;  %v638_v57 = vadd.f32 %v637_v52, %v492_v51 }
  0xbd   : > { %v701_v55 = vmax.f32 %v685_v53, 0.0  ;;  %v678_v62 = vadd.f32 %v1289_v35, %v638_v57 }
  0xbf   : > { %v1068_v56 = vpack.c.bf16 %v701_v55, %v700_v54  ;;  %v512_v58 = vpop.f32.mrf.mxu2  ;;  %v694_v2 = vmax.f32 %v678_v62, 0.0 }
  0xc0   : > { %v657_v59 = vpop.f32.mrf.mxu3 }
  0xc1   : > { %1088 = vst [vmem:[%s1297_s23 + $0x20] sm:$0xff] %v1068_v56   ;;  %v494_v60 = vpop.f32.mrf.mxu0  ;;  %v658_v0 = vadd.f32 %v657_v59, %v512_v58 }
  0xc2   : > { %v639_v61 = vpop.f32.mrf.mxu1 }
  0xc3   : > { %v640_v63 = vadd.f32 %v639_v61, %v494_v60  ;;  %v686_v6 = vadd.f32 %v1289_v35, %v658_v0 }
  0xc5   : > { %v679_v1 = vadd.f32 %v1289_v35, %v640_v63  ;;  %v702_v12 = vmax.f32 %v686_v6, 0.0 }
  0xc7   : > { %v695_v3 = vmax.f32 %v679_v1, 0.0  ;;  %v514_v4 = vpop.f32.mrf.mxu2 }
  0xc8   : > { %v659_v5 = vpop.f32.mrf.mxu3 }
  0xc9   : > { %v1053_v7 = vpack.c.bf16 %v695_v3, %v694_v2  ;;  %v660_v8 = vadd.f32 %v659_v5, %v514_v4  ;;  %v497_v9 = vpop.f32.mrf.mxu0 }
  0xca   : > { %v642_v10 = vpop.f32.mrf.mxu1 }
  0xcb   : > { %1085 = vst [vmem:[%s1297_s23 + $0x8] sm:$0xff] %v1053_v7   ;;  %v687_v11 = vadd.f32 %v1289_v35, %v660_v8  ;;  %v643_v15 = vadd.f32 %v642_v10, %v497_v9 }
  0xcd   : > { %v703_v13 = vmax.f32 %v687_v11, 0.0  ;;  %v680_v20 = vadd.f32 %v1289_v35, %v643_v15 }
  0xcf   : > { %v1073_v14 = vpack.c.bf16 %v703_v13, %v702_v12  ;;  %v517_v16 = vpop.f32.mrf.mxu2  ;;  %v696_v24 = vmax.f32 %v680_v20, 0.0 }
  0xd0   : > { %v662_v17 = vpop.f32.mrf.mxu3 }
  0xd1   : > { %1089 = vst [vmem:[%s1297_s23 + $0x28] sm:$0xff] %v1073_v14   ;;  %v499_v18 = vpop.f32.mrf.mxu0  ;;  %v663_v22 = vadd.f32 %v662_v17, %v517_v16 }
  0xd2   : > { %v644_v19 = vpop.f32.mrf.mxu1 }
  0xd3   : > { %v645_v21 = vadd.f32 %v644_v19, %v499_v18  ;;  %v688_v28 = vadd.f32 %v1289_v35, %v663_v22 }
  0xd5   : > { %v681_v23 = vadd.f32 %v1289_v35, %v645_v21  ;;  %v704_v34 = vmax.f32 %v688_v28, 0.0 }
  0xd7   : > { %v697_v25 = vmax.f32 %v681_v23, 0.0  ;;  %v519_v26 = vpop.f32.mrf.mxu2 }
  0xd8   : > { %v664_v27 = vpop.f32.mrf.mxu3 }
  0xd9   : > { %v1058_v29 = vpack.c.bf16 %v697_v25, %v696_v24  ;;  %v665_v30 = vadd.f32 %v664_v27, %v519_v26  ;;  %v502_v31 = vpop.f32.mrf.mxu0 }
  0xda   : > { %v647_v32 = vpop.f32.mrf.mxu1 }
  0xdb   : > { %1086 = vst [vmem:[%s1297_s23 + $0x10] sm:$0xff] %v1058_v29   ;;  %v689_v33 = vadd.f32 %v1289_v35, %v665_v30  ;;  %v648_v38 = vadd.f32 %v647_v32, %v502_v31 }
  0xdd   : > { %v705_v36 = vmax.f32 %v689_v33, 0.0  ;;  %v682_v43 = vadd.f32 %v1289_v35, %v648_v38 }
  0xdf   : > { %v1078_v37 = vpack.c.bf16 %v705_v36, %v704_v34  ;;  %v522_v39 = vpop.f32.mrf.mxu2  ;;  %v698_v47 = vmax.f32 %v682_v43, 0.0 }
  0xe0   : > { %v667_v40 = vpop.f32.mrf.mxu3 }
  0xe1   : > { %1090 = vst [vmem:[%s1297_s23 + $0x30] sm:$0xff] %v1078_v37   ;;  %v504_v41 = vpop.f32.mrf.mxu0  ;;  %v668_v45 = vadd.f32 %v667_v40, %v522_v39 }
  0xe2   : > { %v649_v42 = vpop.f32.mrf.mxu1 }
  0xe3   : > { %v650_v44 = vadd.f32 %v649_v42, %v504_v41  ;;  %v690_v51 = vadd.f32 %v1289_v35, %v668_v45 }
  0xe5   : > { %v683_v46 = vadd.f32 %v1289_v35, %v650_v44  ;;  %v706_v55 = vmax.f32 %v690_v51, 0.0 }
  0xe7   : > { %v699_v48 = vmax.f32 %v683_v46, 0.0  ;;  %v524_v49 = vpop.f32.mrf.mxu2 }
  0xe8   : > { %v669_v50 = vpop.f32.mrf.mxu3 }
  0xe9   : > { %v1063_v52 = vpack.c.bf16 %v699_v48, %v698_v47  ;;  %v670_v53 = vadd.f32 %v669_v50, %v524_v49 }
  0xeb   : > { %1087 = vst [vmem:[%s1297_s23 + $0x18] sm:$0xff] %v1063_v52   ;;  %v691_v54 = vadd.f32 %v1289_v35, %v670_v53 }
  0xed   : > { %v707_v56 = vmax.f32 %v691_v54, 0.0 }
  0xef   : > { %v1083_v57 = vpack.c.bf16 %v707_v56, %v706_v55 }
  0xf1   : > { %1091 = vst [vmem:[%s1297_s23 + $0x38] sm:$0xff] %v1083_v57  }
  0xf2 PF: > { %s15_s20 = sadd.s32 1, %s1155_s20   ;;  %s1336_s18 = smov %s1151_s19 }
  0xf3   : > { %p12_p5 = scmp.ge.s32.totalorder %s15_s20, 6   ;;  %s1337_s19 = smov %s1339_s21 }
  0xf5   :  { %14 = sbr.rel (!%p12_p5) target bundleno = 2 (0x2), region = 82 }

// kernel: resnet_bn_block_forward.4
= control target key start
LH: loop header
LB: loop body
LE: loop exit
PB: predicated region body
PF: predicated region fallthrough
CT: control target
= control target key end

     0   :  { %s3932_s15 = smov 0   ;;  %s3934_s16 = smov 0   ;;  %s4860_s0 = inlined_call_operand.vmem [shape: bf16[2,24,18,128], index: 0, kind: input, shape index: {}, may-alias: {0,1}]   ;;  %s4861_s1 = inlined_call_operand.vmem [shape: bf16[2,24,18,128], index: 1, kind: input, shape index: {}, may-alias: {0,1}]   ;;  %s4862_s2 = inlined_call_operand.vmem [shape: bf16[9,128,128], index: 2, kind: input, shape index: {}]   ;;  %s4863_s3 = inlined_call_operand.vmem [shape: f32[1,128], index: 3, kind: input, shape index: {}]   ;;  %s4864_s4 = inlined_call_operand.vmem [shape: bf16[2,16,16,128], index: 4, kind: output, shape index: {}]  }
   0x1   :  { %s3936_s17 = smov 0   ;;  %s3938_s18 = smov 0  }
   0x2   :  { %s3940_s19 = smov 0  }
   0x3 LB: > { %s23_s20 = sadd.s32 1, %s3896_s17  ;;  %s26_s21 = sadd.s32 1, %s3900_s18  ;;  %s3904_s19 = sphi %s3940_s19, %s14_s19   ;;  %s3900_s18 = sphi %s3938_s18, %s4869_s18   ;;  %s3896_s17 = sphi %s3936_s17, %s4868_s17   ;;  %s3892_s16 = sphi %s3934_s16, %s4867_s16   ;;  %s3888_s15 = sphi %s3932_s15, %s4866_s15  }
   0x4   : > { %p24_p0 = scmp.ge.s32.totalorder %s23_s20, 2  ;;  %p3114_p1 = scmp.ge.s32.totalorder %s3904_s19, 1 }
   0x5   : > { %p210_p2 = scmp.lt.s32.totalorder %s3904_s19, 5 }
   0x6   : > { %s4871_s20 = smov (%p24_p0, %s23_s20), 0  ;;  %s4873_s21 = smov (!%p24_p0, %s26_s21), %s3900_s18 }
   0x7   : > { %p211_p3 = pnand %p3114_p1, %p210_p2  ;;  %p28_p4 = scmp.ge.s32.totalorder %s4873_s21, 2 }
   0x8   : > { %s3965_s24 = sshll.u32 (!%p211_p3), %s3888_s15, 3  ;;  %p259_p5 = scmp.lt.s32.totalorder (!%p211_p3), %s3892_s16, 1 }
   0x9   : > { %s4875_s21 = smov (%p28_p4, %s4873_s21), 0  ;;  %214 = sbr.rel (%p211_p3) target bundleno = 615 (0x267), region = 36 }
   0xa   : > { %p261_p6 = scmp.lt.s32.totalorder (!%p211_p3), %s3965_s24, 23  ;;  %p287_p8 = scmp.lt.s32.totalorder (!%p211_p3), %s3965_s24, 15 }
   0xe   : > { %v3668_v0 = vld [vmem:[%s4862_s2 + $0x78] sm:$0xff]  ;;  %v3667_v1 = vld [vmem:[%s4862_s2 + $0x70] sm:$0xff]  ;;  %s4877_s16 = smov (!%p259_p5, %s3892_s16), 1  ;;  %v3666_v2 = vld [vmem:[%s4862_s2 + $0x68] sm:$0xff]  ;;  %vm368_vm0 = vcmask 1040384   ;;  %vm372_vm1 = vcmask 1041409  }
   0xf   : > { %3797 = vmatpush.bf16.msra.mxu1 %v3668_v0  ;;  %3798 = vmatpush.bf16.msra.mxu2 %v3668_v0  ;;  %s262_s27 = scalar_select %p261_p6, %s3965_s24, 23  ;;  %v3665_v3 = vld [vmem:[%s4862_s2 + $0x60] sm:$0xff]  ;;  %vm376_vm2 = vcmask 1042434   ;;  %v3664_v7 = vld [vmem:[%s4862_s2 + $0x58] sm:$0xff]  ;;  %vm380_vm3 = vcmask 1043459   ;;  %v3663_v17 = vld [vmem:[%s4862_s2 + $0x50] sm:$0xff] }
  0x10   : > { %3799 = vmatpush.bf16.msra.mxu3 %v3668_v0  ;;  %1128 = vmatpush.bf16.msra.mxu0 %v3668_v0  ;;  %s3822_s28 = smul.u32 72, %s4877_s16  ;;  %v3662_v28 = vld [vmem:[%s4862_s2 + $0x48] sm:$0xff]  ;;  %v3661_v33 = vld [vmem:[%s4862_s2 + $0x40] sm:$0xff]  ;;  %vm994_vm4 = vsmask.f32 7424  ;;  %vm1314_vm6 = vcmask 1046528  }
  0x11   : > { %s3821_s29 = smul.u32 3, %s262_s27  ;;  %s3786_s27 = sadd.s32 8, %s3965_s24  ;;  %vm1716_vm5 = vsmask.f32 6400  ;;  %vm1956_vm7 = vcmask 1045504   ;;  %vm2598_vm8 = vcmask 1044480  }
  0x12   : > { %p4124_p7 = scmp.lt.s32.totalorder %s3786_s27, 23  ;;  %vm2358_vm9 = vsmask.f32 5376  ;;  %s4881_s24 = smov (!%p287_p8, %s3965_s24), 15 }
  0x13   : > { %3800 = vmatpush.bf16.msra.mxu1 %v3667_v1  ;;  %3801 = vmatpush.bf16.msra.mxu2 %v3667_v1  ;;  %s265_s6 = sadd.s32 %s3822_s28, %s3821_s29  ;;  %s3121_s15 = sshll.u32 %s4881_s24, 1 }
  0x14   : > { %3802 = vmatpush.bf16.msra.mxu3 %v3667_v1  ;;  %1129 = vmatpush.bf16.msra.mxu0 %v3667_v1  ;;  %s3116_s7 = sshll.u32 %s265_s6, 2  ;;  %s4879_s27 = smov (!%p4124_p7, %s3786_s27), 23 }
  0x15   : > { %s3983_s10 = scalar_lea.vmem %s4860_s0, %s3116_s7  ;;  %s3823_s11 = smul.u32 3, %s4879_s27 }
  0x16   : > { %v296_v4 = vld [vmem:[%s3983_s10] sm:$0xf]  ;;  %v297_v5 = vld [vmem:[%s3983_s10 + $0x4] sm:$0xf]  ;;  %v299_v12 = vld [vmem:[%s3983_s10 + $0xc] sm:$0xf] }
  0x17   : > { %3803 = vmatpush.bf16.msra.mxu1 %v3666_v2  ;;  %3804 = vmatpush.bf16.msra.mxu2 %v3666_v2  ;;  %v344_v6 = vrot.slane %v296_v4, 3  ;;  %v345_v8 = vrot.slane %v297_v5, 3  ;;  %v298_v22 = vld [vmem:[%s3983_s10 + $0x8] sm:$0x1]  ;;  %v347_v24 = vrot.slane %v299_v12, 3  ;;  %s278_s9 = sadd.s32 %s3823_s11, %s3822_s28  ;;  %s3122_s22 = sshll.u32 %s4877_s16, 5 }
  0x18   : > { %3805 = vmatpush.bf16.msra.mxu3 %v3666_v2  ;;  %1130 = vmatpush.bf16.msra.mxu0 %v3666_v2  ;;  %v300_v26 = vld [vmem:[%s3983_s10 + $0x10] sm:$0xf]  ;;  %v346_v29 = vrot.slane %v298_v22, 3  ;;  %v302_v41 = vld [vmem:[%s3983_s10 + $0x18] sm:$0xf]  ;;  %s3119_s28 = sshll.u32 %s278_s9, 2  ;;  %s291_s23 = sadd.s32 %s3122_s22, %s3121_s15 }
  0x19   : > { %v371_v9 = vsel %vm368_vm0, %v296_v4, %v344_v6  ;;  %v373_v10 = vsel %vm372_vm1, %v296_v4, %v344_v6  ;;  %v377_v11 = vsel %vm376_vm2, %v296_v4, %v344_v6  ;;  %v381_v15 = vsel %vm380_vm3, %v296_v4, %v344_v6  ;;  %v301_v44 = vld [vmem:[%s3983_s10 + $0x14] sm:$0x1]  ;;  %v303_v50 = vld [vmem:[%s3983_s10 + $0x1c] sm:$0xf]  ;;  %v305_v0 = vld [vmem:[%s3983_s10 + $0x24] sm:$0xf]  ;;  %s4210_s14 = scalar_lea.vmem %s4861_s1, %s3119_s28 }
  0x1a   : > { %v375_v13 = vrot.slane %v373_v10, 1  ;;  %v379_v14 = vrot.slane %v377_v11, 2  ;;  %v386_v16 = vsel %vm368_vm0, %v297_v5, %v345_v8  ;;  %588 = vst [vmem:[#allocation1] ss:$4 sm:$0xff] %v371_v9  ;;  %v383_v18 = vrot.slane %v381_v15, 3  ;;  %s3123_s25 = sshll.u32 %s291_s23, 2 }
  0x1b   : > { %3806 = vmatpush.bf16.msra.mxu1 %v3665_v3  ;;  %3807 = vmatpush.bf16.msra.mxu2 %v3665_v3  ;;  %v387_v19 = vsel %vm372_vm1, %v297_v5, %v345_v8  ;;  %v390_v20 = vsel %vm376_vm2, %v297_v5, %v345_v8  ;;  %v393_v21 = vsel %vm380_vm3, %v297_v5, %v345_v8  ;;  %v348_v30 = vrot.slane %v300_v26, 3  ;;  %v304_v2 = vld [vmem:[%s3983_s10 + $0x20] sm:$0x1]  ;;  %v306_v11 = vld [vmem:[%s3983_s10 + $0x28] sm:$0xf]  ;;  %s4805_s26 = scalar_lea.vmem %s4864_s4, %s3123_s25 }
  0x1c   : > { %3808 = vmatpush.bf16.msra.mxu3 %v3665_v3  ;;  %1131 = vmatpush.bf16.msra.mxu0 %v3665_v3  ;;  %599 = vst [vmem:[#allocation1 + $0x20] ss:$4 sm:$0xff] %v386_v16  ;;  %v389_v23 = vrot.slane %v387_v19, 1  ;;  %v392_v25 = vrot.slane %v390_v20, 2  ;;  %v395_v27 = vrot.slane %v393_v21, 3  ;;  %v402_v31 = vsel %vm372_vm1, %v299_v12, %v347_v24 }
  0x1d   : > { %591 = vst [vmem:[#allocation1 + $0x1] ss:$4 sm:$0xff] %v375_v13  ;;  %v405_v32 = vsel %vm376_vm2, %v299_v12, %v347_v24  ;;  %v398_v34 = vsel %vm368_vm0, %v298_v22, %v346_v29  ;;  %v408_v35 = vsel %vm380_vm3, %v299_v12, %v347_v24  ;;  %v401_v36 = vsel %vm368_vm0, %v299_v12, %v347_v24 }
  0x1e   : > { %594 = vst [vmem:[#allocation1 + $0x2] ss:$4 sm:$0xff] %v379_v14  ;;  %v404_v37 = vrot.slane %v402_v31, 1  ;;  %v407_v38 = vrot.slane %v405_v32, 2  ;;  %v414_v39 = vsel %vm372_vm1, %v300_v26, %v348_v30  ;;  %v410_v42 = vrot.slane %v408_v35, 3 }
  0x1f   : > { %3809 = vmatpush.bf16.msra.mxu1 %v3664_v7  ;;  %3810 = vmatpush.bf16.msra.mxu2 %v3664_v7  ;;  %597 = vst [vmem:[#allocation1 + $0x3] ss:$4 sm:$0xff] %v383_v18  ;;  %v417_v43 = vsel %vm376_vm2, %v300_v26, %v348_v30  ;;  %v413_v45 = vsel %vm368_vm0, %v300_v26, %v348_v30  ;;  %v416_v46 = vrot.slane %v414_v39, 1  ;;  %v350_v47 = vrot.slane %v302_v41, 3 }
  0x20   : > { %3811 = vmatpush.bf16.msra.mxu3 %v3664_v7  ;;  %1132 = vmatpush.bf16.msra.mxu0 %v3664_v7  ;;  %602 = vst [vmem:[#allocation1 + $0x21] ss:$4 sm:$0xff] %v389_v23  ;;  %v419_v48 = vrot.slane %v417_v43, 2  ;;  %v420_v51 = vsel %vm380_vm3, %v300_v26, %v348_v30  ;;  %v349_v52 = vrot.slane %v301_v44, 3  ;;  %v351_v53 = vrot.slane %v303_v50, 3 }
  0x21   : > { %605 = vst [vmem:[#allocation1 + $0x22] ss:$4 sm:$0xff] %v392_v25  ;;  %v422_v54 = vrot.slane %v420_v51, 3  ;;  %v429_v55 = vsel %vm372_vm1, %v302_v41, %v350_v47  ;;  %v432_v56 = vsel %vm376_vm2, %v302_v41, %v350_v47  ;;  %v435_v58 = vsel %vm380_vm3, %v302_v41, %v350_v47  ;;  %v308_v25 = vld [vmem:[%s3983_s10 + $0x30] sm:$0xf] }
  0x22   : > { %608 = vst [vmem:[#allocation1 + $0x23] ss:$4 sm:$0xff] %v395_v27  ;;  %v425_v57 = vsel %vm368_vm0, %v301_v44, %v349_v52  ;;  %v428_v59 = vsel %vm368_vm0, %v302_v41, %v350_v47  ;;  %v431_v60 = vrot.slane %v429_v55, 1  ;;  %v434_v62 = vrot.slane %v432_v56, 2  ;;  %v307_v27 = vld [vmem:[%s3983_s10 + $0x2c] sm:$0x1] }
  0x23   : > { %3812 = vmatpush.bf16.msra.mxu1 %v3663_v17  ;;  %3813 = vmatpush.bf16.msra.mxu2 %v3663_v17  ;;  %v441_v63 = vsel %vm372_vm1, %v303_v50, %v351_v53  ;;  %v437_v1 = vrot.slane %v435_v58, 3  ;;  %v440_v3 = vsel %vm368_vm0, %v303_v50, %v351_v53  ;;  %v353_v6 = vrot.slane %v305_v0, 3  ;;  %v3660_v41 = vld [vmem:[%s4862_s2 + $0x38] sm:$0xff] }
  0x24   : > { %3814 = vmatpush.bf16.msra.mxu3 %v3663_v17  ;;  %1133 = vmatpush.bf16.msra.mxu0 %v3663_v17  ;;  %v443_v4 = vrot.slane %v441_v63, 1  ;;  %v444_v7 = vsel %vm376_vm2, %v303_v50, %v351_v53  ;;  %v447_v8 = vsel %vm380_vm3, %v303_v50, %v351_v53  ;;  %v352_v9 = vrot.slane %v304_v2, 3  ;;  %v311_v51 = vld [vmem:[%s3983_s10 + $0x3c] sm:$0xf]  ;;  %v310_v55 = vld [vmem:[%s3983_s10 + $0x38] sm:$0x1] }
  0x25   : > { %v446_v10 = vrot.slane %v444_v7, 2  ;;  %v449_v12 = vrot.slane %v447_v8, 3  ;;  %v456_v13 = vsel %vm372_vm1, %v305_v0, %v353_v6  ;;  %v459_v14 = vsel %vm376_vm2, %v305_v0, %v353_v6 }
  0x26   : > { %v609_v40 = vld [vmem:[#allocation1] sm:$0xff]  ;;  %v452_v15 = vsel %vm368_vm0, %v304_v2, %v352_v9  ;;  %v462_v16 = vsel %vm380_vm3, %v305_v0, %v353_v6  ;;  %v354_v18 = vrot.slane %v306_v11, 3  ;;  %v455_v19 = vsel %vm368_vm0, %v305_v0, %v353_v6 }
  0x27   : > { %3815 = vmatpush.bf16.msra.mxu1 %v3662_v28  ;;  %3816 = vmatpush.bf16.msra.mxu2 %v3662_v28  ;;  %611 = vst [vmem:[#allocation1] ss:$4 sm:$0xff] %v398_v34  ;;  %v458_v20 = vrot.slane %v456_v13, 1  ;;  %v461_v21 = vrot.slane %v459_v14, 2  ;;  %v464_v22 = vrot.slane %v462_v16, 3  ;;  %v356_v29 = vrot.slane %v308_v25, 3 }
  0x28   : > { %3817 = vmatpush.bf16.msra.mxu3 %v3662_v28  ;;  %1134 = vmatpush.bf16.msra.mxu0 %v3662_v28  ;;  %612 = vst [vmem:[#allocation1 + $0x1] ss:$4 sm:$0xff] %v401_v36  ;;  %v467_v24 = vsel %vm368_vm0, %v306_v11, %v354_v18  ;;  %v468_v26 = vsel %vm372_vm1, %v306_v11, %v354_v18  ;;  %v355_v32 = vrot.slane %v307_v27, 3  ;;  %v358_v63 = vrot.slane %v310_v55, 3 }
  0x29   : > { %614 = vst [vmem:[#allocation1 + $0x2] ss:$4 sm:$0xff] %v404_v37  ;;  %v610_v49 = vld [vmem:[#allocation1 + $0x20] sm:$0xff]  ;;  %v471_v28 = vsel %vm376_vm2, %v306_v11, %v354_v18  ;;  %v474_v30 = vsel %vm380_vm3, %v306_v11, %v354_v18  ;;  %v470_v31 = vrot.slane %v468_v26, 1  ;;  %v483_v36 = vsel %vm372_vm1, %v308_v25, %v356_v29 }
  0x2a   : > { %616 = vst [vmem:[#allocation1 + $0x3] ss:$4 sm:$0xff] %v407_v38  ;;  %v476_v35 = vrot.slane %v474_v30, 3  ;;  %v486_v37 = vsel %vm376_vm2, %v308_v25, %v356_v29  ;;  %v309_v38 = vld [vmem:[%s3983_s10 + $0x34] sm:$0xf]  ;;  %v479_v39 = vsel %vm368_vm0, %v307_v27, %v355_v32  ;;  %v482_v43 = vsel %vm368_vm0, %v308_v25, %v356_v29  ;;  %v3657_v30 = vld [vmem:[%s4862_s2 + $0x20] sm:$0xff] }
  0x2b   : > { %3818 = vmatpush.bf16.msra.mxu1 %v3661_v33  ;;  %3819 = vmatpush.bf16.msra.mxu2 %v3661_v33  ;;  %618 = vst [vmem:[#allocation1 + $0x20] ss:$4 sm:$0xff] %v410_v42  ;;  %v485_v44 = vrot.slane %v483_v36, 1  ;;  %v357_v47 = vrot.slane %v309_v38, 3  ;;  %v506_v9 = vsel %vm368_vm0, %v310_v55, %v358_v63 }
  0x2c   : > { %3820 = vmatpush.bf16.msra.mxu3 %v3661_v33  ;;  %1135 = vmatpush.bf16.msra.mxu0 %v3661_v33  ;;  %619 = vst [vmem:[#allocation1 + $0x21] ss:$4 sm:$0xff] %v413_v45  ;;  %v473_v33 = vrot.slane %v471_v28, 2  ;;  %v488_v45 = vrot.slane %v486_v37, 2 }
  0x2d   : > { %621 = vst [vmem:[#allocation1 + $0x22] ss:$4 sm:$0xff] %v416_v46  ;;  %v3659_v46 = vld [vmem:[%s4862_s2 + $0x30] sm:$0xff]  ;;  %v495_v52 = vsel %vm372_vm1, %v309_v38, %v357_v47  ;;  %v498_v56 = vsel %vm376_vm2, %v309_v38, %v357_v47 }
  0x2e   : > { %623 = vst [vmem:[#allocation1 + $0x23] ss:$4 sm:$0xff] %v419_v48  ;;  %v500_v0 = vrot.slane %v498_v56, 2  ;;  %v4140_v56 = vld [vmem:[%s3983_s10 + $0x54] sm:$0xf] }
  0x2f   : > { %751 = vst [vmem:[#allocation2] sm:$0xf] %v609_v40  ;;  %v489_v40 = vsel %vm380_vm3, %v308_v25, %v356_v29  ;;  %1239 = vmatpush.bf16.msrb.mxu1 %v3660_v41  ;;  %v3676_v25 = vld [vmem:[%s4862_s2 + $0xb8] sm:$0xff] }
  0x30   : > { %752 = vst [vmem:[#allocation2 + $0x4] sm:$0xf] %v610_v49  ;;  %v491_v49 = vrot.slane %v489_v40, 3  ;;  %1391 = vmatpush.bf16.msrb.mxu2 %v3676_v25  ;;  %v3689_v25 = vld [vmem:[%s4862_s2 + $0xe0] sm:$0xff] }
  0x31   : > { %v624_v61 = vld [vmem:[#allocation1] sm:$0xff] }
  0x32   : > { %627 = vst [vmem:[#allocation1] ss:$4 sm:$0xff] %v422_v54 }
  0x33   : > { %628 = vst [vmem:[#allocation1 + $0x1] ss:$4 sm:$0xff] %v425_v57  ;;  %1240 = vmatpush.bf16.msrb.mxu1 %v3659_v46  ;;  %v359_v57 = vrot.slane %v311_v51, 3 }
  0x34   : > { %629 = vst [vmem:[#allocation1 + $0x2] ss:$4 sm:$0xff] %v428_v59  ;;  %v494_v59 = vsel %vm368_vm0, %v309_v38, %v357_v47 }
  0x35   : > { %v625_v5 = vld [vmem:[#allocation1 + $0x20] sm:$0xff]  ;;  %631 = vst [vmem:[#allocation1 + $0x3] ss:$4 sm:$0xff] %v431_v60  ;;  %v497_v60 = vrot.slane %v495_v52, 1  ;;  %v513_v7 = vsel %vm376_vm2, %v311_v51, %v359_v57  ;;  %v516_v16 = vsel %vm380_vm3, %v311_v51, %v359_v57 }
  0x36   : > { %633 = vst [vmem:[#allocation1 + $0x20] ss:$4 sm:$0xff] %v434_v62  ;;  %v515_v14 = vrot.slane %v513_v7, 2 }
  0x37   : > { %635 = vst [vmem:[#allocation1 + $0x21] ss:$4 sm:$0xff] %v437_v1 }
  0x38   : > { %636 = vst [vmem:[#allocation1 + $0x22] ss:$4 sm:$0xff] %v440_v3  ;;  %v312_v3 = vld [vmem:[%s3983_s10 + $0x40] sm:$0xf] }
  0x39   : > { %638 = vst [vmem:[#allocation1 + $0x23] ss:$4 sm:$0xff] %v443_v4  ;;  %v360_v11 = vrot.slane %v312_v3, 3 }
  0x3a   : > { %753 = vst [vmem:[#allocation2 + $0x8] sm:$0xf] %v624_v61  ;;  %v501_v61 = vsel %vm380_vm3, %v309_v38, %v357_v47  ;;  %v3691_v38 = vld [vmem:[%s4862_s2 + $0xf0] sm:$0xff]  ;;  %v3674_v47 = vld [vmem:[%s4862_s2 + $0xa8] sm:$0xff] }
  0x3b   : > { %754 = vst [vmem:[#allocation2 + $0xc] sm:$0xf] %v625_v5  ;;  %v503_v4 = vrot.slane %v501_v61, 3  ;;  %v510_v5 = vsel %vm372_vm1, %v311_v51, %v359_v57  ;;  %v522_v18 = vsel %vm372_vm1, %v312_v3, %v360_v11  ;;  %v521_v28 = vsel %vm368_vm0, %v312_v3, %v360_v11 }
  0x3c   : > { %v639_v17 = vld [vmem:[#allocation1] sm:$0xff]  ;;  %v512_v13 = vrot.slane %v510_v5, 1  ;;  %v524_v29 = vrot.slane %v522_v18, 1 }
  0x3d   : > { %642 = vst [vmem:[#allocation1] ss:$4 sm:$0xff] %v446_v10 }
  0x3e   : > { %644 = vst [vmem:[#allocation1 + $0x1] ss:$4 sm:$0xff] %v449_v12  ;;  %v509_v12 = vsel %vm368_vm0, %v311_v51, %v359_v57 }
  0x3f   : > { %645 = vst [vmem:[#allocation1 + $0x2] ss:$4 sm:$0xff] %v452_v15  ;;  %v314_v15 = vld [vmem:[%s3983_s10 + $0x48] sm:$0xf] }
  0x40   : > { %v640_v23 = vld [vmem:[#allocation1 + $0x20] sm:$0xff]  ;;  %646 = vst [vmem:[#allocation1 + $0x3] ss:$4 sm:$0xff] %v455_v19  ;;  %v362_v19 = vrot.slane %v314_v15, 3 }
  0x41   : > { %648 = vst [vmem:[#allocation1 + $0x20] ss:$4 sm:$0xff] %v458_v20  ;;  %v518_v20 = vrot.slane %v516_v16, 3 }
  0x42   : > { %650 = vst [vmem:[#allocation1 + $0x21] ss:$4 sm:$0xff] %v461_v21  ;;  %v525_v21 = vsel %vm376_vm2, %v312_v3, %v360_v11  ;;  %v537_v37 = vsel %vm372_vm1, %v314_v15, %v362_v19  ;;  %v543_v52 = vsel %vm380_vm3, %v314_v15, %v362_v19  ;;  %v4147_v63 = vld [vmem:[#allocation2 + $0x8] sm:$0xff] }
  0x43   : > { %652 = vst [vmem:[#allocation1 + $0x22] ss:$4 sm:$0xff] %v464_v22  ;;  %v3658_v22 = vld [vmem:[%s4862_s2 + $0x28] sm:$0xff]  ;;  %v527_v32 = vrot.slane %v525_v21, 2  ;;  %v545_v57 = vrot.slane %v543_v52, 3  ;;  %v3653_v21 = vld [vmem:[%s4862_s2] sm:$0xff] }
  0x44   : > { %653 = vst [vmem:[#allocation1 + $0x23] ss:$4 sm:$0xff] %v467_v24  ;;  %v528_v24 = vsel %vm380_vm3, %v312_v3, %v360_v11  ;;  %1241 = vmatpush.bf16.msrb.mxu1 %v3658_v22  ;;  %v3654_v11 = vld [vmem:[%s4862_s2 + $0x8] sm:$0xff]  ;;  %v3672_v22 = vld [vmem:[%s4862_s2 + $0x98] sm:$0xff] }
  0x45   : > { %755 = vst [vmem:[#allocation2 + $0x10] sm:$0xf] %v639_v17  ;;  %v313_v17 = vld [vmem:[%s3983_s10 + $0x44] sm:$0x1]  ;;  %v530_v36 = vrot.slane %v528_v24, 3 }
  0x46   : > { %756 = vst [vmem:[#allocation2 + $0x14] sm:$0xf] %v640_v23  ;;  %v361_v27 = vrot.slane %v313_v17, 3 }
  0x47   : > { %v654_v34 = vld [vmem:[#allocation1] sm:$0xff] }
  0x48   : > { %757 = vst [vmem:[#allocation2 + $0x18] sm:$0xf] %v654_v34  ;;  %v3675_v34 = vld [vmem:[%s4862_s2 + $0xb0] sm:$0xff]  ;;  %v533_v41 = vsel %vm368_vm0, %v313_v17, %v361_v27  ;;  %1242 = vmatpush.bf16.msrb.mxu1 %v3657_v30 }
  0x49   : > { %657 = vst [vmem:[#allocation1] ss:$4 sm:$0xff] %v470_v31  ;;  %v3692_v31 = vld [vmem:[%s4862_s2 + $0xf8] sm:$0xff]  ;;  %1392 = vmatpush.bf16.msrb.mxu2 %v3675_v34 }
  0x4a   : > { %659 = vst [vmem:[#allocation1 + $0x1] ss:$4 sm:$0xff] %v473_v33  ;;  %1623 = vmatpush.bf16.msrb.mxu3 %v3692_v31  ;;  %v318_v31 = vld [vmem:[%s3983_s10 + $0x58] sm:$0xf] }
  0x4b   : > { %v655_v42 = vld [vmem:[#allocation1 + $0x20] sm:$0xff]  ;;  %661 = vst [vmem:[#allocation1 + $0x2] ss:$4 sm:$0xff] %v476_v35 }
  0x4c   : > { %758 = vst [vmem:[#allocation2 + $0x1c] sm:$0xf] %v655_v42  ;;  %v3656_v42 = vld [vmem:[%s4862_s2 + $0x18] sm:$0xff] }
  0x4d   : > { %v4060_v48 = vld [vmem:[#allocation2 + $0x10] sm:$0xff]  ;;  %662 = vst [vmem:[#allocation1 + $0x3] ss:$4 sm:$0xff] %v479_v39  ;;  %1243 = vmatpush.bf16.msrb.mxu1 %v3656_v42  ;;  %1393 = vmatpush.bf16.msrb.mxu2 %v3674_v47 }
  0x4e   : > { %663 = vst [vmem:[#allocation1 + $0x20] ss:$4 sm:$0xff] %v482_v43  ;;  %v1011_v50 = vshll.u32 %v4060_v48, 16  ;;  %v1015_v54 = vshrl.u32 %v4060_v48, 16  ;;  %v315_v43 = vld [vmem:[%s3983_s10 + $0x4c] sm:$0xf]  ;;  %1624 = vmatpush.bf16.msrb.mxu3 %v3691_v38 }
  0x4f   : > { %665 = vst [vmem:[#allocation1 + $0x21] ss:$4 sm:$0xff] %v485_v44  ;;  %v536_v44 = vsel %vm368_vm0, %v314_v15, %v362_v19  ;;  %v363_v51 = vrot.slane %v315_v43, 3 }
  0x50   : > { %667 = vst [vmem:[#allocation1 + $0x22] ss:$4 sm:$0xff] %v488_v45  ;;  %v4065_v53 = vrot.slane %v1011_v50, 1  ;;  %v539_v45 = vrot.slane %v537_v37, 1  ;;  %v366_v37 = vrot.slane %v318_v31, 3 }
  0x51   : > { %669 = vst [vmem:[#allocation1 + $0x23] ss:$4 sm:$0xff] %v491_v49  ;;  %v540_v49 = vsel %vm376_vm2, %v314_v15, %v362_v19  ;;  %v549_v61 = vsel %vm372_vm1, %v315_v43, %v363_v51  ;;  %v555_v3 = vsel %vm380_vm3, %v315_v43, %v363_v51  ;;  %v3690_v15 = vld [vmem:[%s4862_s2 + $0xe8] sm:$0xff]  ;;  %v3700_v19 = vld [vmem:[%s4862_s2 + $0x138] sm:$0xff] }
  0x52   : > { %v1017_v1 = vor.u32 %v1015_v54, %v4065_v53  ;;  %v3655_v54 = vld [vmem:[%s4862_s2 + $0x10] sm:$0xff]  ;;  %v542_v55 = vrot.slane %v540_v49, 2  ;;  %v557_v18 = vrot.slane %v555_v3, 3  ;;  %1625 = vmatpush.bf16.msrb.mxu3 %v3690_v15  ;;  %1863 = vmatpush.bf16.msrb.mxu0 %v3700_v19  ;;  %v579_v49 = vsel %vm376_vm2, %v318_v31, %v366_v37 }
  0x53   : > { %v4070_v58 = vld [vmem:[#allocation2 + $0x18] sm:$0xff]  ;;  %1244 = vmatpush.bf16.msrb.mxu1 %v3655_v54 }
  0x54   : > { %v670_v62 = vld [vmem:[#allocation1] sm:$0xff]  ;;  %v1019_v2 = vshll.u32 %v4070_v58, 16  ;;  %v1023_v23 = vshrl.u32 %v4070_v58, 16 }
  0x55   : > { %759 = vst [vmem:[#allocation2 + $0x20] sm:$0xf] %v670_v62  ;;  %v552_v62 = vsel %vm376_vm2, %v315_v43, %v363_v51 }
  0x56   : > { %672 = vst [vmem:[#allocation1] ss:$4 sm:$0xff] %v494_v59  ;;  %v1021_v6 = vrot.slane %v1019_v2, 1  ;;  %v4142_v59 = vld [vmem:[#allocation2] sm:$0xff]   ;;  %v548_v2 = vsel %vm368_vm0, %v315_v43, %v363_v51  ;;  %1626 = vmatpush.bf16.msrb.mxu3 %v3689_v25  ;;  %v319_v43 = vld [vmem:[%s3983_s10 + $0x5c] sm:$0x1] }
  0x57   : > { %674 = vst [vmem:[#allocation1 + $0x1] ss:$4 sm:$0xff] %v497_v60  ;;  %v316_v60 = vld [vmem:[%s3983_s10 + $0x50] sm:$0x1]  ;;  %1245 = vmatpush.bf16.msrb.mxu1 %v3654_v11  ;;  %v769_v51 = vld [vmem:[%s4210_s14] sm:$0xf] }
  0x58   : > { %v671_v8 = vld [vmem:[#allocation1 + $0x20] sm:$0xff]  ;;  %676 = vst [vmem:[#allocation1 + $0x2] ss:$4 sm:$0xff] %v500_v0  ;;  %v1022_v10 = vsel %vm994_vm4, %v1017_v1, %v1021_v6  ;;  %v1025_v39 = vor.u32 %v1023_v23, %v1021_v6  ;;  %v998_v0 = vshll.u32 %v4142_v59, 16  ;;  %v1003_v6 = vshll.u32 %v4147_v63, 16  ;;  %v3671_v11 = vld [vmem:[%s4862_s2 + $0x90] sm:$0xff] }
  0x59   : > { %760 = vst [vmem:[#allocation2 + $0x24] sm:$0xf] %v671_v8  ;;  %1146 = vmatmul.bf16.vlgmr.msra.gmra.mxu1 %v1022_v10  ;;  %v364_v7 = vrot.slane %v316_v60, 3  ;;  %v365_v8 = vrot.slane %v4140_v56, 3  ;;  %v554_v10 = vrot.slane %v552_v62, 2  ;;  %v367_v54 = vrot.slane %v319_v43, 3 }
  0x5a   : > { %678 = vst [vmem:[#allocation1 + $0x3] ss:$4 sm:$0xff] %v503_v4  ;;  %v996_v4 = vshrl.u32 %v4142_v59, 16  ;;  %v1000_v5 = vrot.slane %v998_v0, 1  ;;  %v781_v0 = vrot.slane %v769_v51, 3 }
  0x5b   : > { %679 = vst [vmem:[#allocation1 + $0x20] ss:$4 sm:$0xff] %v506_v9  ;;  %v551_v9 = vrot.slane %v549_v61, 1  ;;  %v560_v24 = vsel %vm368_vm0, %v316_v60, %v364_v7  ;;  %v563_v27 = vsel %vm368_vm0, %v4140_v56, %v365_v8  ;;  %1246 = vmatpush.bf16.msrb.mxu1 %v3653_v21  ;;  %v581_v60 = vrot.slane %v579_v49, 2 }
  0x5c   : > { %680 = vst [vmem:[#allocation1 + $0x21] ss:$4 sm:$0xff] %v509_v12  ;;  %v1001_v12 = vor.u32 %v1000_v5, %v996_v4  ;;  %v793_v3 = vsel %vm376_vm2, %v769_v51, %v781_v0  ;;  %v3698_v4 = vld [vmem:[%s4862_s2 + $0x128] sm:$0xff] }
  0x5d   : > { %682 = vst [vmem:[#allocation1 + $0x22] ss:$4 sm:$0xff] %v512_v13  ;;  %v4159_v13 = vrot.slane %v1003_v6, 1  ;;  %v3688_v6 = vld [vmem:[%s4862_s2 + $0xd8] sm:$0xff]  ;;  %v795_v15 = vrot.slane %v793_v3, 2 }
  0x5e   : > { %684 = vst [vmem:[#allocation1 + $0x23] ss:$4 sm:$0xff] %v515_v14  ;;  %v3673_v14 = vld [vmem:[%s4862_s2 + $0xa0] sm:$0xff]  ;;  %1627 = vmatpush.bf16.msrb.mxu3 %v3688_v6 }
  0x5f   : > { %1394 = vmatpush.bf16.msrb.mxu2 %v3673_v14 }
  0x60   : > { %v4095_v26 = vld [vmem:[#allocation2 + $0x20] sm:$0xff] }
  0x61   : > { %v685_v33 = vld [vmem:[#allocation1] sm:$0xff]  ;;  %v1027_v35 = vshll.u32 %v4095_v26, 16  ;;  %v1031_v17 = vshrl.u32 %v4095_v26, 16 }
  0x62   : > { %688 = vst [vmem:[#allocation1] ss:$4 sm:$0xff] %v518_v20  ;;  %v1006_v20 = vsel %vm994_vm4, %v1001_v12, %v4159_v13  ;;  %v1007_v12 = vshrl.u32 %v4147_v63, 16 }
  0x63   : > { %689 = vst [vmem:[#allocation1 + $0x1] ss:$4 sm:$0xff] %v521_v28  ;;  %v4113_v40 = vrot.slane %v1027_v35, 1  ;;  %1136 = vmatmul.bf16.vlgmr.msra.gmra.mxu0 %v1006_v20  ;;  %v3699_v28 = vld [vmem:[%s4862_s2 + $0x130] sm:$0xff]  ;;  %1395 = vmatpush.bf16.msrb.mxu2 %v3672_v22  ;;  %v3670_v20 = vld [vmem:[%s4862_s2 + $0x88] sm:$0xff] }
  0x64   : > { %691 = vst [vmem:[#allocation1 + $0x2] ss:$4 sm:$0xff] %v524_v29  ;;  %1864 = vmatpush.bf16.msrb.mxu0 %v3699_v28  ;;  %v1009_v19 = vor.u32 %v1007_v12, %v4159_v13  ;;  %v3686_v28 = vld [vmem:[%s4862_s2 + $0xc8] sm:$0xff]  ;;  %v4307_v12 = vld [vmem:[#allocation2 + $0x18] sm:$0xff] }
  0x65   : > { %v686_v46 = vld [vmem:[#allocation1 + $0x20] sm:$0xff]  ;;  %693 = vst [vmem:[#allocation1 + $0x3] ss:$4 sm:$0xff] %v527_v32  ;;  %v1030_v50 = vsel %vm994_vm4, %v1025_v39, %v4113_v40  ;;  %v1033_v30 = vor.u32 %v1031_v17, %v4113_v40  ;;  %v564_v32 = vsel %vm372_vm1, %v4140_v56, %v365_v8 }
  0x66   : > { %695 = vst [vmem:[#allocation1 + $0x20] ss:$4 sm:$0xff] %v530_v36  ;;  %v570_v36 = vsel %vm380_vm3, %v4140_v56, %v365_v8  ;;  %v566_v38 = vrot.slane %v564_v32, 1  ;;  %v3697_v17 = vld [vmem:[%s4862_s2 + $0x120] sm:$0xff]  ;;  %v1014_v25 = vsel %vm994_vm4, %v1009_v19, %v4065_v53  ;;  %v3723_v19 = vld [vmem:[%s4862_s2 + $0x1b0] sm:$0xff] }
  0x67   : > { %696 = vst [vmem:[#allocation1 + $0x21] ss:$4 sm:$0xff] %v533_v41  ;;  %1396 = vmatpush.bf16.msrb.mxu2 %v3671_v11  ;;  %v3669_v53 = vld [vmem:[%s4862_s2 + $0x80] sm:$0xff]  ;;  %v3732_v11 = vld [vmem:[%s4862_s2 + $0x1f8] sm:$0xff] }
  0x68   : > { %697 = vst [vmem:[#allocation1 + $0x22] ss:$4 sm:$0xff] %v536_v44  ;;  %v572_v44 = vrot.slane %v570_v36, 3  ;;  %1865 = vmatpush.bf16.msrb.mxu0 %v3698_v4  ;;  %v3685_v32 = vld [vmem:[%s4862_s2 + $0xc0] sm:$0xff] }
  0x69   : > { %699 = vst [vmem:[#allocation1 + $0x23] ss:$4 sm:$0xff] %v539_v45  ;;  %1151 = vmatmul.bf16.gmra.mxu1 %v1030_v50  ;;  %v576_v45 = vsel %vm372_vm1, %v318_v31, %v366_v37  ;;  %v582_v50 = vsel %vm380_vm3, %v318_v31, %v366_v37 }
  0x6a   : > { %761 = vst [vmem:[#allocation2 + $0x28] sm:$0xf] %v685_v33  ;;  %v567_v33 = vsel %vm376_vm2, %v4140_v56, %v365_v8  ;;  %v578_v56 = vrot.slane %v576_v45, 1  ;;  %v584_v62 = vrot.slane %v582_v50, 3  ;;  %v789_v8 = vsel %vm368_vm0, %v769_v51, %v781_v0 }
  0x6b   : > { %762 = vst [vmem:[#allocation2 + $0x2c] sm:$0xf] %v686_v46  ;;  %v569_v41 = vrot.slane %v567_v33, 2  ;;  %1397 = vmatpush.bf16.msrb.mxu2 %v3670_v20  ;;  %v3731_v20 = vld [vmem:[%s4862_s2 + $0x1f0] sm:$0xff] }
  0x6c   : > { %v700_v1 = vld [vmem:[#allocation1] sm:$0xff]  ;;  %1866 = vmatpush.bf16.msrb.mxu0 %v3697_v17  ;;  %v1735_v17 = vshrl.u32 %v4307_v12, 16 }
  0x6d   : > { %763 = vst [vmem:[#allocation2 + $0x30] sm:$0xf] %v700_v1  ;;  %v587_v1 = vsel %vm368_vm0, %v319_v43, %v367_v54  ;;  %v3724_v43 = vld [vmem:[%s4862_s2 + $0x1b8] sm:$0xff] }
  0x6e   : > { %703 = vst [vmem:[#allocation1] ss:$4 sm:$0xff] %v542_v55  ;;  %v575_v55 = vsel %vm368_vm0, %v318_v31, %v366_v37  ;;  %v4262_v31 = vld [vmem:[#allocation2 + $0xc] sm:$0xf] }
  0x6f   : > { %705 = vst [vmem:[#allocation1 + $0x1] ss:$4 sm:$0xff] %v545_v57  ;;  %1398 = vmatpush.bf16.msrb.mxu2 %v3669_v53 }
  0x70   : > { %v701_v16 = vld [vmem:[#allocation1 + $0x20] sm:$0xff]  ;;  %706 = vst [vmem:[#allocation1 + $0x2] ss:$4 sm:$0xff] %v548_v2  ;;  %v790_v2 = vsel %vm372_vm1, %v769_v51, %v781_v0 }
  0x71   : > { %764 = vst [vmem:[#allocation2 + $0x34] sm:$0xf] %v701_v16  ;;  %v3687_v16 = vld [vmem:[%s4862_s2 + $0xd0] sm:$0xff] }
  0x72   : > { %v4179_v23 = vld [vmem:[#allocation2 + $0x28] sm:$0xff]  ;;  %708 = vst [vmem:[#allocation1 + $0x3] ss:$4 sm:$0xff] %v551_v9  ;;  %v792_v9 = vrot.slane %v790_v2, 1  ;;  %1628 = vmatpush.bf16.msrb.mxu3 %v3687_v16  ;;  %v3740_v16 = vld [vmem:[%s4862_s2 + $0x238] sm:$0xff] }
  0x73   : > { %710 = vst [vmem:[#allocation1 + $0x20] ss:$4 sm:$0xff] %v554_v10  ;;  %v1035_v29 = vshll.u32 %v4179_v23, 16  ;;  %v1039_v35 = vshrl.u32 %v4179_v23, 16  ;;  %v796_v10 = vsel %vm380_vm3, %v769_v51, %v781_v0  ;;  %1141 = vmatmul.bf16.gmra.mxu0 %v1014_v25 }
  0x74   : > { %712 = vst [vmem:[#allocation1 + $0x21] ss:$4 sm:$0xff] %v557_v18  ;;  %v798_v22 = vrot.slane %v796_v10, 3 }
  0x75   : > { %713 = vst [vmem:[#allocation1 + $0x22] ss:$4 sm:$0xff] %v560_v24  ;;  %v1037_v34 = vrot.slane %v1035_v29, 1 }
  0x76   : > { %714 = vst [vmem:[#allocation1 + $0x23] ss:$4 sm:$0xff] %v563_v27  ;;  %v3696_v27 = vld [vmem:[%s4862_s2 + $0x118] sm:$0xff]  ;;  %1629 = vmatpush.bf16.msrb.mxu3 %v3686_v28 }
  0x77   : > { %v1038_v40 = vsel %vm994_vm4, %v1033_v30, %v1037_v34  ;;  %v1041_v46 = vor.u32 %v1039_v35, %v1037_v34  ;;  %v1463_v30 = vld [vmem:[#allocation2 + $0x8] sm:$0xe]  ;;  %1867 = vmatpush.bf16.msrb.mxu0 %v3696_v27  ;;  %v1519_v34 = vunpack.c.l.b16 %v4262_v31  ;;  %v1316_v27 = vrot.slane %v4147_v63, 1 }
  0x78   : > { %v4204_v39 = vld [vmem:[#allocation2 + $0x30] sm:$0xff]  ;;  %v1518_v33 = vunpack.c.l.b16 %v1463_v30 }
  0x79   : > { %v715_v42 = vld [vmem:[#allocation1] sm:$0xff]  ;;  %v1043_v47 = vshll.u32 %v4204_v39, 16  ;;  %1156 = vmatmul.bf16.gmra.mxu1 %v1038_v40  ;;  %v1047_v5 = vshrl.u32 %v4204_v39, 16 }
  0x7a   : > { %765 = vst [vmem:[#allocation2 + $0x38] sm:$0xf] %v715_v42  ;;  %1630 = vmatpush.bf16.msrb.mxu3 %v3685_v32  ;;  %v4275_v37 = vpack.c.b16 %v1519_v34, %v1518_v33  ;;  %v3693_v42 = vld [vmem:[%s4862_s2 + $0x100] sm:$0xff]  ;;  %v4331_v32 = vld [vmem:[#allocation2 + $0x20] sm:$0xff] }
  0x7b   : > { %718 = vst [vmem:[#allocation1] ss:$4 sm:$0xff] %v566_v38  ;;  %v1045_v52 = vrot.slane %v1043_v47, 1  ;;  %v3694_v38 = vld [vmem:[%s4862_s2 + $0x108] sm:$0xff]  ;;  %v3708_v47 = vld [vmem:[%s4862_s2 + $0x178] sm:$0xff]  ;;  %v1744_v33 = vshrl.u32 %v4331_v32, 16 }
  0x7c   : > { %720 = vst [vmem:[#allocation1 + $0x1] ss:$4 sm:$0xff] %v569_v41  ;;  %v4281_v41 = vld [vmem:[#allocation2 + $0x10] sm:$0xff]  ;;  %2033 = vmatpush.bf16.msra.mxu1 %v3708_v47 }
  0x7d   : > { %v716_v57 = vld [vmem:[#allocation1 + $0x20] sm:$0xff]  ;;  %722 = vst [vmem:[#allocation1 + $0x2] ss:$4 sm:$0xff] %v572_v44  ;;  %v1046_v61 = vsel %vm994_vm4, %v1041_v46, %v1045_v52  ;;  %v1049_v21 = vor.u32 %v1047_v5, %v1045_v52  ;;  %v1718_v44 = vshrl.u32 %v4275_v37, 16  ;;  %v1721_v46 = vshll.u32 %v4275_v37, 16 }
  0x7e   : > { %766 = vst [vmem:[#allocation2 + $0x3c] sm:$0xf] %v716_v57  ;;  %1161 = vmatmul.bf16.vlgmr.msra.gmra.mxu2 %v1046_v61  ;;  %v1726_v50 = vshrl.u32 %v4281_v41, 16  ;;  %v1729_v51 = vshll.u32 %v4281_v41, 16  ;;  %v1548_v30 = vrot.slane %v4281_v41, 1  ;;  %v1958_v31 = vrot.slane %v4281_v41, 2 }
  0x7f   : > { %723 = vst [vmem:[#allocation1 + $0x3] ss:$4 sm:$0xff] %v575_v55  ;;  %2265 = vmatpush.bf16.msra.mxu2 %v3724_v43  ;;  %v1720_v49 = vrot.slane %v1718_v44, 1  ;;  %v1723_v54 = vrot.slane %v1721_v46, 2  ;;  %v1318_v44 = vrot.slane %v4060_v48, 1  ;;  %v3717_v41 = vld [vmem:[%s4862_s2 + $0x180] sm:$0xff] }
  0x80   : > { %725 = vst [vmem:[#allocation1 + $0x20] ss:$4 sm:$0xff] %v578_v56  ;;  %v1728_v55 = vrot.slane %v1726_v50, 1  ;;  %v1731_v56 = vrot.slane %v1729_v51, 2  ;;  %v4353_v51 = vld [vmem:[#allocation2 + $0x28] sm:$0xff] }
  0x81   : > { %727 = vst [vmem:[#allocation1 + $0x21] ss:$4 sm:$0xff] %v581_v60  ;;  %v1724_v60 = vor.u32 %v1723_v54, %v1720_v49  ;;  %v1319_v47 = vsel %vm1314_vm6, %v1316_v27, %v1318_v44  ;;  %v1550_v49 = vrot.slane %v4307_v12, 1  ;;  %v1756_v54 = vshll.u32 %v4353_v51, 16 }
  0x82   : > { %729 = vst [vmem:[#allocation1 + $0x22] ss:$4 sm:$0xff] %v584_v62  ;;  %v1732_v62 = vor.u32 %v1731_v56, %v1728_v55  ;;  %v3721_v55 = vld [vmem:[%s4862_s2 + $0x1a0] sm:$0xff] }
  0x83   : > { %730 = vst [vmem:[#allocation1 + $0x23] ss:$4 sm:$0xff] %v587_v1  ;;  %2266 = vmatpush.bf16.msra.mxu2 %v3723_v19  ;;  %v1551_v50 = vsel %vm1314_vm6, %v1548_v30, %v1550_v49  ;;  %v3729_v56 = vld [vmem:[%s4862_s2 + $0x1e0] sm:$0xff] }
  0x84   : > { %v1733_v3 = vsel %vm1716_vm5, %v1724_v60, %v1732_v62  ;;  %v1758_v60 = vrot.slane %v1756_v54, 2  ;;  %v3727_v54 = vld [vmem:[%s4862_s2 + $0x1d0] sm:$0xff] }
  0x85   : > { %v4230_v7 = vld [vmem:[#allocation2 + $0x38] sm:$0xff] }
  0x86   : > { %v731_v14 = vld [vmem:[#allocation1] sm:$0xff]  ;;  %v1051_v18 = vshll.u32 %v4230_v7, 16  ;;  %v1055_v40 = vshrl.u32 %v4230_v7, 16 }
  0x87   : > { %767 = vst [vmem:[#allocation2 + $0x40] sm:$0xf] %v731_v14 }
  0x88   : > { %841 = vst [vmem:[#allocation1] ss:$4 sm:$0xff] %v789_v8  ;;  %v1053_v24 = vrot.slane %v1051_v18, 1  ;;  %v3787_v8 = vld [vmem:[#allocation2] sm:$0xf0]  ;;  %v1738_v18 = vshll.u32 %v4307_v12, 16 }
  0x89   : > { %844 = vst [vmem:[#allocation1 + $0x1] ss:$4 sm:$0xff] %v792_v9  ;;  %1247 = vmatmul.bf16.vlgmr.msrb.gmra.mxu1 %v4142_v59  ;;  %v3695_v59 = vld [vmem:[%s4862_s2 + $0x110] sm:$0xff]  ;;  %v3788_v9 = vld [vmem:[#allocation2] sm:$0xe] }
  0x8a   : > { %v732_v13 = vld [vmem:[#allocation1 + $0x20] sm:$0xff]  ;;  %847 = vst [vmem:[#allocation1 + $0x2] ss:$4 sm:$0xff] %v795_v15  ;;  %v1054_v29 = vsel %vm994_vm4, %v1049_v21, %v1053_v24  ;;  %1868 = vmatpush.bf16.msrb.mxu0 %v3695_v59  ;;  %v1057_v52 = vor.u32 %v1055_v40, %v1053_v24  ;;  %v3789_v15 = vor.u32 %v3788_v9, %v3787_v8  ;;  %v3707_v21 = vld [vmem:[%s4862_s2 + $0x170] sm:$0xff]  ;;  %v1740_v24 = vrot.slane %v1738_v18, 2  ;;  %v3706_v40 = vld [vmem:[%s4862_s2 + $0x168] sm:$0xff] }
  0x8b   : > { %768 = vst [vmem:[#allocation2 + $0x44] sm:$0xf] %v732_v13  ;;  %2034 = vmatpush.bf16.msra.mxu1 %v3707_v21 }
  0x8c   : > { %850 = vst [vmem:[#allocation1 + $0x3] ss:$4 sm:$0xff] %v798_v22  ;;  %v1737_v22 = vrot.slane %v1735_v17, 1  ;;  %v1315_v25 = vrot.slane %v3789_v15, 1 }
  0x8e   : > { %1166 = vmatmul.bf16.gmra.mxu2 %v1054_v29  ;;  %1869 = vmatpush.bf16.msrb.mxu0 %v3694_v38  ;;  %v1741_v13 = vor.u32 %v1740_v24, %v1737_v22  ;;  %v1317_v53 = vsel %vm1314_vm6, %v1315_v25, %v1316_v27  ;;  %v1547_v29 = vrot.slane %v4275_v37, 1  ;;  %v3722_v37 = vld [vmem:[%s4862_s2 + $0x1a8] sm:$0xff]  ;;  %v4395_v24 = vld [vmem:[#allocation2 + $0x38] sm:$0xff]  ;;  %v3704_v25 = vld [vmem:[%s4862_s2 + $0x158] sm:$0xff] }
  0x8f   : > { %v3730_v38 = vld [vmem:[%s4862_s2 + $0x1e8] sm:$0xff]  ;;  %2267 = vmatpush.bf16.msra.mxu2 %v3722_v37  ;;  %2035 = vmatpush.bf16.msra.mxu1 %v3706_v40  ;;  %v1771_v27 = vshrl.u32 %v4395_v24, 16 }
  0x90   : > { %v1742_v28 = vsel %vm1716_vm5, %v1732_v62, %v1741_v13  ;;  %v1549_v59 = vsel %vm1314_vm6, %v1547_v29, %v1548_v30 }
  0x91   : > { %v1773_v29 = vrot.slane %v1771_v27, 1 }
  0x92   : > { %v4271_v35 = vld [vmem:[#allocation2 + $0x40] sm:$0xff]  ;;  %1870 = vmatpush.bf16.msrb.mxu0 %v3693_v42  ;;  %v1746_v42 = vrot.slane %v1744_v33, 1 }
  0x93   : > { %v862_v36 = vld [vmem:[#allocation1] sm:$0xff]  ;;  %v1059_v45 = vshll.u32 %v4271_v35, 16  ;;  %v1063_v1 = vshrl.u32 %v4271_v35, 16  ;;  %2268 = vmatpush.bf16.msra.mxu2 %v3721_v55  ;;  %v3703_v55 = vld [vmem:[%s4862_s2 + $0x150] sm:$0xff] }
  0x94   : > { %888 = vst [vmem:[#allocation2 + $0x48] sm:$0xf] %v862_v36  ;;  %v1747_v36 = vshll.u32 %v4331_v32, 16 }
  0x95   : > { %v1061_v57 = vrot.slane %v1059_v45, 1  ;;  %1871 = vmatmul.bf16.vlgmr.msrb.gmra.mxu0 %v1733_v3 }
  0x96   : > { %2675 = vmatpush.bf16.msra.mxu0 %v3740_v16  ;;  %v1749_v43 = vrot.slane %v1747_v36, 2  ;;  %v1322_v16 = vrot.slane %v4095_v26, 1  ;;  %v770_v36 = vld [vmem:[%s4210_s14 + $0x4] sm:$0xf] }
  0x97   : > { %v1062_v2 = vsel %vm994_vm4, %v1057_v52, %v1061_v57  ;;  %v1065_v5 = vor.u32 %v1063_v1, %v1061_v57  ;;  %v1753_v52 = vshrl.u32 %v4353_v51, 16 }
  0x98   : > { %v1750_v45 = vor.u32 %v1749_v43, %v1746_v42 }
  0x99   : > { %1252 = vmatmul.bf16.gmra.mxu1 %v4147_v63  ;;  %v3739_v63 = vld [vmem:[%s4862_s2 + $0x230] sm:$0xff]  ;;  %v1755_v57 = vrot.slane %v1753_v52, 1 }
  0x9a   : > { %2676 = vmatpush.bf16.msra.mxu0 %v3739_v63  ;;  %v1751_v46 = vsel %vm1716_vm5, %v1741_v13, %v1750_v45  ;;  %v1774_v13 = vshll.u32 %v4395_v24, 16  ;;  %v3719_v52 = vld [vmem:[%s4862_s2 + $0x190] sm:$0xff] }
  0x9b   : > { %v928_v61 = vld [vmem:[#allocation2 + $0x48] sm:$0x1]  ;;  %v1759_v62 = vor.u32 %v1758_v60, %v1755_v57 }
  0x9c   : > { %v983_v0 = vunpack.c.l.b16 %v928_v61  ;;  %v1320_v61 = vrot.slane %v4070_v58, 1  ;;  %v1776_v30 = vrot.slane %v1774_v13, 2 }
  0x9e   : > { %v4301_v4 = vpack.c.b16 %v983_v0, %v983_v0  ;;  %1171 = vmatmul.bf16.gmra.mxu2 %v1062_v2  ;;  %v1760_v0 = vsel %vm1716_vm5, %v1750_v45, %v1759_v62  ;;  %v1321_v1 = vsel %vm1314_vm6, %v1318_v44, %v1320_v61  ;;  %v1552_v2 = vrot.slane %v4331_v32, 1 }
  0x9f   : > { %v1323_v19 = vsel %vm1314_vm6, %v1320_v61, %v1322_v16  ;;  %v1777_v63 = vor.u32 %v1776_v30, %v1773_v29  ;;  %v3735_v61 = vld [vmem:[%s4862_s2 + $0x210] sm:$0xff]  ;;  %v3718_v29 = vld [vmem:[%s4862_s2 + $0x188] sm:$0xff] }
  0xa0   : > { %v1067_v6 = vshll.u32 %v4301_v4, 16  ;;  %v1553_v3 = vsel %vm1314_vm6, %v1550_v49, %v1552_v2 }
  0xa2   : > { %v1069_v10 = vrot.slane %v1067_v6, 1  ;;  %v3737_v6 = vld [vmem:[%s4862_s2 + $0x220] sm:$0xff] }
  0xa4   : > { %v1070_v14 = vsel %vm994_vm4, %v1065_v5, %v1069_v10  ;;  %v4372_v5 = vld [vmem:[#allocation2 + $0x30] sm:$0xff] }
  0xa5   : > { %1176 = vmatmul.bf16.vlgmr.msra.gmra.mxu3 %v1070_v14  ;;  %1876 = vmatmul.bf16.gmra.mxu0 %v1742_v28  ;;  %v1762_v8 = vshrl.u32 %v4372_v5, 16  ;;  %v1765_v9 = vshll.u32 %v4372_v5, 16  ;;  %v3720_v10 = vld [vmem:[%s4862_s2 + $0x198] sm:$0xff]  ;;  %v1556_v40 = vrot.slane %v4372_v5, 1 }
  0xa6   : > { %2505 = vmatpush.bf16.msra.mxu3 %v3732_v11  ;;  %2269 = vmatpush.bf16.msra.mxu2 %v3720_v10  ;;  %v3736_v28 = vld [vmem:[%s4862_s2 + $0x218] sm:$0xff] }
  0xa7   : > { %v1764_v14 = vrot.slane %v1762_v8, 1  ;;  %v1767_v15 = vrot.slane %v1765_v9, 2  ;;  %v771_v8 = vld [vmem:[%s4210_s14 + $0x8] sm:$0x1] }
  0xa9   : > { %1257 = vmatmul.bf16.gmra.mxu1 %v4060_v48  ;;  %v3738_v48 = vld [vmem:[%s4862_s2 + $0x228] sm:$0xff]  ;;  %v1768_v17 = vor.u32 %v1767_v15, %v1764_v14  ;;  %v783_v14 = vrot.slane %v771_v8, 3 }
  0xaa   : > { %2506 = vmatpush.bf16.msra.mxu3 %v3731_v20  ;;  %2677 = vmatpush.bf16.msra.mxu0 %v3738_v48  ;;  %v1554_v20 = vrot.slane %v4353_v51, 1  ;;  %v4423_v48 = vld [vmem:[#allocation2 + $0x40] sm:$0xff] }
  0xab   : > { %v1769_v18 = vsel %vm1716_vm5, %v1759_v62, %v1768_v17  ;;  %v1778_v33 = vsel %vm1716_vm5, %v1768_v17, %v1777_v63  ;;  %v1780_v57 = vshrl.u32 %v4423_v48, 16  ;;  %v1783_v60 = vshll.u32 %v4423_v48, 16  ;;  %2270 = vmatpush.bf16.msra.mxu2 %v3719_v52  ;;  %v3701_v52 = vld [vmem:[%s4862_s2 + $0x140] sm:$0xff] }
  0xac   : > { %v1555_v22 = vsel %vm1314_vm6, %v1552_v2, %v1554_v20  ;;  %v1326_v2 = vrot.slane %v4204_v39, 1 }
  0xae   : > { %1399 = vmatmul.bf16.vlgmr.msrb.gmra.mxu2 %v1317_v53  ;;  %2507 = vmatpush.bf16.msra.mxu3 %v3730_v38  ;;  %v782_v38 = vrot.slane %v770_v36, 3 }
  0xaf   : > { %2678 = vmatpush.bf16.msra.mxu0 %v3737_v6  ;;  %2271 = vmatpush.bf16.msra.mxu2 %v3718_v29 }
  0xb0   : > { %v802_v42 = vsel %vm372_vm1, %v770_v36, %v782_v38  ;;  %v805_v43 = vsel %vm376_vm2, %v770_v36, %v782_v38  ;;  %v808_v44 = vsel %vm380_vm3, %v770_v36, %v782_v38 }
  0xb1   : > { %v804_v45 = vrot.slane %v802_v42, 1  ;;  %v810_v49 = vrot.slane %v808_v44, 3 }
  0xb2   : > { %2508 = vmatpush.bf16.msra.mxu3 %v3729_v56 }
  0xb3   : > { %2679 = vmatpush.bf16.msra.mxu0 %v3736_v28  ;;  %855 = vst [vmem:[#allocation1 + $0x21] ss:$4 sm:$0xff] %v804_v45  ;;  %2272 = vmatpush.bf16.msra.mxu2 %v3717_v41  ;;  %v1962_v41 = vrot.slane %v4331_v32, 2 }
  0xb4   : > { %861 = vst [vmem:[#allocation1 + $0x23] ss:$4 sm:$0xff] %v810_v49 }
  0xb5   : > { %1631 = vmatmul.bf16.vlgmr.msrb.gmra.mxu3 %v1549_v59  ;;  %1881 = vmatmul.bf16.gmra.mxu0 %v1751_v46  ;;  %v1324_v59 = vrot.slane %v4179_v23, 1  ;;  %v807_v46 = vrot.slane %v805_v43, 2  ;;  %v3702_v43 = vld [vmem:[%s4862_s2 + $0x148] sm:$0xff] }
  0xb7   : > { %v1325_v37 = vsel %vm1314_vm6, %v1322_v16, %v1324_v59  ;;  %858 = vst [vmem:[#allocation1 + $0x22] ss:$4 sm:$0xff] %v807_v46  ;;  %2680 = vmatpush.bf16.msra.mxu0 %v3735_v61  ;;  %v1327_v17 = vsel %vm1314_vm6, %v1324_v59, %v1326_v2 }
  0xb9   : > { %1262 = vmatmul.bf16.gmra.mxu1 %v4070_v58  ;;  %v3705_v58 = vld [vmem:[%s4862_s2 + $0x160] sm:$0xff] }
  0xba   : > { %2036 = vmatpush.bf16.msra.mxu1 %v3705_v58 }
  0xbe   : > { %1404 = vmatmul.bf16.gmra.mxu2 %v1319_v47  ;;  %2037 = vmatpush.bf16.msra.mxu1 %v3704_v25  ;;  %v801_v47 = vsel %vm368_vm0, %v770_v36, %v782_v38 }
  0xbf   : > { %852 = vst [vmem:[#allocation1 + $0x20] ss:$4 sm:$0xff] %v801_v47 }
  0xc2   : > { %2038 = vmatpush.bf16.msra.mxu1 %v3703_v55 }
  0xc5   : > { %1636 = vmatmul.bf16.gmra.mxu3 %v1551_v50  ;;  %1886 = vmatmul.bf16.gmra.mxu0 %v1760_v0  ;;  %v1557_v50 = vsel %vm1314_vm6, %v1554_v20, %v1556_v40  ;;  %v1782_v0 = vrot.slane %v1780_v57, 1 }
  0xc6   : > { %v863_v10 = vld [vmem:[#allocation1 + $0x20] sm:$0xff]  ;;  %2039 = vmatpush.bf16.msra.mxu1 %v3702_v43 }
  0xc7   : > { %889 = vst [vmem:[#allocation2 + $0x4c] sm:$0xf] %v863_v10 }
  0xc9   : > { %1267 = vmatmul.bf16.gmra.mxu1 %v4095_v26  ;;  %v3728_v26 = vld [vmem:[%s4862_s2 + $0x1d8] sm:$0xff] }
  0xca   : > { %2509 = vmatpush.bf16.msra.mxu3 %v3728_v26  ;;  %2040 = vmatpush.bf16.msra.mxu1 %v3701_v52 }
  0xce   : > { %1409 = vmatmul.bf16.gmra.mxu2 %v1321_v1  ;;  %2510 = vmatpush.bf16.msra.mxu3 %v3727_v54  ;;  %v1785_v1 = vrot.slane %v1783_v60, 2  ;;  %v4457_v28 = vld [vmem:[#allocation2 + $0x48] sm:$0xff]  ;;  %v1560_v54 = vrot.slane %v4423_v48, 1  ;;  %v3734_v60 = vld [vmem:[%s4862_s2 + $0x208] sm:$0xff] }
  0xcf   : > { %v1789_v30 = vshrl.u32 %v4457_v28, 16  ;;  %v1792_v59 = vshll.u32 %v4457_v28, 16  ;;  %2681 = vmatpush.bf16.msra.mxu0 %v3734_v60  ;;  %v1562_v29 = vrot.slane %v4457_v28, 1 }
  0xd0   : > { %v1786_v58 = vor.u32 %v1785_v1, %v1782_v0 }
  0xd1   : > { %v1794_v36 = vrot.slane %v1792_v59, 2 }
  0xd2   : > { %v1787_v9 = vsel %vm1716_vm5, %v1777_v63, %v1786_v58 }
  0xd5   : > { %1641 = vmatmul.bf16.gmra.mxu3 %v1553_v3  ;;  %1891 = vmatmul.bf16.gmra.mxu0 %v1769_v18  ;;  %v772_v3 = vld [vmem:[%s4210_s14 + $0xc] sm:$0xf]  ;;  %v813_v18 = vsel %vm368_vm0, %v771_v8, %v783_v14 }
  0xd6   : > { %v4385_v11 = vpop.f32.mrf.mxu1  ;;  %v784_v6 = vrot.slane %v772_v3, 3  ;;  %864 = vst [vmem:[#allocation1] ss:$4 sm:$0xff] %v813_v18 }
  0xd8   : > { %v817_v15 = vsel %vm372_vm1, %v772_v3, %v784_v6  ;;  %v820_v16 = vsel %vm376_vm2, %v772_v3, %v784_v6  ;;  %v823_v61 = vsel %vm380_vm3, %v772_v3, %v784_v6 }
  0xd9   : > { %1272 = vmatmul.bf16.gmra.mxu1 %v4179_v23  ;;  %v822_v20 = vrot.slane %v820_v16, 2 }
  0xdb   : > { %869 = vst [vmem:[#allocation1 + $0x3] ss:$4 sm:$0xff] %v822_v20 }
  0xde   : > { %1414 = vmatmul.bf16.gmra.mxu2 %v1323_v19  ;;  %v4392_v21 = vpop.f32.mrf.mxu1  ;;  %v816_v19 = vsel %vm368_vm0, %v772_v3, %v784_v6 }
  0xdf   : > { %865 = vst [vmem:[#allocation1 + $0x1] ss:$4 sm:$0xff] %v816_v19  ;;  %v3725_v19 = vld [vmem:[%s4862_s2 + $0x1c0] sm:$0xff] }
  0xe0   : > { %v1137_v56 = vpop.f32.mrf.mxu0 }
  0xe5   : > { %1646 = vmatmul.bf16.gmra.mxu3 %v1555_v22  ;;  %1896 = vmatmul.bf16.gmra.mxu0 %v1778_v33  ;;  %v1558_v22 = vrot.slane %v4395_v24, 1  ;;  %v1791_v33 = vrot.slane %v1789_v30, 1 }
  0xe6   : > { %v4408_v53 = vpop.f32.mrf.mxu1 }
  0xe7   : > { %v1559_v27 = vsel %vm1314_vm6, %v1556_v40, %v1558_v22  ;;  %v3726_v40 = vld [vmem:[%s4862_s2 + $0x1c8] sm:$0xff]  ;;  %v1795_v45 = vor.u32 %v1794_v36, %v1791_v33  ;;  %v1561_v8 = vsel %vm1314_vm6, %v1558_v22, %v1560_v54  ;;  %v1563_v33 = vsel %vm1314_vm6, %v1560_v54, %v1562_v29 }
  0xe8   : > { %v1139_v26 = vpop.f32.mrf.mxu0  ;;  %2511 = vmatpush.bf16.msra.mxu3 %v3726_v40  ;;  %v2106_v40 = vld [vmem:[#allocation2 + $0x14] sm:$0xf] }
  0xe9   : > { %1277 = vmatmul.bf16.gmra.mxu1 %v4204_v39  ;;  %v819_v39 = vrot.slane %v817_v15, 1  ;;  %v1796_v47 = vsel %vm1716_vm5, %v1786_v58, %v1795_v45 }
  0xeb   : > { %867 = vst [vmem:[#allocation1 + $0x2] ss:$4 sm:$0xff] %v819_v39  ;;  %v1330_v39 = vrot.slane %v4271_v35, 1 }
  0xec   : > { %2512 = vmatpush.bf16.msra.mxu3 %v3725_v19 }
  0xee   : > { %1419 = vmatmul.bf16.gmra.mxu2 %v1325_v37  ;;  %v4419_v23 = vpop.f32.mrf.mxu1  ;;  %v1328_v37 = vrot.slane %v4230_v7, 1 }
  0xf0   : > { %v1142_v42 = vpop.f32.mrf.mxu0 }
  0xf2   : > { %v877_v44 = vld [vmem:[#allocation1] sm:$0xff] }
  0xf3   : > { %890 = vst [vmem:[#allocation2 + $0x50] sm:$0xf] %v877_v44  ;;  %v2577_v44 = vld [vmem:[#allocation2 + $0x10] sm:$0x8] }
  0xf5   : > { %1651 = vmatmul.bf16.gmra.mxu3 %v1557_v50  ;;  %1901 = vmatmul.bf16.gmra.mxu0 %v1787_v9  ;;  %v1329_v50 = vsel %vm1314_vm6, %v1326_v2, %v1328_v37  ;;  %v825_v2 = vrot.slane %v823_v61, 3 }
  0xf6   : > { %v4439_v62 = vpop.f32.mrf.mxu1 }
  0xf7   : > { %871 = vst [vmem:[#allocation1 + $0x20] ss:$4 sm:$0xff] %v825_v2 }
  0xf8   : > { %v1144_v1 = vpop.f32.mrf.mxu0 }
  0xf9   : > { %1282 = vmatmul.bf16.gmra.mxu1 %v4230_v7  ;;  %v1935_v7 = vld [vmem:[#allocation2 + $0x8] sm:$0xc] }
  0xfa   : > { %v1954_v49 = vunpack.c.l.b16 %v1935_v7  ;;  %v1695_v0 = vld [vmem:[#allocation2 + $0x50] sm:$0x3]  ;;  %v2596_v7 = vunpack.c.l.b16 %v2577_v44 }
  0xfb   : > { %v1714_v58 = vunpack.c.l.b16 %v1695_v0 }
  0xfe   : > { %1424 = vmatmul.bf16.gmra.mxu2 %v1327_v17  ;;  %v4452_v25 = vpop.f32.mrf.mxu1 }
 0x101   : > { %v4455_v13 = vpop.f32.mrf.mxu2 }
 0x105   : > { %1656 = vmatmul.bf16.gmra.mxu3 %v1559_v27  ;;  %1906 = vmatmul.bf16.gmra.mxu0 %v1796_v47  ;;  %v1331_v27 = vsel %vm1314_vm6, %v1328_v37, %v1330_v39  ;;  %v1960_v37 = vrot.slane %v4307_v12, 2 }
 0x106   : > { %v1248_v63 = vpop.f32.mrf.mxu1 }
 0x107   : > { %v4465_v38 = vadd.f32 %v1248_v63, %v1137_v56  ;;  %v1955_v56 = vpack.c.b16 %v1519_v34, %v1954_v49  ;;  %v4494_v34 = vpack.c.b16 %v1714_v58, %v1714_v58  ;;  %v3733_v63 = vld [vmem:[%s4862_s2 + $0x200] sm:$0xff]  ;;  %v1961_v52 = vsel %vm1956_vm7, %v1958_v31, %v1960_v37 }
 0x108   : > { %2682 = vmatpush.bf16.msra.mxu0 %v3733_v63  ;;  %v4526_v49 = vld [vmem:[#allocation2 + $0x18] sm:$0xff] }
 0x109   : > { %v4473_v46 = vpop.f32.mrf.mxu2  ;;  %1287 = vmatmul.bf16.gmra.mxu1 %v4271_v35  ;;  %v1957_v10 = vrot.slane %v1955_v56, 2  ;;  %v1798_v14 = vshrl.u32 %v4494_v34, 16  ;;  %v1801_v3 = vshll.u32 %v4494_v34, 16  ;;  %v1332_v56 = vrot.slane %v4301_v4, 1 }
 0x10a   : > { %v2600_v60 = vrot.slane %v4526_v49, 3 }
 0x10b   : > { %v1959_v15 = vsel %vm1956_vm7, %v1957_v10, %v1958_v31  ;;  %v1800_v16 = vrot.slane %v1798_v14, 1  ;;  %v1803_v17 = vrot.slane %v1801_v3, 2 }
 0x10d   : > { %v1804_v20 = vor.u32 %v1803_v17, %v1800_v16 }
 0x10e   : > { %1429 = vmatmul.bf16.gmra.mxu2 %v1329_v50  ;;  %v1250_v55 = vpop.f32.mrf.mxu1 }
 0x10f   : > { %v4484_v57 = vadd.f32 %v1250_v55, %v1139_v26  ;;  %v1805_v35 = vsel %vm1716_vm5, %v1795_v45, %v1804_v20  ;;  %v2161_v45 = vunpack.c.l.b16 %v2106_v40  ;;  %v2368_v20 = vshrl.u32 %v4526_v49, 16 }
 0x111   : > { %v4491_v9 = vpop.f32.mrf.mxu2  ;;  %v2597_v54 = vpack.c.b16 %v2161_v45, %v2596_v7 }
 0x112   : > { %v4510_v26 = vpop.f32.mrf.mxu0 }
 0x113   : > { %v2599_v12 = vrot.slane %v2597_v54, 3 }
 0x115   : > { %1661 = vmatmul.bf16.gmra.mxu3 %v1561_v8  ;;  %1911 = vmatmul.bf16.gmra.mxu0 %v1805_v35  ;;  %v2601_v58 = vsel %vm2598_vm8, %v2599_v12, %v2600_v60  ;;  %v1333_v8 = vsel %vm1314_vm6, %v1330_v39, %v1332_v56  ;;  %v2371_v35 = vshll.u32 %v4526_v49, 16 }
 0x116   : > { %v1253_v6 = vpop.f32.mrf.mxu1 }
 0x117   : > { %v4500_v18 = vadd.f32 %v1253_v6, %v1142_v42  ;;  %v1481_v42 = vld [vmem:[#allocation2 + $0x50] sm:$0x1]  ;;  %v2373_v7 = vrot.slane %v2371_v35, 3 }
 0x118   : > { %v1536_v47 = vunpack.c.l.b16 %v1481_v42 }
 0x119   : > { %v4508_v22 = vpop.f32.mrf.mxu2  ;;  %2041 = vmatmul.bf16.vlgmr.msra.gmra.mxu1 %v1959_v15 }
 0x11a   : > { %v4523_v43 = vpop.f32.mrf.mxu0  ;;  %v1546_v61 = vpack.c.b16 %v1536_v47, %v1536_v47 }
 0x11c   : > { %v1564_v10 = vrot.slane %v1546_v61, 1 }
 0x11e   : > { %1434 = vmatmul.bf16.gmra.mxu2 %v1331_v27  ;;  %v1255_v30 = vpop.f32.mrf.mxu1  ;;  %v1565_v3 = vsel %vm1314_vm6, %v1562_v29, %v1564_v10  ;;  %v4552_v27 = vld [vmem:[#allocation2 + $0x20] sm:$0xff]  ;;  %v1963_v29 = vsel %vm1956_vm7, %v1960_v37, %v1962_v41 }
 0x11f   : > { %v4515_v59 = vadd.f32 %v1255_v30, %v1144_v1  ;;  %v2105_v1 = vld [vmem:[#allocation2 + $0x10] sm:$0xc]  ;;  %v2602_v40 = vrot.slane %v4552_v27, 3 }
 0x120   : > { %v2160_v31 = vunpack.c.l.b16 %v2105_v1 }
 0x121   : > { %v4521_v36 = vpop.f32.mrf.mxu2  ;;  %v2603_v56 = vsel %vm2598_vm8, %v2600_v60, %v2602_v40 }
 0x122   : > { %v4537_v2 = vpop.f32.mrf.mxu0  ;;  %v2179_v15 = vpack.c.b16 %v2161_v45, %v2160_v31  ;;  %v2370_v45 = vrot.slane %v2368_v20, 2 }
 0x124   : > { %v2360_v39 = vshrl.u32 %v2179_v15, 16  ;;  %v2363_v19 = vshll.u32 %v2179_v15, 16  ;;  %v2374_v61 = vor.u32 %v2373_v7, %v2370_v45 }
 0x125   : > { %1666 = vmatmul.bf16.gmra.mxu3 %v1563_v33  ;;  %2683 = vmatmul.bf16.vlgmr.msra.gmra.mxu0 %v2601_v58  ;;  %v2189_v33 = vrot.slane %v2179_v15, 2  ;;  %v2380_v15 = vshll.u32 %v4552_v27, 16 }
 0x126   : > { %v4528_v50 = vpop.f32.mrf.mxu1  ;;  %v2362_v42 = vrot.slane %v2360_v39, 2  ;;  %v2365_v44 = vrot.slane %v2363_v19, 3 }
 0x128   : > { %v4531_v55 = vpop.f32.mrf.mxu3  ;;  %v2366_v12 = vor.u32 %v2365_v44, %v2362_v42 }
 0x129   : > { %v4535_v0 = vpop.f32.mrf.mxu2  ;;  %2046 = vmatmul.bf16.gmra.mxu1 %v1961_v52 }
 0x12a   : > { %v4547_v17 = vpop.f32.mrf.mxu0 }
 0x12e   : > { %1439 = vmatmul.bf16.gmra.mxu2 %v1333_v8  ;;  %v4541_v4 = vpop.f32.mrf.mxu1 }
 0x130   : > { %v4543_v14 = vpop.f32.mrf.mxu3 }
 0x131   : > { %v1400_v6 = vpop.f32.mrf.mxu2 }
 0x132   : > { %v1445_v16 = vadd.f32 %v1400_v6, %v4465_v38  ;;  %v2190_v38 = vrot.slane %v4526_v49, 2  ;;  %v4560_v54 = vpop.f32.mrf.mxu0  ;;  %v2377_v6 = vshrl.u32 %v4552_v27, 16 }
 0x134   : > { %v2191_v49 = vsel %vm1956_vm7, %v2189_v33, %v2190_v38 }
 0x135   : > { %1671 = vmatmul.bf16.gmra.mxu3 %v1565_v3  ;;  %2688 = vmatmul.bf16.gmra.mxu0 %v2603_v56 }
 0x136   : > { %v4554_v30 = vpop.f32.mrf.mxu1 }
 0x138   : > { %v1632_v63 = vpop.f32.mrf.mxu3 }
 0x139   : > { %v1677_v32 = vadd.f32 %v1632_v63, %v1445_v16  ;;  %v1402_v47 = vpop.f32.mrf.mxu2  ;;  %2051 = vmatmul.bf16.gmra.mxu1 %v1963_v29  ;;  %v4579_v16 = vld [vmem:[#allocation2 + $0x28] sm:$0xff]  ;;  %v2379_v29 = vrot.slane %v2377_v6, 2 }
 0x13a   : > { %v1446_v52 = vadd.f32 %v1402_v47, %v4484_v57  ;;  %v2375_v57 = vsel %vm2358_vm9, %v2366_v12, %v2374_v61  ;;  %v4571_v60 = vpop.f32.mrf.mxu0  ;;  %v2604_v35 = vrot.slane %v4579_v16, 3  ;;  %v1259_v47 = vadd.f32 %v4528_v50, %v4385_v11 }
 0x13b   : > { %v4564_v37 = vadd.f32 %v4510_v26, %v1677_v32  ;;  %v1964_v26 = vrot.slane %v4353_v51, 2  ;;  %v2386_v12 = vshrl.u32 %v4579_v16, 16 }
 0x13c   : > { %v2605_v42 = vsel %vm2598_vm8, %v2602_v40, %v2604_v35 }
 0x13d   : > { %v1965_v19 = vsel %vm1956_vm7, %v1962_v41, %v1964_v26 }
 0x13e   : > { %2273 = vmatmul.bf16.vlgmr.msra.gmra.mxu2 %v2191_v49  ;;  %v4567_v1 = vpop.f32.mrf.mxu1 }
 0x140   : > { %v1634_v58 = vpop.f32.mrf.mxu3 }
 0x141   : > { %v1678_v8 = vadd.f32 %v1634_v58, %v1446_v52  ;;  %v1405_v10 = vpop.f32.mrf.mxu2  ;;  %v2389_v58 = vshll.u32 %v4579_v16, 16 }
 0x142   : > { %v1447_v31 = vadd.f32 %v1405_v10, %v4500_v18  ;;  %v2192_v18 = vrot.slane %v4552_v27, 2  ;;  %v4587_v32 = vpop.f32.mrf.mxu0 }
 0x143   : > { %v4575_v3 = vadd.f32 %v4523_v43, %v1678_v8  ;;  %v2382_v43 = vrot.slane %v2380_v15, 3  ;;  %v4607_v8 = vld [vmem:[#allocation2 + $0x30] sm:$0xff]  ;;  %v2391_v6 = vrot.slane %v2389_v58, 3 }
 0x144   : > { %v2193_v41 = vsel %vm1956_vm7, %v2190_v38, %v2192_v18  ;;  %v2606_v10 = vrot.slane %v4607_v8, 3 }
 0x145   : > { %2513 = vmatmul.bf16.vlgmr.msra.gmra.mxu3 %v2375_v57  ;;  %v2383_v45 = vor.u32 %v2382_v43, %v2379_v29  ;;  %2693 = vmatmul.bf16.gmra.mxu0 %v2605_v42  ;;  %v2194_v57 = vrot.slane %v4579_v16, 2 }
 0x146   : > { %v4581_v39 = vpop.f32.mrf.mxu1 }
 0x147   : > { %v2195_v16 = vsel %vm1956_vm7, %v2192_v18, %v2194_v57 }
 0x148   : > { %v1637_v20 = vpop.f32.mrf.mxu3 }
 0x149   : > { %v1679_v51 = vadd.f32 %v1637_v20, %v1447_v31  ;;  %v1407_v63 = vpop.f32.mrf.mxu2  ;;  %2056 = vmatmul.bf16.gmra.mxu1 %v1965_v19  ;;  %v2388_v31 = vrot.slane %v2386_v12, 2 }
 0x14a   : > { %v1448_v33 = vadd.f32 %v1407_v63, %v4515_v59  ;;  %v2384_v59 = vsel %vm2358_vm9, %v2374_v61, %v2383_v45  ;;  %v4599_v40 = vpop.f32.mrf.mxu0 }
 0x14b   : > { %v4591_v44 = vadd.f32 %v4537_v2, %v1679_v51  ;;  %v1966_v2 = vrot.slane %v4372_v5, 2  ;;  %v1261_v5 = vadd.f32 %v4541_v4, %v4392_v21  ;;  %v2607_v51 = vsel %vm2598_vm8, %v2604_v35, %v2606_v10 }
 0x14c   : > { %v2392_v29 = vor.u32 %v2391_v6, %v2388_v31  ;;  %v1264_v4 = vadd.f32 %v4554_v30, %v4408_v53 }
 0x14d   : > { %v1967_v50 = vsel %vm1956_vm7, %v1964_v26, %v1966_v2 }
 0x14e   : > { %2278 = vmatmul.bf16.gmra.mxu2 %v2193_v41  ;;  %v4594_v27 = vpop.f32.mrf.mxu1 }
 0x150   : > { %v1639_v7 = vpop.f32.mrf.mxu3 }
 0x151   : > { %v1680_v52 = vadd.f32 %v1639_v7, %v1448_v33  ;;  %v1410_v56 = vpop.f32.mrf.mxu2  ;;  %v2393_v33 = vsel %vm2358_vm9, %v2383_v45, %v2392_v29  ;;  %v2395_v7 = vshrl.u32 %v4607_v8, 16 }
 0x152   : > { %v1449_v49 = vadd.f32 %v1410_v56, %v1259_v47  ;;  %v4616_v20 = vpop.f32.mrf.mxu0  ;;  %v2398_v47 = vshll.u32 %v4607_v8, 16 }
 0x153   : > { %v4603_v38 = vadd.f32 %v4547_v17, %v1680_v52  ;;  %v4636_v52 = vld [vmem:[#allocation2 + $0x38] sm:$0xff] }
 0x154   : > { %v2608_v56 = vrot.slane %v4636_v52, 3  ;;  %v2400_v12 = vrot.slane %v2398_v47, 3 }
 0x155   : > { %2518 = vmatmul.bf16.gmra.mxu3 %v2384_v59  ;;  %2698 = vmatmul.bf16.gmra.mxu0 %v2607_v51  ;;  %v2196_v59 = vrot.slane %v4607_v8, 2 }
 0x156   : > { %v4609_v11 = vpop.f32.mrf.mxu1 }
 0x157   : > { %v2197_v8 = vsel %vm1956_vm7, %v2194_v57, %v2196_v59 }
 0x158   : > { %v1642_v61 = vpop.f32.mrf.mxu3 }
 0x159   : > { %v1681_v17 = vadd.f32 %v1642_v61, %v1449_v49  ;;  %v1412_v15 = vpop.f32.mrf.mxu2  ;;  %2061 = vmatmul.bf16.gmra.mxu1 %v1967_v50  ;;  %v2397_v49 = vrot.slane %v2395_v7, 2 }
 0x15a   : > { %v1450_v19 = vadd.f32 %v1412_v15, %v1261_v5  ;;  %v4628_v35 = vpop.f32.mrf.mxu0  ;;  %v2609_v5 = vsel %vm2598_vm8, %v2606_v10, %v2608_v56 }
 0x15b   : > { %v4620_v26 = vadd.f32 %v4560_v54, %v1681_v17  ;;  %v1968_v54 = vrot.slane %v4395_v24, 2  ;;  %v1266_v24 = vadd.f32 %v4567_v1, %v4419_v23  ;;  %v2401_v17 = vor.u32 %v2400_v12, %v2397_v49 }
 0x15c   : > { %v1269_v1 = vadd.f32 %v4581_v39, %v4439_v62 }
 0x15d   : > { %v1969_v30 = vsel %vm1956_vm7, %v1966_v2, %v1968_v54  ;;  %v2402_v15 = vsel %vm2358_vm9, %v2392_v29, %v2401_v17  ;;  %v773_v29 = vld [vmem:[%s4210_s14 + $0x10] sm:$0xf] }
 0x15e   : > { %2283 = vmatmul.bf16.gmra.mxu2 %v2195_v16  ;;  %v4623_v43 = vpop.f32.mrf.mxu1  ;;  %v2404_v16 = vshrl.u32 %v4636_v52, 16 }
 0x160   : > { %v1644_v21 = vpop.f32.mrf.mxu3  ;;  %v2406_v7 = vrot.slane %v2404_v16, 2 }
 0x161   : > { %v1682_v63 = vadd.f32 %v1644_v21, %v1450_v19  ;;  %v1415_v42 = vpop.f32.mrf.mxu2  ;;  %v2407_v21 = vshll.u32 %v4636_v52, 16 }
 0x162   : > { %v1451_v41 = vadd.f32 %v1415_v42, %v1264_v4  ;;  %v4645_v61 = vpop.f32.mrf.mxu0  ;;  %v4665_v4 = vld [vmem:[#allocation2 + $0x40] sm:$0xff]  ;;  %v785_v42 = vrot.slane %v773_v29, 3 }
 0x163   : > { %v4632_v18 = vadd.f32 %v4571_v60, %v1682_v63  ;;  %v2409_v47 = vrot.slane %v2407_v21, 3  ;;  %v2413_v16 = vshrl.u32 %v4665_v4, 16  ;;  %v2416_v21 = vshll.u32 %v4665_v4, 16 }
 0x165   : > { %2523 = vmatmul.bf16.gmra.mxu3 %v2393_v33  ;;  %2703 = vmatmul.bf16.gmra.mxu0 %v2609_v5  ;;  %v2198_v33 = vrot.slane %v4636_v52, 2 }
 0x166   : > { %v4638_v53 = vpop.f32.mrf.mxu1 }
 0x168   : > { %v1647_v45 = vpop.f32.mrf.mxu3 }
 0x169   : > { %v1683_v60 = vadd.f32 %v1647_v45, %v1451_v41  ;;  %v1417_v58 = vpop.f32.mrf.mxu2  ;;  %2066 = vmatmul.bf16.gmra.mxu1 %v1969_v30 }
 0x16a   : > { %v1452_v50 = vadd.f32 %v1417_v58, %v1266_v24  ;;  %v4657_v51 = vpop.f32.mrf.mxu0  ;;  %v829_v24 = vsel %vm372_vm1, %v773_v29, %v785_v42 }
 0x16b   : > { %v4649_v2 = vadd.f32 %v4587_v32, %v1683_v60  ;;  %v1970_v32 = vrot.slane %v4423_v48, 2  ;;  %v2610_v48 = vrot.slane %v4665_v4, 3  ;;  %v831_v12 = vrot.slane %v829_v24, 1 }
 0x16d   : > { %v1971_v39 = vsel %vm1956_vm7, %v1968_v54, %v1970_v32  ;;  %v2611_v45 = vsel %vm2598_vm8, %v2608_v56, %v2610_v48  ;;  %v832_v54 = vsel %vm376_vm2, %v773_v29, %v785_v42  ;;  %v2410_v56 = vor.u32 %v2409_v47, %v2406_v7  ;;  %874 = vst [vmem:[#allocation1 + $0x22] ss:$4 sm:$0xff] %v831_v12 }
 0x16e   : > { %2288 = vmatmul.bf16.gmra.mxu2 %v2197_v8  ;;  %v4652_v31 = vpop.f32.mrf.mxu1  ;;  %v834_v58 = vrot.slane %v832_v54, 2  ;;  %v1276_v47 = vadd.f32 %v4623_v43, %v4473_v46  ;;  %v2415_v54 = vrot.slane %v2413_v16, 2 }
 0x170   : > { %v1649_v23 = vpop.f32.mrf.mxu3  ;;  %876 = vst [vmem:[#allocation1 + $0x23] ss:$4 sm:$0xff] %v834_v58 }
 0x171   : > { %v1684_v6 = vadd.f32 %v1649_v23, %v1452_v50  ;;  %v1420_v19 = vpop.f32.mrf.mxu2 }
 0x172   : > { %v1453_v10 = vadd.f32 %v1420_v19, %v1269_v1  ;;  %v4678_v49 = vpop.f32.mrf.mxu0  ;;  %v2411_v1 = vsel %vm2358_vm9, %v2401_v17, %v2410_v56  ;;  %v1972_v19 = vrot.slane %v4457_v28, 2  ;;  %v2200_v28 = vrot.slane %v4665_v4, 2 }
 0x173   : > { %v4661_v57 = vadd.f32 %v4599_v40, %v1684_v6  ;;  %v1271_v40 = vadd.f32 %v4594_v27, %v4452_v25  ;;  %v2199_v25 = vsel %vm1956_vm7, %v2196_v59, %v2198_v33  ;;  %v828_v27 = vsel %vm368_vm0, %v773_v29, %v785_v42 }
 0x174   : > { %872 = vst [vmem:[#allocation1 + $0x21] ss:$4 sm:$0xff] %v828_v27  ;;  %v1973_v17 = vsel %vm1956_vm7, %v1970_v32, %v1972_v19  ;;  %v2418_v32 = vrot.slane %v2416_v21, 3  ;;  %v2201_v46 = vsel %vm1956_vm7, %v2198_v33, %v2200_v28  ;;  %v1974_v33 = vrot.slane %v4494_v34, 2 }
 0x175   : > { %2528 = vmatmul.bf16.gmra.mxu3 %v2402_v15  ;;  %2708 = vmatmul.bf16.gmra.mxu0 %v2611_v45  ;;  %v1281_v34 = vadd.f32 %v4652_v31, %v4508_v22 }
 0x176   : > { %v4667_v62 = vpop.f32.mrf.mxu1  ;;  %v2419_v43 = vor.u32 %v2418_v32, %v2415_v54 }
 0x178   : > { %v1652_v63 = vpop.f32.mrf.mxu3 }
 0x179   : > { %v1685_v41 = vadd.f32 %v1652_v63, %v1453_v10  ;;  %v1422_v30 = vpop.f32.mrf.mxu2  ;;  %2071 = vmatmul.bf16.gmra.mxu1 %v1971_v39  ;;  %v4700_v39 = vld [vmem:[#allocation2 + $0x48] sm:$0xff]  ;;  %v835_v63 = vsel %vm380_vm3, %v773_v29, %v785_v42 }
 0x17a   : > { %v1454_v60 = vadd.f32 %v1422_v30, %v1271_v40  ;;  %v4692_v15 = vpop.f32.mrf.mxu0  ;;  %v837_v7 = vrot.slane %v835_v63, 3  ;;  %v2202_v21 = vrot.slane %v4700_v39, 2 }
 0x17b   : > { %v4681_v50 = vadd.f32 %v4616_v20, %v1685_v41  ;;  %v1274_v20 = vadd.f32 %v4609_v11, %v4455_v13  ;;  %v878_v13 = vld [vmem:[#allocation1 + $0x20] sm:$0xff]  ;;  %v774_v11 = vld [vmem:[%s4210_s14 + $0x14] sm:$0x1] }
 0x17c   : > { %891 = vst [vmem:[#allocation2 + $0x54] sm:$0xf] %v878_v13  ;;  %v786_v40 = vrot.slane %v774_v11, 3 }
 0x17d   : > { %880 = vst [vmem:[#allocation1] ss:$4 sm:$0xff] %v837_v7 }
 0x17e   : > { %2293 = vmatmul.bf16.gmra.mxu2 %v2199_v25  ;;  %v4687_v5 = vpop.f32.mrf.mxu1  ;;  %v840_v24 = vsel %vm368_vm0, %v774_v11, %v786_v40  ;;  %v1279_v25 = vadd.f32 %v4638_v53, %v4491_v9  ;;  %v2422_v9 = vshrl.u32 %v4700_v39, 16  ;;  %v2425_v53 = vshll.u32 %v4700_v39, 16 }
 0x17f   : > { %881 = vst [vmem:[#allocation1 + $0x1] ss:$4 sm:$0xff] %v840_v24  ;;  %v1284_v24 = vadd.f32 %v4667_v62, %v4521_v36 }
 0x180   : > { %v1654_v8 = vpop.f32.mrf.mxu3 }
 0x181   : > { %v1686_v23 = vadd.f32 %v1654_v8, %v1454_v60  ;;  %v1425_v6 = vpop.f32.mrf.mxu2  ;;  %v2420_v8 = vsel %vm2358_vm9, %v2410_v56, %v2419_v43 }
 0x182   : > { %v1455_v59 = vadd.f32 %v1425_v6, %v1274_v20  ;;  %v4712_v42 = vpop.f32.mrf.mxu0 }
 0x183   : > { %v4696_v10 = vadd.f32 %v4628_v35, %v1686_v23  ;;  %v2612_v35 = vrot.slane %v4700_v39, 3  ;;  %v3906_v23 = vmov 0   ;;  %v4734_v56 = vld [vmem:[#allocation2 + $0x50] sm:$0xff]  ;;  %v2203_v39 = vsel %vm1956_vm7, %v2200_v28, %v2202_v21 }
 0x184   : > { %893 = vst [vmem:[#allocation2 + $0x58] sm:$0x4] %v3906_v23  ;;  %v2614_v13 = vrot.slane %v4734_v56, 3  ;;  %v2431_v28 = vshrl.u32 %v4734_v56, 16  ;;  %v2204_v36 = vrot.slane %v4734_v56, 2 }
 0x185   : > { %2533 = vmatmul.bf16.gmra.mxu3 %v2411_v1  ;;  %v2613_v4 = vsel %vm2598_vm8, %v2610_v48, %v2612_v35 }
 0x186   : > { %v4709_v45 = vpop.f32.mrf.mxu1  ;;  %2713 = vmatmul.bf16.gmra.mxu0 %v2613_v4  ;;  %v882_v48 = vld [vmem:[#allocation1] sm:$0xff]  ;;  %v2615_v7 = vsel %vm2598_vm8, %v2612_v35, %v2614_v13 }
 0x187   : > { %892 = vst [vmem:[#allocation2 + $0x58] sm:$0x3] %v882_v48 }
 0x188   : > { %v1657_v41 = vpop.f32.mrf.mxu3 }
 0x189   : > { %v1687_v30 = vadd.f32 %v1657_v41, %v1455_v59  ;;  %v1427_v60 = vpop.f32.mrf.mxu2  ;;  %2076 = vmatmul.bf16.gmra.mxu1 %v1973_v17  ;;  %v1975_v59 = vsel %vm1956_vm7, %v1972_v19, %v1974_v33  ;;  %v2427_v17 = vrot.slane %v2425_v53, 3  ;;  %v2205_v53 = vsel %vm1956_vm7, %v2202_v21, %v2204_v36 }
 0x18a   : > { %v1456_v29 = vadd.f32 %v1427_v60, %v1276_v47  ;;  %v4726_v52 = vpop.f32.mrf.mxu0 }
 0x18b   : > { %v4716_v12 = vadd.f32 %v4645_v61, %v1687_v30 }
 0x18e   : > { %2298 = vmatmul.bf16.gmra.mxu2 %v2201_v46  ;;  %v4724_v1 = vpop.f32.mrf.mxu1  ;;  %v2337_v22 = vld [vmem:[#allocation2 + $0x58] sm:$0x7]  ;;  %v2434_v46 = vshll.u32 %v4734_v56, 16 }
 0x18f   : > { %v2356_v35 = vunpack.c.l.b16 %v2337_v22 }
 0x190   : > { %v1659_v58 = vpop.f32.mrf.mxu3  ;;  %v2436_v48 = vrot.slane %v2434_v46, 3 }
 0x191   : > { %v1688_v27 = vadd.f32 %v1659_v58, %v1456_v29  ;;  %v1430_v20 = vpop.f32.mrf.mxu2  ;;  %v2357_v58 = vpack.c.b16 %v2356_v35, %v2356_v35 }
 0x192   : > { %v1457_v61 = vadd.f32 %v1430_v20, %v1279_v25  ;;  %v4741_v41 = vpop.f32.mrf.mxu0  ;;  %v2433_v20 = vrot.slane %v2431_v28, 2 }
 0x193   : > { %v4730_v6 = vadd.f32 %v4657_v51, %v1688_v27  ;;  %v2424_v51 = vrot.slane %v2422_v9, 2  ;;  %v2616_v62 = vrot.slane %v2357_v58, 3 }
 0x195   : > { %2538 = vmatmul.bf16.gmra.mxu3 %v2420_v8  ;;  %v2428_v30 = vor.u32 %v2427_v17, %v2424_v51  ;;  %v2617_v33 = vsel %vm2598_vm8, %v2614_v13, %v2616_v62 }
 0x196   : > { %v4748_v47 = vpop.f32.mrf.mxu1  ;;  %2718 = vmatmul.bf16.gmra.mxu0 %v2615_v7  ;;  %v2443_v7 = vshll.u32 %v2357_v58, 16 }
 0x197   : > { %v2429_v32 = vsel %vm2358_vm9, %v2419_v43, %v2428_v30  ;;  %v1286_v43 = vadd.f32 %v4687_v5, %v4535_v0  ;;  %v1289_v0 = vadd.f32 %v4709_v45, %v4531_v55 }
 0x198   : > { %v1662_v16 = vpop.f32.mrf.mxu3 }
 0x199   : > { %v1689_v11 = vadd.f32 %v1662_v16, %v1457_v61  ;;  %v1432_v63 = vpop.f32.mrf.mxu2  ;;  %2081 = vmatmul.bf16.gmra.mxu1 %v1975_v59  ;;  %v2123_v59 = vld [vmem:[#allocation2 + $0x58] sm:$0x3]  ;;  %v2437_v16 = vor.u32 %v2436_v48, %v2433_v20 }
 0x19a   : > { %v1458_v40 = vadd.f32 %v1432_v63, %v1281_v34  ;;  %v2178_v34 = vunpack.c.l.b16 %v2123_v59 }
 0x19b   : > { %v4745_v19 = vadd.f32 %v4678_v49, %v1689_v11  ;;  %v1914_v49 = vpop.f32.mrf.mxu0  ;;  %v2438_v51 = vsel %vm2358_vm9, %v2428_v30, %v2437_v16 }
 0x19c   : > { %v2188_v21 = vpack.c.b16 %v2178_v34, %v2178_v34 }
 0x19e   : > { %2303 = vmatmul.bf16.gmra.mxu2 %v2203_v39  ;;  %v2044_v25 = vpop.f32.mrf.mxu1  ;;  %v2206_v22 = vrot.slane %v2188_v21, 2 }
 0x1a0   : > { %v1664_v31 = vpop.f32.mrf.mxu3 }
 0x1a1   : > { %v1690_v54 = vadd.f32 %v1664_v31, %v1458_v40  ;;  %v1435_v60 = vpop.f32.mrf.mxu2  ;;  %v2440_v40 = vshrl.u32 %v2357_v58, 16  ;;  %v1291_v31 = vadd.f32 %v4724_v1, %v4543_v14  ;;  %v2087_v14 = vadd.f32 %v4748_v47, %v4564_v37 }
 0x1a2   : > { %v1459_v29 = vadd.f32 %v1435_v60, %v1284_v24  ;;  %v2445_v24 = vrot.slane %v2443_v7, 3 }
 0x1a3   : > { %v4754_v4 = vadd.f32 %v4692_v15, %v1690_v54  ;;  %v2684_v61 = vpop.f32.mrf.mxu0  ;;  %v2442_v45 = vrot.slane %v2440_v40, 2 }
 0x1a5   : > { %2543 = vmatmul.bf16.gmra.mxu3 %v2429_v32 }
 0x1a6   : > { %2723 = vmatmul.bf16.gmra.mxu0 %v2617_v33  ;;  %v2047_v11 = vpop.f32.mrf.mxu1 }
 0x1a8   : > { %v1667_v27 = vpop.f32.mrf.mxu3 }
 0x1a9   : > { %v1691_v8 = vadd.f32 %v1667_v27, %v1459_v29  ;;  %v1437_v23 = vpop.f32.mrf.mxu2  ;;  %v2446_v29 = vor.u32 %v2445_v24, %v2442_v45 }
 0x1aa   : > { %v1460_v15 = vadd.f32 %v1437_v23, %v1286_v43  ;;  %v2088_v23 = vadd.f32 %v2044_v25, %v4575_v3  ;;  %v2089_v3 = vadd.f32 %v2047_v11, %v4591_v44 }
 0x1ab   : > { %v4763_v9 = vadd.f32 %v4712_v42, %v1691_v8  ;;  %v2686_v63 = vpop.f32.mrf.mxu0  ;;  %v2447_v58 = vsel %vm2358_vm9, %v2437_v16, %v2446_v29 }
 0x1ae   : > { %2308 = vmatmul.bf16.gmra.mxu2 %v2205_v53  ;;  %v2049_v32 = vpop.f32.mrf.mxu1 }
 0x1af   : > { %v2090_v11 = vadd.f32 %v2049_v32, %v4603_v38 }
 0x1b0   : > { %v1669_v56 = vpop.f32.mrf.mxu3 }
 0x1b1   : > { %v1692_v5 = vadd.f32 %v1669_v56, %v1460_v15  ;;  %v1440_v17 = vpop.f32.mrf.mxu2 }
 0x1b2   : > { %v1461_v13 = vadd.f32 %v1440_v17, %v1289_v0 }
 0x1b3   : > { %v4770_v42 = vadd.f32 %v4726_v52, %v1692_v5  ;;  %v2207_v52 = vsel %vm1956_vm7, %v2204_v36, %v2206_v22  ;;  %v2689_v35 = vpop.f32.mrf.mxu0  ;;  %v4786_v36 = vld [vmem:[%s4863_s3] ss:$0 sm:$0xff] }
 0x1b5   : > { %2548 = vmatmul.bf16.gmra.mxu3 %v2438_v51 }
 0x1b6   : > { %v2052_v43 = vpop.f32.mrf.mxu1 }
 0x1b7   : > { %v2091_v38 = vadd.f32 %v2052_v43, %v4620_v26 }
 0x1b8   : > { %v1672_v39 = vpop.f32.mrf.mxu3 }
 0x1b9   : > { %v1693_v55 = vadd.f32 %v1672_v39, %v1461_v13  ;;  %v1442_v54 = vpop.f32.mrf.mxu2 }
 0x1ba   : > { %v1462_v30 = vadd.f32 %v1442_v54, %v1291_v31 }
 0x1bb   : > { %v4775_v60 = vadd.f32 %v4741_v41, %v1693_v55  ;;  %v2691_v41 = vpop.f32.mrf.mxu0 }
 0x1be   : > { %2313 = vmatmul.bf16.gmra.mxu2 %v2207_v52  ;;  %v4790_v33 = vpop.f32.mrf.mxu1 }
 0x1c0   : > { %v1674_v28 = vpop.f32.mrf.mxu3 }
 0x1c1   : > { %v1694_v46 = vadd.f32 %v1674_v28, %v1462_v30  ;;  %v2274_v27 = vpop.f32.mrf.mxu2 }
 0x1c2   : > { %v2319_v62 = vadd.f32 %v2274_v27, %v2087_v14 }
 0x1c3   : > { %v4781_v1 = vadd.f32 %v1914_v49, %v1694_v46  ;;  %v4792_v59 = vpop.f32.mrf.mxu0 }
 0x1c5   : > { %2553 = vmatmul.bf16.gmra.mxu3 %v2447_v58 }
 0x1c6   : > { %v2057_v22 = vpop.f32.mrf.mxu1 }
 0x1c8   : > { %v2514_v8 = vpop.f32.mrf.mxu3 }
 0x1c9   : > { %v2559_v20 = vadd.f32 %v2514_v8, %v2319_v62  ;;  %v2276_v48 = vpop.f32.mrf.mxu2 }
 0x1ca   : > { %v2320_v47 = vadd.f32 %v2276_v48, %v2088_v23 }
 0x1cb   : > { %v2729_v15 = vadd.f32 %v2684_v61, %v2559_v20  ;;  %v2696_v44 = vpop.f32.mrf.mxu0 }
 0x1cd   : > { %v2751_v37 = vadd.f32 %v4786_v36, %v2729_v15 }
 0x1cf   : > { %v2769_v49 = vmax.f32 %v2751_v37, 0.0 }
 0x1d0   : > { %v2516_v53 = vpop.f32.mrf.mxu3 }
 0x1d1   : > { %v2805_v16 = vrot.slane %v2769_v49, 2  ;;  %v2806_v56 = vrot.slane %v2769_v49, 4  ;;  %v2807_v34 = vrot.slane %v2769_v49, 6  ;;  %2853 = vst [vmem:[#allocation1] ss:$4 sm:$0xff] %v2769_v49  ;;  %v2560_v0 = vadd.f32 %v2516_v53, %v2320_v47  ;;  %v2279_v5 = vpop.f32.mrf.mxu2 }
 0x1d2   : > { %v2321_v51 = vadd.f32 %v2279_v5, %v2089_v3  ;;  %v2092_v47 = vadd.f32 %v4790_v33, %v4632_v18  ;;  %v2093_v18 = vadd.f32 %v2057_v22, %v4649_v2 }
 0x1d3   : > { %2855 = vst [vmem:[#allocation1 + $0x1] ss:$4 sm:$0xff] %v2805_v16  ;;  %v2730_v25 = vadd.f32 %v2686_v63, %v2560_v0  ;;  %v2699_v14 = vpop.f32.mrf.mxu0 }
 0x1d4   : > { %2857 = vst [vmem:[#allocation1 + $0x2] ss:$4 sm:$0xff] %v2806_v56 }
 0x1d5   : > { %2859 = vst [vmem:[#allocation1 + $0x3] ss:$4 sm:$0xff] %v2807_v34  ;;  %v2752_v61 = vadd.f32 %v4786_v36, %v2730_v25 }
 0x1d7   : > { %v2770_v17 = vmax.f32 %v2752_v61, 0.0 }
 0x1d8   : > { %v2519_v13 = vpop.f32.mrf.mxu3 }
 0x1d9   : > { %v2808_v21 = vrot.slane %v2770_v17, 2  ;;  %v2809_v40 = vrot.slane %v2770_v17, 4  ;;  %v2810_v7 = vrot.slane %v2770_v17, 6  ;;  %2861 = vst [vmem:[#allocation1 + $0x20] ss:$4 sm:$0xff] %v2770_v17  ;;  %v2561_v39 = vadd.f32 %v2519_v13, %v2321_v51  ;;  %v2281_v31 = vpop.f32.mrf.mxu2 }
 0x1da   : > { %v2322_v45 = vadd.f32 %v2281_v31, %v2090_v11 }
 0x1db   : > { %2863 = vst [vmem:[#allocation1 + $0x21] ss:$4 sm:$0xff] %v2808_v21  ;;  %v2731_v63 = vadd.f32 %v2689_v35, %v2561_v39  ;;  %v2059_v35 = vpop.f32.mrf.mxu1  ;;  %v2701_v34 = vpop.f32.mrf.mxu0 }
 0x1dc   : > { %2865 = vst [vmem:[#allocation1 + $0x22] ss:$4 sm:$0xff] %v2809_v40  ;;  %v2868_v46 = vld.sshfl [vmem:[#allocation1] sm:$0xff pattern:$0x73625140]  ;;  %v2094_v2 = vadd.f32 %v2059_v35, %v4661_v57 }
 0x1dd   : > { %2867 = vst [vmem:[#allocation1 + $0x23] ss:$4 sm:$0xff] %v2810_v7  ;;  %v2753_v55 = vadd.f32 %v4786_v36, %v2731_v63 }
 0x1df   : > { %v2771_v24 = vmax.f32 %v2753_v55, 0.0 }
 0x1e0   : > { %v2521_v54 = vpop.f32.mrf.mxu3 }
 0x1e1   : > { %v2811_v30 = vrot.slane %v2771_v24, 2  ;;  %v2812_v52 = vrot.slane %v2771_v24, 4  ;;  %v2813_v29 = vrot.slane %v2771_v24, 6  ;;  %v2562_v28 = vadd.f32 %v2521_v54, %v2322_v45  ;;  %v2284_v58 = vpop.f32.mrf.mxu2 }
 0x1e2   : > { %v2323_v8 = vadd.f32 %v2284_v58, %v2091_v38 }
 0x1e3   : > { %2870 = vst [vmem:[#allocation1] ss:$4 sm:$0xff] %v2811_v30  ;;  %v2732_v32 = vadd.f32 %v2691_v41, %v2562_v28  ;;  %v2062_v16 = vpop.f32.mrf.mxu1  ;;  %v2704_v31 = vpop.f32.mrf.mxu0 }
 0x1e4   : > { %v2869_v27 = vld.sshfl [vmem:[#allocation1 + $0x20] sm:$0xff pattern:$0x73625140]  ;;  %2871 = vst [vmem:[#allocation1 + $0x1] ss:$4 sm:$0xff] %v2812_v52  ;;  %v2095_v57 = vadd.f32 %v2062_v16, %v4681_v50 }
 0x1e5   : > { %2872 = vst [vmem:[#allocation1 + $0x2] ss:$4 sm:$0xff] %v2813_v29  ;;  %v2754_v62 = vadd.f32 %v4786_v36, %v2732_v32  ;;  %v3748_v20 = vpack.c.bf16 %v2869_v27, %v2868_v46 }
 0x1e7   : > { %v2772_v48 = vmax.f32 %v2754_v62, 0.0  ;;  %3749 = vst [vmem:[%s4805_s26] sm:$0xff] %v3748_v20  }
 0x1e8   : > { %v2524_v26 = vpop.f32.mrf.mxu3 }
 0x1e9   : > { %v2814_v43 = vrot.slane %v2772_v48, 2  ;;  %v2815_v41 = vrot.slane %v2772_v48, 4  ;;  %v2816_v23 = vrot.slane %v2772_v48, 6  ;;  %2873 = vst [vmem:[#allocation1 + $0x3] ss:$4 sm:$0xff] %v2772_v48  ;;  %v2563_v15 = vadd.f32 %v2524_v26, %v2323_v8  ;;  %v2286_v37 = vpop.f32.mrf.mxu2 }
 0x1ea   : > { %v2324_v56 = vadd.f32 %v2286_v37, %v2092_v47 }
 0x1eb   : > { %2874 = vst [vmem:[#allocation1 + $0x20] ss:$4 sm:$0xff] %v2814_v43  ;;  %v2733_v49 = vadd.f32 %v4792_v59, %v2563_v15  ;;  %v2064_v40 = vpop.f32.mrf.mxu1  ;;  %v2706_v62 = vpop.f32.mrf.mxu0 }
 0x1ec   : > { %2875 = vst [vmem:[#allocation1 + $0x21] ss:$4 sm:$0xff] %v2815_v41  ;;  %v2096_v47 = vadd.f32 %v2064_v40, %v4696_v10 }
 0x1ed   : > { %2876 = vst [vmem:[#allocation1 + $0x22] ss:$4 sm:$0xff] %v2816_v23  ;;  %v2755_v53 = vadd.f32 %v4786_v36, %v2733_v49 }
 0x1ef   : > { %v2773_v0 = vmax.f32 %v2755_v53, 0.0 }
 0x1f0   : > { %v2526_v5 = vpop.f32.mrf.mxu3  ;;  %v2878_v51 = vld.sshfl [vmem:[#allocation1] sm:$0xff pattern:$0x73625140] }
 0x1f1   : > { %v2817_v3 = vrot.slane %v2773_v0, 4  ;;  %v2818_v25 = vrot.slane %v2773_v0, 6  ;;  %2877 = vst [vmem:[#allocation1 + $0x23] ss:$4 sm:$0xff] %v2773_v0  ;;  %v2564_v61 = vadd.f32 %v2526_v5, %v2324_v56  ;;  %v2289_v17 = vpop.f32.mrf.mxu2 }
 0x1f2   : > { %v2325_v13 = vadd.f32 %v2289_v17, %v2093_v18 }
 0x1f3   : > { %2880 = vst [vmem:[#allocation1] ss:$4 sm:$0xff] %v2817_v3  ;;  %v2734_v33 = vadd.f32 %v2696_v44, %v2564_v61  ;;  %v2067_v58 = vpop.f32.mrf.mxu1  ;;  %v2709_v16 = vpop.f32.mrf.mxu0 }
 0x1f4   : > { %2881 = vst [vmem:[#allocation1 + $0x1] ss:$4 sm:$0xff] %v2818_v25  ;;  %v2097_v10 = vadd.f32 %v2067_v58, %v4716_v12 }
 0x1f5   : > { %v2756_v59 = vadd.f32 %v4786_v36, %v2734_v33 }
 0x1f7   : > { %v2774_v21 = vmax.f32 %v2756_v59, 0.0 }
 0x1f8   : > { %v2879_v7 = vld.sshfl [vmem:[#allocation1 + $0x20] sm:$0xff pattern:$0x73625140]  ;;  %v2529_v39 = vpop.f32.mrf.mxu3 }
 0x1f9   : > { %v2819_v11 = vrot.slane %v2774_v21, 2  ;;  %v2820_v63 = vrot.slane %v2774_v21, 4  ;;  %v2821_v55 = vrot.slane %v2774_v21, 6  ;;  %2882 = vst [vmem:[#allocation1 + $0x2] ss:$4 sm:$0xff] %v2774_v21  ;;  %v2565_v45 = vadd.f32 %v2529_v39, %v2325_v13  ;;  %v2291_v24 = vpop.f32.mrf.mxu2 }
 0x1fa   : > { %v3753_v54 = vpack.c.bf16 %v2879_v7, %v2878_v51  ;;  %v2326_v30 = vadd.f32 %v2291_v24, %v2094_v2 }
 0x1fb   : > { %2883 = vst [vmem:[#allocation1 + $0x3] ss:$4 sm:$0xff] %v2819_v11  ;;  %v2735_v22 = vadd.f32 %v2699_v14, %v2565_v45  ;;  %v2069_v50 = vpop.f32.mrf.mxu1  ;;  %v2711_v13 = vpop.f32.mrf.mxu0 }
 0x1fc   : > { %2884 = vst [vmem:[#allocation1 + $0x20] ss:$4 sm:$0xff] %v2820_v63  ;;  %v2098_v12 = vadd.f32 %v2069_v50, %v4730_v6 }
 0x1fd   : > { %2885 = vst [vmem:[#allocation1 + $0x21] ss:$4 sm:$0xff] %v2821_v55  ;;  %v2757_v44 = vadd.f32 %v4786_v36, %v2735_v22 }
 0x1fe   : > { %3790 = vst [vmem:[%s4805_s26 + $0x8] sm:$0xff] %v3753_v54  }
 0x1ff   : > { %v2775_v52 = vmax.f32 %v2757_v44, 0.0 }
 0x200   : > { %v2531_v29 = vpop.f32.mrf.mxu3 }
 0x201   : > { %v2822_v28 = vrot.slane %v2775_v52, 2  ;;  %v2823_v46 = vrot.slane %v2775_v52, 6  ;;  %2886 = vst [vmem:[#allocation1 + $0x22] ss:$4 sm:$0xff] %v2775_v52  ;;  %v2566_v38 = vadd.f32 %v2531_v29, %v2326_v30  ;;  %v2294_v27 = vpop.f32.mrf.mxu2 }
 0x202   : > { %v2888_v32 = vld.sshfl [vmem:[#allocation1] sm:$0xff pattern:$0x73625140]  ;;  %v2327_v8 = vadd.f32 %v2294_v27, %v2095_v57 }
 0x203   : > { %2887 = vst [vmem:[#allocation1 + $0x23] ss:$4 sm:$0xff] %v2822_v28  ;;  %v2736_v35 = vadd.f32 %v2701_v34, %v2566_v38  ;;  %v2072_v18 = vpop.f32.mrf.mxu1  ;;  %v2714_v29 = vpop.f32.mrf.mxu0 }
 0x204   : > { %2890 = vst [vmem:[#allocation1] ss:$4 sm:$0xff] %v2823_v46 }
 0x205   : > { %v2758_v14 = vadd.f32 %v4786_v36, %v2736_v35 }
 0x207   : > { %v2776_v20 = vmax.f32 %v2758_v14, 0.0 }
 0x208   : > { %v2534_v48 = vpop.f32.mrf.mxu3 }
 0x209   : > { %v2824_v26 = vrot.slane %v2776_v20, 2  ;;  %v2825_v43 = vrot.slane %v2776_v20, 4  ;;  %v2826_v41 = vrot.slane %v2776_v20, 6  ;;  %2891 = vst [vmem:[#allocation1 + $0x1] ss:$4 sm:$0xff] %v2776_v20  ;;  %v2567_v23 = vadd.f32 %v2534_v48, %v2327_v8  ;;  %v2296_v37 = vpop.f32.mrf.mxu2 }
 0x20a   : > { %v2889_v15 = vld.sshfl [vmem:[#allocation1 + $0x20] sm:$0xff pattern:$0x73625140]  ;;  %v2328_v34 = vadd.f32 %v2296_v37, %v2096_v47 }
 0x20b   : > { %2892 = vst [vmem:[#allocation1 + $0x2] ss:$4 sm:$0xff] %v2824_v26  ;;  %v2737_v49 = vadd.f32 %v2704_v31, %v2567_v23  ;;  %v3758_v53 = vpack.c.bf16 %v2889_v15, %v2888_v32  ;;  %v2074_v44 = vpop.f32.mrf.mxu1  ;;  %v2099_v32 = vadd.f32 %v2072_v18, %v4745_v19  ;;  %v2716_v23 = vpop.f32.mrf.mxu0 }
 0x20c   : > { %2893 = vst [vmem:[#allocation1 + $0x3] ss:$4 sm:$0xff] %v2825_v43  ;;  %v2100_v19 = vadd.f32 %v2074_v44, %v4754_v4 }
 0x20d   : > { %2894 = vst [vmem:[#allocation1 + $0x20] ss:$4 sm:$0xff] %v2826_v41  ;;  %v2759_v56 = vadd.f32 %v4786_v36, %v2737_v49 }
 0x20e   : > { %3791 = vst [vmem:[%s4805_s26 + $0x10] sm:$0xff] %v3758_v53  }
 0x20f   : > { %v2777_v0 = vmax.f32 %v2759_v56, 0.0 }
 0x210   : > { %v2536_v5 = vpop.f32.mrf.mxu3 }
 0x211   : > { %v2827_v3 = vrot.slane %v2777_v0, 2  ;;  %v2828_v25 = vrot.slane %v2777_v0, 4  ;;  %2895 = vst [vmem:[#allocation1 + $0x21] ss:$4 sm:$0xff] %v2777_v0  ;;  %v2568_v61 = vadd.f32 %v2536_v5, %v2328_v34  ;;  %v2299_v51 = vpop.f32.mrf.mxu2 }
 0x212   : > { %v2329_v59 = vadd.f32 %v2299_v51, %v2097_v10 }
 0x213   : > { %2896 = vst [vmem:[#allocation1 + $0x22] ss:$4 sm:$0xff] %v2827_v3  ;;  %v2738_v17 = vadd.f32 %v2706_v62, %v2568_v61  ;;  %v2898_v40 = vld.sshfl [vmem:[#allocation1] sm:$0xff pattern:$0x73625140]  ;;  %v2077_v8 = vpop.f32.mrf.mxu1  ;;  %v2719_v10 = vpop.f32.mrf.mxu0 }
 0x214   : > { %2897 = vst [vmem:[#allocation1 + $0x23] ss:$4 sm:$0xff] %v2828_v25  ;;  %v2101_v4 = vadd.f32 %v2077_v8, %v4763_v9 }
 0x215   : > { %v2760_v33 = vadd.f32 %v4786_v36, %v2738_v17 }
 0x217   : > { %v2778_v21 = vmax.f32 %v2760_v33, 0.0 }
 0x218   : > { %v2539_v7 = vpop.f32.mrf.mxu3 }
 0x219   : > { %v2829_v39 = vrot.slane %v2778_v21, 2  ;;  %v2830_v31 = vrot.slane %v2778_v21, 4  ;;  %v2831_v11 = vrot.slane %v2778_v21, 6  ;;  %2900 = vst [vmem:[#allocation1] ss:$4 sm:$0xff] %v2778_v21  ;;  %v2569_v63 = vadd.f32 %v2539_v7, %v2329_v59  ;;  %v2301_v55 = vpop.f32.mrf.mxu2 }
 0x21a   : > { %v2330_v22 = vadd.f32 %v2301_v55, %v2098_v12 }
 0x21b   : > { %v2899_v45 = vld.sshfl [vmem:[#allocation1 + $0x20] sm:$0xff pattern:$0x73625140]  ;;  %2901 = vst [vmem:[#allocation1 + $0x1] ss:$4 sm:$0xff] %v2829_v39  ;;  %v2739_v24 = vadd.f32 %v2709_v16, %v2569_v63  ;;  %v2079_v61 = vpop.f32.mrf.mxu1  ;;  %v2721_v55 = vpop.f32.mrf.mxu0 }
 0x21c   : > { %v3763_v54 = vpack.c.bf16 %v2899_v45, %v2898_v40  ;;  %2902 = vst [vmem:[#allocation1 + $0x2] ss:$4 sm:$0xff] %v2830_v31  ;;  %v2102_v9 = vadd.f32 %v2079_v61, %v4770_v42 }
 0x21d   : > { %2903 = vst [vmem:[#allocation1 + $0x3] ss:$4 sm:$0xff] %v2831_v11  ;;  %v2761_v2 = vadd.f32 %v4786_v36, %v2739_v24 }
 0x21e   : > { %3792 = vst [vmem:[%s4805_s26 + $0x18] sm:$0xff] %v3763_v54  }
 0x21f   : > { %v2779_v30 = vmax.f32 %v2761_v2, 0.0 }
 0x220   : > { %v2541_v52 = vpop.f32.mrf.mxu3 }
 0x221   : > { %v2832_v28 = vrot.slane %v2779_v30, 2  ;;  %v2833_v46 = vrot.slane %v2779_v30, 4  ;;  %v2834_v58 = vrot.slane %v2779_v30, 6  ;;  %2904 = vst [vmem:[#allocation1 + $0x20] ss:$4 sm:$0xff] %v2779_v30  ;;  %v2570_v38 = vadd.f32 %v2541_v52, %v2330_v22  ;;  %v2304_v6 = vpop.f32.mrf.mxu2 }
 0x222   : > { %v2331_v57 = vadd.f32 %v2304_v6, %v2099_v32 }
 0x223   : > { %2905 = vst [vmem:[#allocation1 + $0x21] ss:$4 sm:$0xff] %v2832_v28  ;;  %v2740_v27 = vadd.f32 %v2711_v13, %v2570_v38  ;;  %v2082_v11 = vpop.f32.mrf.mxu1 }
 0x224   : > { %2906 = vst [vmem:[#allocation1 + $0x22] ss:$4 sm:$0xff] %v2833_v46  ;;  %v2908_v41 = vld.sshfl [vmem:[#allocation1] sm:$0xff pattern:$0x73625140]  ;;  %v2103_v28 = vadd.f32 %v2082_v11, %v4775_v60 }
 0x225   : > { %2907 = vst [vmem:[#allocation1 + $0x23] ss:$4 sm:$0xff] %v2834_v58  ;;  %v2762_v62 = vadd.f32 %v4786_v36, %v2740_v27  ;;  %v2724_v27 = vpop.f32.mrf.mxu0 }
 0x227   : > { %v2780_v35 = vmax.f32 %v2762_v62, 0.0 }
 0x228   : > { %v2544_v14 = vpop.f32.mrf.mxu3 }
 0x229   : > { %v2835_v20 = vrot.slane %v2780_v35, 2  ;;  %v2836_v48 = vrot.slane %v2780_v35, 4  ;;  %v2837_v26 = vrot.slane %v2780_v35, 6  ;;  %v2571_v43 = vadd.f32 %v2544_v14, %v2331_v57  ;;  %v2306_v15 = vpop.f32.mrf.mxu2 }
 0x22a   : > { %v2332_v53 = vadd.f32 %v2306_v15, %v2100_v19 }
 0x22b   : > { %2910 = vst [vmem:[#allocation1] ss:$4 sm:$0xff] %v2835_v20  ;;  %v2741_v37 = vadd.f32 %v2714_v29, %v2571_v43  ;;  %v2084_v38 = vpop.f32.mrf.mxu1 }
 0x22c   : > { %v2909_v47 = vld.sshfl [vmem:[#allocation1 + $0x20] sm:$0xff pattern:$0x73625140]  ;;  %2911 = vst [vmem:[#allocation1 + $0x1] ss:$4 sm:$0xff] %v2836_v48  ;;  %v2104_v8 = vadd.f32 %v2084_v38, %v4781_v1 }
 0x22d   : > { %v3768_v50 = vpack.c.bf16 %v2909_v47, %v2908_v41  ;;  %2912 = vst [vmem:[#allocation1 + $0x2] ss:$4 sm:$0xff] %v2837_v26  ;;  %v2763_v49 = vadd.f32 %v4786_v36, %v2741_v37  ;;  %v2726_v47 = vpop.f32.mrf.mxu0 }
 0x22f   : > { %3793 = vst [vmem:[%s4805_s26 + $0x20] sm:$0xff] %v3768_v50   ;;  %v2781_v16 = vmax.f32 %v2763_v49, 0.0 }
 0x230   : > { %v2546_v56 = vpop.f32.mrf.mxu3 }
 0x231   : > { %v2838_v34 = vrot.slane %v2781_v16, 2  ;;  %v2839_v0 = vrot.slane %v2781_v16, 4  ;;  %v2840_v5 = vrot.slane %v2781_v16, 6  ;;  %2913 = vst [vmem:[#allocation1 + $0x3] ss:$4 sm:$0xff] %v2781_v16  ;;  %v2572_v3 = vadd.f32 %v2546_v56, %v2332_v53  ;;  %v2309_v25 = vpop.f32.mrf.mxu2 }
 0x232   : > { %v2333_v18 = vadd.f32 %v2309_v25, %v2101_v4 }
 0x233   : > { %2914 = vst [vmem:[#allocation1 + $0x20] ss:$4 sm:$0xff] %v2838_v34  ;;  %v2742_v51 = vadd.f32 %v2716_v23, %v2572_v3 }
 0x234   : > { %2915 = vst [vmem:[#allocation1 + $0x21] ss:$4 sm:$0xff] %v2839_v0 }
 0x235   : > { %2916 = vst [vmem:[#allocation1 + $0x22] ss:$4 sm:$0xff] %v2840_v5  ;;  %v2764_v17 = vadd.f32 %v4786_v36, %v2742_v51 }
 0x237   : > { %v2782_v33 = vmax.f32 %v2764_v17, 0.0 }
 0x238   : > { %v2549_v59 = vpop.f32.mrf.mxu3  ;;  %v2918_v7 = vld.sshfl [vmem:[#allocation1] sm:$0xff pattern:$0x73625140] }
 0x239   : > { %v2841_v13 = vrot.slane %v2782_v33, 4  ;;  %v2842_v21 = vrot.slane %v2782_v33, 6  ;;  %2917 = vst [vmem:[#allocation1 + $0x23] ss:$4 sm:$0xff] %v2782_v33  ;;  %v2573_v40 = vadd.f32 %v2549_v59, %v2333_v18  ;;  %v2311_v39 = vpop.f32.mrf.mxu2 }
 0x23a   : > { %v2334_v12 = vadd.f32 %v2311_v39, %v2102_v9 }
 0x23b   : > { %2920 = vst [vmem:[#allocation1] ss:$4 sm:$0xff] %v2841_v13  ;;  %v2743_v31 = vadd.f32 %v2719_v10, %v2573_v40 }
 0x23c   : > { %2921 = vst [vmem:[#allocation1 + $0x1] ss:$4 sm:$0xff] %v2842_v21 }
 0x23d   : > { %v2765_v63 = vadd.f32 %v4786_v36, %v2743_v31 }
 0x23f   : > { %v2783_v45 = vmax.f32 %v2765_v63, 0.0 }
 0x240   : > { %v2919_v24 = vld.sshfl [vmem:[#allocation1 + $0x20] sm:$0xff pattern:$0x73625140]  ;;  %v2551_v54 = vpop.f32.mrf.mxu3 }
 0x241   : > { %v3773_v2 = vpack.c.bf16 %v2919_v24, %v2918_v7  ;;  %v2843_v22 = vrot.slane %v2783_v45, 2  ;;  %v2844_v44 = vrot.slane %v2783_v45, 4  ;;  %2922 = vst [vmem:[#allocation1 + $0x2] ss:$4 sm:$0xff] %v2783_v45  ;;  %v2845_v30 = vrot.slane %v2783_v45, 6  ;;  %v2314_v29 = vpop.f32.mrf.mxu2 }
 0x242   : > { %v2574_v52 = vadd.f32 %v2551_v54, %v2334_v12  ;;  %v2335_v46 = vadd.f32 %v2314_v29, %v2103_v28 }
 0x243   : > { %3794 = vst [vmem:[%s4805_s26 + $0x28] sm:$0xff] %v3773_v2  }
 0x244   : > { %2923 = vst [vmem:[#allocation1 + $0x3] ss:$4 sm:$0xff] %v2843_v22  ;;  %v2744_v42 = vadd.f32 %v2721_v55, %v2574_v52 }
 0x245   : > { %2924 = vst [vmem:[#allocation1 + $0x20] ss:$4 sm:$0xff] %v2844_v44 }
 0x246   : > { %2925 = vst [vmem:[#allocation1 + $0x21] ss:$4 sm:$0xff] %v2845_v30  ;;  %v2766_v58 = vadd.f32 %v4786_v36, %v2744_v42 }
 0x248   : > { %v2784_v6 = vmax.f32 %v2766_v58, 0.0  ;;  %v2554_v32 = vpop.f32.mrf.mxu3 }
 0x249   : > { %v2575_v62 = vadd.f32 %v2554_v32, %v2335_v46  ;;  %v2316_v14 = vpop.f32.mrf.mxu2 }
 0x24a   : > { %v2846_v57 = vrot.slane %v2784_v6, 2  ;;  %v2847_v35 = vrot.slane %v2784_v6, 6  ;;  %2926 = vst [vmem:[#allocation1 + $0x22] ss:$4 sm:$0xff] %v2784_v6  ;;  %v2336_v26 = vadd.f32 %v2316_v14, %v2104_v8 }
 0x24b   : > { %v2928_v60 = vld.sshfl [vmem:[#allocation1] sm:$0xff pattern:$0x73625140]  ;;  %v2745_v20 = vadd.f32 %v2724_v27, %v2575_v62 }
 0x24c   : > { %2927 = vst [vmem:[#allocation1 + $0x23] ss:$4 sm:$0xff] %v2846_v57 }
 0x24d   : > { %2930 = vst [vmem:[#allocation1] ss:$4 sm:$0xff] %v2847_v35  ;;  %v2767_v48 = vadd.f32 %v4786_v36, %v2745_v20 }
 0x24f   : > { %v2785_v43 = vmax.f32 %v2767_v48, 0.0 }
 0x250   : > { %v2556_v41 = vpop.f32.mrf.mxu3 }
 0x251   : > { %v2848_v23 = vrot.slane %v2785_v43, 2  ;;  %v2849_v15 = vrot.slane %v2785_v43, 4  ;;  %v2850_v19 = vrot.slane %v2785_v43, 6  ;;  %2931 = vst [vmem:[#allocation1 + $0x1] ss:$4 sm:$0xff] %v2785_v43  ;;  %v2576_v37 = vadd.f32 %v2556_v41, %v2336_v26 }
 0x253   : > { %v2929_v50 = vld.sshfl [vmem:[#allocation1 + $0x20] sm:$0xff pattern:$0x73625140]  ;;  %2932 = vst [vmem:[#allocation1 + $0x2] ss:$4 sm:$0xff] %v2848_v23  ;;  %v2746_v1 = vadd.f32 %v2726_v47, %v2576_v37 }
 0x254   : > { %v3778_v49 = vpack.c.bf16 %v2929_v50, %v2928_v60  ;;  %2933 = vst [vmem:[#allocation1 + $0x3] ss:$4 sm:$0xff] %v2849_v15 }
 0x255   : > { %2934 = vst [vmem:[#allocation1 + $0x20] ss:$4 sm:$0xff] %v2850_v19  ;;  %v2768_v53 = vadd.f32 %v4786_v36, %v2746_v1 }
 0x256   : > { %3795 = vst [vmem:[%s4805_s26 + $0x30] sm:$0xff] %v3778_v49  }
 0x257   : > { %v2786_v16 = vmax.f32 %v2768_v53, 0.0 }
 0x259   : > { %v2851_v56 = vrot.slane %v2786_v16, 2  ;;  %v2852_v34 = vrot.slane %v2786_v16, 4  ;;  %2935 = vst [vmem:[#allocation1 + $0x21] ss:$4 sm:$0xff] %v2786_v16 }
 0x25b   : > { %2936 = vst [vmem:[#allocation1 + $0x22] ss:$4 sm:$0xff] %v2851_v56  ;;  %v2938_v0 = vld.sshfl [vmem:[#allocation1] sm:$0xff pattern:$0x73625140] }
 0x25c   : > { %2937 = vst [vmem:[#allocation1 + $0x23] ss:$4 sm:$0xff] %v2852_v34 }
 0x263   : > { %v2939_v5 = vld.sshfl [vmem:[#allocation1 + $0x20] sm:$0xff pattern:$0x73625140] }
 0x264   : > { %v3783_v3 = vpack.c.bf16 %v2939_v5, %v2938_v0 }
 0x266   : > { %3796 = vst [vmem:[%s4805_s26 + $0x38] sm:$0xff] %v3783_v3  }
 0x267 PF: > { %s14_s19 = sadd.s32 1, %s3904_s19   ;;  %s4866_s15 = smov %s3896_s17 }
 0x268   : > { %p11_p9 = scmp.ge.s32.totalorder %s14_s19, 6   ;;  %s4867_s16 = smov %s3900_s18 }
 0x269   : > { %s4868_s17 = smov %s4871_s20  ;;  %s4869_s18 = smov %s4875_s21 }
 0x26a   :  { %13 = sbr.rel (!%p11_p9) target bundleno = 3 (0x3), region = 98 }

</bundles_post_ra>
